<compile_context>
chip_gen: v6e
topology: v6e:2x2x1
jax: 0.10.0
libtpu: 0.0.40
codegen_flags: <defaults>
</compile_context>

<pallas_src>
import math
import functools

import jax
import jax.numpy as jnp
from jax import lax
from jax.experimental import pallas as pl
from jax.experimental.pallas import tpu as pltpu

_LN_EPS = 1e-6


# ----------------------------------------------------------------------------
# In-kernel helpers (traced inside the single fused Pallas kernel body)
# ----------------------------------------------------------------------------

def _layernorm(z, a, b):
    """Reference LayerNorm: a*(z-mean)/(std+eps)+b, torch-style unbiased std
    (divide by D-1), eps OUTSIDE the sqrt — matches the module's LayerNorm."""
    d = z.shape[-1]
    mean = jnp.mean(z, axis=-1, keepdims=True)
    c = z - mean
    var = jnp.sum(c * c, axis=-1, keepdims=True) * (1.0 / (d - 1))  # unbiased
    return a * c / (jnp.sqrt(var) + _LN_EPS) + b


def _mha(q_in, kv_in, wqkv, bqkv, wo, bo, h, fused_qkv):
    """Multi-head attention for one batch element.

    q_in, kv_in : (S, D) f32
    wqkv        : (D, 3D) bf16      bqkv : (1, 3D) f32
    wo          : (D, D)  bf16      bo   : (1, D)  f32
    Head outputs are concatenated in registers (no VMEM scratch).
    """
    S, D = q_in.shape
    dk = D // h
    q16 = q_in.astype(jnp.bfloat16)            # cast once, reuse for all dots

    if fused_qkv:   # self-attention: single (D,3D) MXU pass for Q, K, V
        qkv = jnp.dot(q16, wqkv, preferred_element_type=jnp.float32) + bqkv
        q, k, v = qkv[:, 0:D], qkv[:, D:2 * D], qkv[:, 2 * D:3 * D]
    else:           # cross-attention: Q from q_in, fused K|V from kv_in
        kv16 = kv_in.astype(jnp.bfloat16)
        q = jnp.dot(q16, wqkv[:, :D],
                    preferred_element_type=jnp.float32) + bqkv[:, :D]
        kv = jnp.dot(kv16, wqkv[:, D:],
                     preferred_element_type=jnp.float32) + bqkv[:, D:]
        k, v = kv[:, :D], kv[:, D:]

    inv_sqrt_dk = jnp.float32(1.0 / math.sqrt(dk))
    heads = []
    for hh in range(h):                         # h is small & static -> unrolled
        lo = hh * dk
        qh, kh, vh = q[:, lo:lo + dk], k[:, lo:lo + dk], v[:, lo:lo + dk]
        # q @ k.T without materializing a transpose (contract last dims).
        s = lax.dot_general(qh, kh, (((1,), (1,)), ((), ())),
                            preferred_element_type=jnp.float32) * inv_sqrt_dk
        m = jnp.max(s, axis=-1, keepdims=True)
        p = jnp.exp(s - m)
        p = p * pl.reciprocal(jnp.sum(p, axis=-1, keepdims=True), approx=True)
        heads.append(jnp.dot(p, vh, preferred_element_type=jnp.float32))
    o = jnp.concatenate(heads, axis=-1)                       # (S, D), in regs
    return jnp.dot(o.astype(jnp.bfloat16), wo,
                   preferred_element_type=jnp.float32) + bo


# ----------------------------------------------------------------------------
# Single fused kernel: all layers + output head for one batch element
# ----------------------------------------------------------------------------

def _decoder_kernel(mem_ref, x_ref,
                    sa_wqkv_ref, sa_bqkv_ref, sa_wo_ref, sa_bo_ref,
                    ca_wqkv_ref, ca_bqkv_ref, ca_wo_ref, ca_bo_ref,
                    w1_ref, b1_ref, w2_ref, b2_ref,
                    ln_a_ref, ln_b_ref,
                    na_ref, nb_ref, wv_ref, b0_ref,
                    wo1_ref, bo1_ref, wo2_ref, bo2_ref,
                    out_ref, *, h, num_layers):
    mem = mem_ref[0]        # (S, D) running "memory" activation
    dec_in = x_ref[0]       # (S, D) decoder input (re-fed to every layer)

    for l in range(num_layers):                 # static unroll over layers
        ln_a = ln_a_ref[l]                      # (3, D)
        ln_b = ln_b_ref[l]

        # sublayer 0: self-attention (fused QKV matmul)
        x = dec_in
        sa = _mha(x, x, sa_wqkv_ref[l], sa_bqkv_ref[l],
                  sa_wo_ref[l], sa_bo_ref[l], h, fused_qkv=True)
        x = _layernorm(x + sa, ln_a[0:1, :], ln_b[0:1, :])

        # sublayer 1: cross-attention (query = x, key/value = memory)
        ca = _mha(x, mem, ca_wqkv_ref[l], ca_bqkv_ref[l],
                  ca_wo_ref[l], ca_bo_ref[l], h, fused_qkv=False)
        x = _layernorm(x + ca, ln_a[1:2, :], ln_b[1:2, :])

        # sublayer 2: position-wise feed-forward
        hid = jnp.dot(x.astype(jnp.bfloat16), w1_ref[l],
                      preferred_element_type=jnp.float32) + b1_ref[l]
        hid = jnp.maximum(hid, 0.0)
        ff = jnp.dot(hid.astype(jnp.bfloat16), w2_ref[l],
                     preferred_element_type=jnp.float32) + b2_ref[l]
        mem = _layernorm(x + ff, ln_a[2:3, :], ln_b[2:3, :])

    # ----- output head (still inside the same kernel) -----
    normed = _layernorm(mem, na_ref[...], nb_ref[...])                    # (S, D)
    # outputLinear (D -> 1) as a lane reduction (avoids a width-1 matmul output)
    t = jnp.sum(normed * wv_ref[...], axis=-1, keepdims=True) + b0_ref[...]  # (S, 1)
    # outputLinear1 (S -> S): broadcast-multiply + sublane reduce -> (1, S)
    x1 = jnp.sum(t * wo1_ref[...], axis=0, keepdims=True) + bo1_ref[...]
    # outputLinear2 (S -> ahead)
    x2 = jnp.dot(x1, wo2_ref[...],
                 preferred_element_type=jnp.float32) + bo2_ref[...]          # (1, ahead)
    out_ref[0] = x2


# ----------------------------------------------------------------------------
# Pallas wrapper: one pallas_call for the whole forward pass
# ----------------------------------------------------------------------------

def decoder_forward_pallas(params, memory, decoder_input, *, h):
    B, S, D = memory.shape
    L = params["sa_wqkv"].shape[0]
    d_ff = params["w1"].shape[-1]
    ahead = params["w_out2"].shape[-1]

    def full(shape):
        nd = len(shape)
        return pl.BlockSpec(shape, lambda b, _nd=nd: (0,) * _nd)

    kernel = functools.partial(_decoder_kernel, h=h, num_layers=L)
    out = pl.pallas_call(
        kernel,
        out_shape=jax.ShapeDtypeStruct((B, 1, ahead), jnp.float32),
        grid=(B,),
        in_specs=[
            pl.BlockSpec((1, S, D), lambda b: (b, 0, 0)),      # memory
            pl.BlockSpec((1, S, D), lambda b: (b, 0, 0)),      # decoder input
            full((L, D, 3 * D)), full((L, 1, 3 * D)),          # self-attn fused qkv
            full((L, D, D)), full((L, 1, D)),                  # self-attn out proj
            full((L, D, 3 * D)), full((L, 1, 3 * D)),          # cross-attn fused qkv
            full((L, D, D)), full((L, 1, D)),                  # cross-attn out proj
            full((L, D, d_ff)), full((L, 1, d_ff)),            # ffn w1 / b1
            full((L, d_ff, D)), full((L, 1, D)),               # ffn w2 / b2
            full((L, 3, D)), full((L, 3, D)),                  # per-layer LN a / b
            full((1, D)), full((1, D)),                        # head LN a / b
            full((1, D)), full((1, 1)),                        # outputLinear (D->1)
            full((S, S)), full((1, S)),                        # outputLinear1
            full((S, ahead)), full((1, ahead)),                # outputLinear2
        ],
        out_specs=pl.BlockSpec((1, 1, ahead), lambda b: (b, 0, 0)),
        compiler_params=pltpu.CompilerParams(
            dimension_semantics=("parallel",)),                # v7x: 1 elem / TC
    )(memory, decoder_input,
      params["sa_wqkv"], params["sa_bqkv"], params["sa_wo"], params["sa_bo"],
      params["ca_wqkv"], params["ca_bqkv"], params["ca_wo"], params["ca_bo"],
      params["w1"], params["b1"], params["w2"], params["b2"],
      params["ln_a"], params["ln_b"],
      params["norm_a"], params["norm_b"], params["w_out_vec"], params["b_out"],
      params["w_out1"], params["b_out1"], params["w_out2"], params["b_out2"])
    return out.reshape(B, ahead)


# ----------------------------------------------------------------------------
# Deterministic parameter init (mean weights, matching the module's structure)
# ----------------------------------------------------------------------------

def _init_linear(key, d_in, d_out):
    kw, kb = jax.random.split(key)
    w = jax.random.normal(kw, (d_in, d_out), jnp.float32) / jnp.sqrt(
        jnp.float32(d_in))
    b = 0.01 * jax.random.normal(kb, (d_out,), jnp.float32)
    return w, b


def init_decoder_params(key, num_layers, d_model, d_ff, window_length, ahead):
    names = ["sa_wqkv", "sa_bqkv", "sa_wo", "sa_bo",
             "ca_wqkv", "ca_bqkv", "ca_wo", "ca_bo",
             "w1", "b1", "w2", "b2", "ln_a", "ln_b"]
    acc = {n: [] for n in names}

    for _ in range(num_layers):
        key, *ks = jax.random.split(key, 11)

        def fused_qkv(k0, k1, k2):
            wq, bq = _init_linear(k0, d_model, d_model)
            wk, bk = _init_linear(k1, d_model, d_model)
            wv, bv = _init_linear(k2, d_model, d_model)
            w = jnp.concatenate([wq, wk, wv], axis=1).astype(jnp.bfloat16)
            b = jnp.concatenate([bq, bk, bv]).reshape(1, -1)
            return w, b

        w, b = fused_qkv(ks[0], ks[1], ks[2])
        acc["sa_wqkv"].append(w); acc["sa_bqkv"].append(b)
        wo, bo = _init_linear(ks[3], d_model, d_model)
        acc["sa_wo"].append(wo.astype(jnp.bfloat16))
        acc["sa_bo"].append(bo.reshape(1, -1))

        w, b = fused_qkv(ks[4], ks[5], ks[6])
        acc["ca_wqkv"].append(w); acc["ca_bqkv"].append(b)
        wo, bo = _init_linear(ks[7], d_model, d_model)
        acc["ca_wo"].append(wo.astype(jnp.bfloat16))
        acc["ca_bo"].append(bo.reshape(1, -1))

        w1, b1 = _init_linear(ks[8], d_model, d_ff)
        w2, b2 = _init_linear(ks[9], d_ff, d_model)
        acc["w1"].append(w1.astype(jnp.bfloat16)); acc["b1"].append(b1.reshape(1, -1))
        acc["w2"].append(w2.astype(jnp.bfloat16)); acc["b2"].append(b2.reshape(1, -1))

        acc["ln_a"].append(jnp.ones((3, d_model), jnp.float32))
        acc["ln_b"].append(jnp.zeros((3, d_model), jnp.float32))

    params = {n: jnp.stack(v, axis=0) for n, v in acc.items()}

    key, k1, k2, k3 = jax.random.split(key, 4)
    w_out, b_out = _init_linear(k1, d_model, 1)
    w_out1, b_out1 = _init_linear(k2, window_length, window_length)
    w_out2, b_out2 = _init_linear(k3, window_length, ahead)
    params.update({
        "norm_a": jnp.ones((1, d_model), jnp.float32),
        "norm_b": jnp.zeros((1, d_model), jnp.float32),
        "w_out_vec": w_out.reshape(1, d_model),
        "b_out": b_out.reshape(1, 1),
        "w_out1": w_out1,
        "b_out1": b_out1.reshape(1, -1),
        "w_out2": w_out2,
        "b_out2": b_out2.reshape(1, -1),
    })
    return params


# ----------------------------------------------------------------------------
# main
# ----------------------------------------------------------------------------

if __name__ == "__main__":
    B = 2                 # batch
    S = 8                 # sequence length == window_length
    D_MODEL = 32
    H = 4                 # heads (d_model % h == 0 -> d_k = 8)
    D_FF = 64
    NUM_LAYERS = 2
    AHEAD = 4

    key = jax.random.PRNGKey(0)
    k_mem, k_dec, k_par = jax.random.split(key, 3)

    memory = jax.random.normal(k_mem, (B, S, D_MODEL), jnp.float32)
    decoder_input = jax.random.normal(k_dec, (B, S, D_MODEL), jnp.float32)

    params = init_decoder_params(k_par, NUM_LAYERS, D_MODEL, D_FF, S, AHEAD)

    fwd = jax.jit(functools.partial(decoder_forward_pallas, h=H))
    out = jax.block_until_ready(fwd(params, memory, decoder_input))

    assert out.shape == (B, AHEAD), out.shape
    assert bool(jnp.all(jnp.isfinite(out)))
    print("KERNEL_OK")
</pallas_src>

<mosaic_0001>
module attributes {stable_mosaic.version = 11 : i64} {
  func.func @_decoder_kernel(%arg0: i32, %arg1: memref<1x8x32xf32, #tpu.memory_space<vmem>>, %arg2: memref<1x8x32xf32, #tpu.memory_space<vmem>>, %arg3: memref<2x32x96xbf16, #tpu.memory_space<vmem>>, %arg4: memref<2x1x96xf32, #tpu.memory_space<vmem>>, %arg5: memref<2x32x32xbf16, #tpu.memory_space<vmem>>, %arg6: memref<2x1x32xf32, #tpu.memory_space<vmem>>, %arg7: memref<2x32x96xbf16, #tpu.memory_space<vmem>>, %arg8: memref<2x1x96xf32, #tpu.memory_space<vmem>>, %arg9: memref<2x32x32xbf16, #tpu.memory_space<vmem>>, %arg10: memref<2x1x32xf32, #tpu.memory_space<vmem>>, %arg11: memref<2x32x64xbf16, #tpu.memory_space<vmem>>, %arg12: memref<2x1x64xf32, #tpu.memory_space<vmem>>, %arg13: memref<2x64x32xbf16, #tpu.memory_space<vmem>>, %arg14: memref<2x1x32xf32, #tpu.memory_space<vmem>>, %arg15: memref<2x3x32xf32, #tpu.memory_space<vmem>>, %arg16: memref<2x3x32xf32, #tpu.memory_space<vmem>>, %arg17: memref<1x32xf32, #tpu.memory_space<vmem>>, %arg18: memref<1x32xf32, #tpu.memory_space<vmem>>, %arg19: memref<1x32xf32, #tpu.memory_space<vmem>>, %arg20: memref<1x1xf32, #tpu.memory_space<vmem>>, %arg21: memref<8x8xf32, #tpu.memory_space<vmem>>, %arg22: memref<1x8xf32, #tpu.memory_space<vmem>>, %arg23: memref<8x4xf32, #tpu.memory_space<vmem>>, %arg24: memref<1x4xf32, #tpu.memory_space<vmem>>, %arg25: memref<1x1x4xf32, #tpu.memory_space<vmem>>) attributes {dimension_semantics = [#tpu.dimension_semantics<parallel>], iteration_bounds = array<i64: 2>, scalar_prefetch = 0 : i64, scratch_operands = 0 : i64, tpu.core_type = #tpu.core_type<tc>, window_params = [{transform_indices = @transform_0, window_bounds = array<i64: 1, 8, 32>}, {transform_indices = @transform_1, window_bounds = array<i64: 1, 8, 32>}, {pipeline_mode = #tpu.pipeline_mode<synchronous>, transform_indices = @transform_2, window_bounds = array<i64: 2, 32, 96>}, {pipeline_mode = #tpu.pipeline_mode<synchronous>, transform_indices = @transform_3, window_bounds = array<i64: 2, 1, 96>}, {pipeline_mode = #tpu.pipeline_mode<synchronous>, transform_indices = @transform_4, window_bounds = array<i64: 2, 32, 32>}, {pipeline_mode = #tpu.pipeline_mode<synchronous>, transform_indices = @transform_5, window_bounds = array<i64: 2, 1, 32>}, {pipeline_mode = #tpu.pipeline_mode<synchronous>, transform_indices = @transform_6, window_bounds = array<i64: 2, 32, 96>}, {pipeline_mode = #tpu.pipeline_mode<synchronous>, transform_indices = @transform_7, window_bounds = array<i64: 2, 1, 96>}, {pipeline_mode = #tpu.pipeline_mode<synchronous>, transform_indices = @transform_8, window_bounds = array<i64: 2, 32, 32>}, {pipeline_mode = #tpu.pipeline_mode<synchronous>, transform_indices = @transform_9, window_bounds = array<i64: 2, 1, 32>}, {pipeline_mode = #tpu.pipeline_mode<synchronous>, transform_indices = @transform_10, window_bounds = array<i64: 2, 32, 64>}, {pipeline_mode = #tpu.pipeline_mode<synchronous>, transform_indices = @transform_11, window_bounds = array<i64: 2, 1, 64>}, {pipeline_mode = #tpu.pipeline_mode<synchronous>, transform_indices = @transform_12, window_bounds = array<i64: 2, 64, 32>}, {pipeline_mode = #tpu.pipeline_mode<synchronous>, transform_indices = @transform_13, window_bounds = array<i64: 2, 1, 32>}, {pipeline_mode = #tpu.pipeline_mode<synchronous>, transform_indices = @transform_14, window_bounds = array<i64: 2, 3, 32>}, {pipeline_mode = #tpu.pipeline_mode<synchronous>, transform_indices = @transform_15, window_bounds = array<i64: 2, 3, 32>}, {pipeline_mode = #tpu.pipeline_mode<synchronous>, transform_indices = @transform_16, window_bounds = array<i64: 1, 32>}, {pipeline_mode = #tpu.pipeline_mode<synchronous>, transform_indices = @transform_17, window_bounds = array<i64: 1, 32>}, {pipeline_mode = #tpu.pipeline_mode<synchronous>, transform_indices = @transform_18, window_bounds = array<i64: 1, 32>}, {pipeline_mode = #tpu.pipeline_mode<synchronous>, transform_indices = @transform_19, window_bounds = array<i64: 1, 1>}, {pipeline_mode = #tpu.pipeline_mode<synchronous>, transform_indices = @transform_20, window_bounds = array<i64: 8, 8>}, {pipeline_mode = #tpu.pipeline_mode<synchronous>, transform_indices = @transform_21, window_bounds = array<i64: 1, 8>}, {pipeline_mode = #tpu.pipeline_mode<synchronous>, transform_indices = @transform_22, window_bounds = array<i64: 8, 4>}, {pipeline_mode = #tpu.pipeline_mode<synchronous>, transform_indices = @transform_23, window_bounds = array<i64: 1, 4>}, {transform_indices = @transform_24, window_bounds = array<i64: 1, 1, 4>}]} {
    %c0 = arith.constant 0 : index
    %c0_0 = arith.constant 0 : index
    %c0_1 = arith.constant 0 : index
    %0 = vector.load %arg1[%c0, %c0_0, %c0_1] : memref<1x8x32xf32, #tpu.memory_space<vmem>>, vector<1x8x32xf32>
    %1 = vector.shape_cast %0 : vector<1x8x32xf32> to vector<8x32xf32>
    %c0_2 = arith.constant 0 : index
    %c0_3 = arith.constant 0 : index
    %c0_4 = arith.constant 0 : index
    %2 = vector.load %arg2[%c0_2, %c0_3, %c0_4] : memref<1x8x32xf32, #tpu.memory_space<vmem>>, vector<1x8x32xf32>
    %3 = vector.shape_cast %2 : vector<1x8x32xf32> to vector<8x32xf32>
    %c0_5 = arith.constant 0 : index
    %c0_6 = arith.constant 0 : index
    %c0_7 = arith.constant 0 : index
    %4 = vector.load %arg15[%c0_5, %c0_6, %c0_7] : memref<2x3x32xf32, #tpu.memory_space<vmem>>, vector<1x3x32xf32>
    %5 = vector.shape_cast %4 : vector<1x3x32xf32> to vector<3x32xf32>
    %c0_8 = arith.constant 0 : index
    %c0_9 = arith.constant 0 : index
    %c0_10 = arith.constant 0 : index
    %6 = vector.load %arg16[%c0_8, %c0_9, %c0_10] : memref<2x3x32xf32, #tpu.memory_space<vmem>>, vector<1x3x32xf32>
    %7 = vector.shape_cast %6 : vector<1x3x32xf32> to vector<3x32xf32>
    %c0_11 = arith.constant 0 : index
    %c0_12 = arith.constant 0 : index
    %c0_13 = arith.constant 0 : index
    %8 = vector.load %arg3[%c0_11, %c0_12, %c0_13] : memref<2x32x96xbf16, #tpu.memory_space<vmem>>, vector<1x32x96xbf16>
    %9 = vector.shape_cast %8 : vector<1x32x96xbf16> to vector<32x96xbf16>
    %c0_14 = arith.constant 0 : index
    %c0_15 = arith.constant 0 : index
    %c0_16 = arith.constant 0 : index
    %10 = vector.load %arg4[%c0_14, %c0_15, %c0_16] : memref<2x1x96xf32, #tpu.memory_space<vmem>>, vector<1x1x96xf32>
    %11 = vector.shape_cast %10 : vector<1x1x96xf32> to vector<1x96xf32>
    %c0_17 = arith.constant 0 : index
    %c0_18 = arith.constant 0 : index
    %c0_19 = arith.constant 0 : index
    %12 = vector.load %arg5[%c0_17, %c0_18, %c0_19] : memref<2x32x32xbf16, #tpu.memory_space<vmem>>, vector<1x32x32xbf16>
    %13 = vector.shape_cast %12 : vector<1x32x32xbf16> to vector<32x32xbf16>
    %c0_20 = arith.constant 0 : index
    %c0_21 = arith.constant 0 : index
    %c0_22 = arith.constant 0 : index
    %14 = vector.load %arg6[%c0_20, %c0_21, %c0_22] : memref<2x1x32xf32, #tpu.memory_space<vmem>>, vector<1x1x32xf32>
    %15 = vector.shape_cast %14 : vector<1x1x32xf32> to vector<1x32xf32>
    %16 = arith.truncf %3 : vector<8x32xf32> to vector<8x32xbf16>
    %cst = arith.constant dense<0.000000e+00> : vector<8x96xf32>
    %17 = tpu.matmul %16, %9, %cst {dimension_numbers = #tpu.dot_dimension_numbers<[1], [0], [0], [1], [0, 0, 1, 1], [], []>} : vector<8x32xbf16>, vector<32x96xbf16>, vector<8x96xf32> -> vector<8x96xf32>
    %18 = vector.broadcast %11 : vector<1x96xf32> to vector<8x96xf32>
    %19 = arith.addf %17, %18 : vector<8x96xf32>
    %20 = vector.extract_strided_slice %19 {offsets = [0, 0], sizes = [8, 32], strides = [1, 1]} : vector<8x96xf32> to vector<8x32xf32>
    %21 = vector.extract_strided_slice %19 {offsets = [0, 32], sizes = [8, 32], strides = [1, 1]} : vector<8x96xf32> to vector<8x32xf32>
    %22 = vector.extract_strided_slice %19 {offsets = [0, 64], sizes = [8, 32], strides = [1, 1]} : vector<8x96xf32> to vector<8x32xf32>
    %23 = vector.extract_strided_slice %20 {offsets = [0, 0], sizes = [8, 8], strides = [1, 1]} : vector<8x32xf32> to vector<8x8xf32>
    %24 = vector.extract_strided_slice %21 {offsets = [0, 0], sizes = [8, 8], strides = [1, 1]} : vector<8x32xf32> to vector<8x8xf32>
    %25 = vector.extract_strided_slice %22 {offsets = [0, 0], sizes = [8, 8], strides = [1, 1]} : vector<8x32xf32> to vector<8x8xf32>
    %cst_23 = arith.constant dense<0.000000e+00> : vector<8x8xf32>
    %26 = tpu.matmul %23, %24, %cst_23 {dimension_numbers = #tpu.dot_dimension_numbers<[1], [1], [0], [0], [0, 0, 1, 0], [], []>} : vector<8x8xf32>, vector<8x8xf32>, vector<8x8xf32> -> vector<8x8xf32>
    %cst_24 = arith.constant 0.353553385 : f32
    %27 = vector.broadcast %cst_24 : f32 to vector<8x8xf32>
    %28 = arith.mulf %26, %27 : vector<8x8xf32>
    %cst_25 = arith.constant dense<0xFF800000> : vector<8xf32>
    %29 = vector.multi_reduction <maximumf>, %28, %cst_25 [1] : vector<8x8xf32> to vector<8xf32>
    %30 = vector.shape_cast %29 : vector<8xf32> to vector<8x1xf32>
    %31 = vector.broadcast %30 : vector<8x1xf32> to vector<8x8xf32>
    %32 = arith.subf %28, %31 : vector<8x8xf32>
    %33 = math.exp %32 : vector<8x8xf32>
    %cst_26 = arith.constant dense<0.000000e+00> : vector<8xf32>
    %34 = vector.multi_reduction <add>, %33, %cst_26 [1] : vector<8x8xf32> to vector<8xf32>
    %35 = vector.shape_cast %34 : vector<8xf32> to vector<8x1xf32>
    %36 = tpu.reciprocal %35 {approx = true} : vector<8x1xf32> -> vector<8x1xf32>
    %37 = vector.broadcast %36 : vector<8x1xf32> to vector<8x8xf32>
    %38 = arith.mulf %33, %37 : vector<8x8xf32>
    %cst_27 = arith.constant dense<0.000000e+00> : vector<8x8xf32>
    %39 = tpu.matmul %38, %25, %cst_27 {dimension_numbers = #tpu.dot_dimension_numbers<[1], [0], [0], [1], [0, 0, 1, 1], [], []>} : vector<8x8xf32>, vector<8x8xf32>, vector<8x8xf32> -> vector<8x8xf32>
    %40 = vector.extract_strided_slice %20 {offsets = [0, 8], sizes = [8, 8], strides = [1, 1]} : vector<8x32xf32> to vector<8x8xf32>
    %41 = vector.extract_strided_slice %21 {offsets = [0, 8], sizes = [8, 8], strides = [1, 1]} : vector<8x32xf32> to vector<8x8xf32>
    %42 = vector.extract_strided_slice %22 {offsets = [0, 8], sizes = [8, 8], strides = [1, 1]} : vector<8x32xf32> to vector<8x8xf32>
    %cst_28 = arith.constant dense<0.000000e+00> : vector<8x8xf32>
    %43 = tpu.matmul %40, %41, %cst_28 {dimension_numbers = #tpu.dot_dimension_numbers<[1], [1], [0], [0], [0, 0, 1, 0], [], []>} : vector<8x8xf32>, vector<8x8xf32>, vector<8x8xf32> -> vector<8x8xf32>
    %cst_29 = arith.constant 0.353553385 : f32
    %44 = vector.broadcast %cst_29 : f32 to vector<8x8xf32>
    %45 = arith.mulf %43, %44 : vector<8x8xf32>
    %cst_30 = arith.constant dense<0xFF800000> : vector<8xf32>
    %46 = vector.multi_reduction <maximumf>, %45, %cst_30 [1] : vector<8x8xf32> to vector<8xf32>
    %47 = vector.shape_cast %46 : vector<8xf32> to vector<8x1xf32>
    %48 = vector.broadcast %47 : vector<8x1xf32> to vector<8x8xf32>
    %49 = arith.subf %45, %48 : vector<8x8xf32>
    %50 = math.exp %49 : vector<8x8xf32>
    %cst_31 = arith.constant dense<0.000000e+00> : vector<8xf32>
    %51 = vector.multi_reduction <add>, %50, %cst_31 [1] : vector<8x8xf32> to vector<8xf32>
    %52 = vector.shape_cast %51 : vector<8xf32> to vector<8x1xf32>
    %53 = tpu.reciprocal %52 {approx = true} : vector<8x1xf32> -> vector<8x1xf32>
    %54 = vector.broadcast %53 : vector<8x1xf32> to vector<8x8xf32>
    %55 = arith.mulf %50, %54 : vector<8x8xf32>
    %cst_32 = arith.constant dense<0.000000e+00> : vector<8x8xf32>
    %56 = tpu.matmul %55, %42, %cst_32 {dimension_numbers = #tpu.dot_dimension_numbers<[1], [0], [0], [1], [0, 0, 1, 1], [], []>} : vector<8x8xf32>, vector<8x8xf32>, vector<8x8xf32> -> vector<8x8xf32>
    %57 = vector.extract_strided_slice %20 {offsets = [0, 16], sizes = [8, 8], strides = [1, 1]} : vector<8x32xf32> to vector<8x8xf32>
    %58 = vector.extract_strided_slice %21 {offsets = [0, 16], sizes = [8, 8], strides = [1, 1]} : vector<8x32xf32> to vector<8x8xf32>
    %59 = vector.extract_strided_slice %22 {offsets = [0, 16], sizes = [8, 8], strides = [1, 1]} : vector<8x32xf32> to vector<8x8xf32>
    %cst_33 = arith.constant dense<0.000000e+00> : vector<8x8xf32>
    %60 = tpu.matmul %57, %58, %cst_33 {dimension_numbers = #tpu.dot_dimension_numbers<[1], [1], [0], [0], [0, 0, 1, 0], [], []>} : vector<8x8xf32>, vector<8x8xf32>, vector<8x8xf32> -> vector<8x8xf32>
    %cst_34 = arith.constant 0.353553385 : f32
    %61 = vector.broadcast %cst_34 : f32 to vector<8x8xf32>
    %62 = arith.mulf %60, %61 : vector<8x8xf32>
    %cst_35 = arith.constant dense<0xFF800000> : vector<8xf32>
    %63 = vector.multi_reduction <maximumf>, %62, %cst_35 [1] : vector<8x8xf32> to vector<8xf32>
    %64 = vector.shape_cast %63 : vector<8xf32> to vector<8x1xf32>
    %65 = vector.broadcast %64 : vector<8x1xf32> to vector<8x8xf32>
    %66 = arith.subf %62, %65 : vector<8x8xf32>
    %67 = math.exp %66 : vector<8x8xf32>
    %cst_36 = arith.constant dense<0.000000e+00> : vector<8xf32>
    %68 = vector.multi_reduction <add>, %67, %cst_36 [1] : vector<8x8xf32> to vector<8xf32>
    %69 = vector.shape_cast %68 : vector<8xf32> to vector<8x1xf32>
    %70 = tpu.reciprocal %69 {approx = true} : vector<8x1xf32> -> vector<8x1xf32>
    %71 = vector.broadcast %70 : vector<8x1xf32> to vector<8x8xf32>
    %72 = arith.mulf %67, %71 : vector<8x8xf32>
    %cst_37 = arith.constant dense<0.000000e+00> : vector<8x8xf32>
    %73 = tpu.matmul %72, %59, %cst_37 {dimension_numbers = #tpu.dot_dimension_numbers<[1], [0], [0], [1], [0, 0, 1, 1], [], []>} : vector<8x8xf32>, vector<8x8xf32>, vector<8x8xf32> -> vector<8x8xf32>
    %74 = vector.extract_strided_slice %20 {offsets = [0, 24], sizes = [8, 8], strides = [1, 1]} : vector<8x32xf32> to vector<8x8xf32>
    %75 = vector.extract_strided_slice %21 {offsets = [0, 24], sizes = [8, 8], strides = [1, 1]} : vector<8x32xf32> to vector<8x8xf32>
    %76 = vector.extract_strided_slice %22 {offsets = [0, 24], sizes = [8, 8], strides = [1, 1]} : vector<8x32xf32> to vector<8x8xf32>
    %cst_38 = arith.constant dense<0.000000e+00> : vector<8x8xf32>
    %77 = tpu.matmul %74, %75, %cst_38 {dimension_numbers = #tpu.dot_dimension_numbers<[1], [1], [0], [0], [0, 0, 1, 0], [], []>} : vector<8x8xf32>, vector<8x8xf32>, vector<8x8xf32> -> vector<8x8xf32>
    %cst_39 = arith.constant 0.353553385 : f32
    %78 = vector.broadcast %cst_39 : f32 to vector<8x8xf32>
    %79 = arith.mulf %77, %78 : vector<8x8xf32>
    %cst_40 = arith.constant dense<0xFF800000> : vector<8xf32>
    %80 = vector.multi_reduction <maximumf>, %79, %cst_40 [1] : vector<8x8xf32> to vector<8xf32>
    %81 = vector.shape_cast %80 : vector<8xf32> to vector<8x1xf32>
    %82 = vector.broadcast %81 : vector<8x1xf32> to vector<8x8xf32>
    %83 = arith.subf %79, %82 : vector<8x8xf32>
    %84 = math.exp %83 : vector<8x8xf32>
    %cst_41 = arith.constant dense<0.000000e+00> : vector<8xf32>
    %85 = vector.multi_reduction <add>, %84, %cst_41 [1] : vector<8x8xf32> to vector<8xf32>
    %86 = vector.shape_cast %85 : vector<8xf32> to vector<8x1xf32>
    %87 = tpu.reciprocal %86 {approx = true} : vector<8x1xf32> -> vector<8x1xf32>
    %88 = vector.broadcast %87 : vector<8x1xf32> to vector<8x8xf32>
    %89 = arith.mulf %84, %88 : vector<8x8xf32>
    %cst_42 = arith.constant dense<0.000000e+00> : vector<8x8xf32>
    %90 = tpu.matmul %89, %76, %cst_42 {dimension_numbers = #tpu.dot_dimension_numbers<[1], [0], [0], [1], [0, 0, 1, 1], [], []>} : vector<8x8xf32>, vector<8x8xf32>, vector<8x8xf32> -> vector<8x8xf32>
    %91 = tpu.concatenate %39, %56, %73, %90 in 1 : vector<8x8xf32>, vector<8x8xf32>, vector<8x8xf32>, vector<8x8xf32> -> vector<8x32xf32>
    %92 = arith.truncf %91 : vector<8x32xf32> to vector<8x32xbf16>
    %cst_43 = arith.constant dense<0.000000e+00> : vector<8x32xf32>
    %93 = tpu.matmul %92, %13, %cst_43 {dimension_numbers = #tpu.dot_dimension_numbers<[1], [0], [0], [1], [0, 0, 1, 1], [], []>} : vector<8x32xbf16>, vector<32x32xbf16>, vector<8x32xf32> -> vector<8x32xf32>
    %94 = vector.broadcast %15 : vector<1x32xf32> to vector<8x32xf32>
    %95 = arith.addf %93, %94 : vector<8x32xf32>
    %96 = arith.addf %3, %95 : vector<8x32xf32>
    %97 = vector.extract_strided_slice %5 {offsets = [0, 0], sizes = [1, 32], strides = [1, 1]} : vector<3x32xf32> to vector<1x32xf32>
    %98 = vector.extract_strided_slice %7 {offsets = [0, 0], sizes = [1, 32], strides = [1, 1]} : vector<3x32xf32> to vector<1x32xf32>
    %cst_44 = arith.constant dense<0.000000e+00> : vector<8xf32>
    %99 = vector.multi_reduction <add>, %96, %cst_44 [1] : vector<8x32xf32> to vector<8xf32>
    %100 = vector.shape_cast %99 : vector<8xf32> to vector<8x1xf32>
    %cst_45 = arith.constant 3.200000e+01 : f32
    %101 = vector.broadcast %cst_45 : f32 to vector<8x1xf32>
    %102 = arith.divf %100, %101 : vector<8x1xf32>
    %103 = vector.broadcast %102 : vector<8x1xf32> to vector<8x32xf32>
    %104 = arith.subf %96, %103 : vector<8x32xf32>
    %105 = arith.mulf %104, %104 : vector<8x32xf32>
    %cst_46 = arith.constant dense<0.000000e+00> : vector<8xf32>
    %106 = vector.multi_reduction <add>, %105, %cst_46 [1] : vector<8x32xf32> to vector<8xf32>
    %107 = vector.shape_cast %106 : vector<8xf32> to vector<8x1xf32>
    %cst_47 = arith.constant 0.0322580636 : f32
    %108 = vector.broadcast %cst_47 : f32 to vector<8x1xf32>
    %109 = arith.mulf %107, %108 : vector<8x1xf32>
    %110 = vector.broadcast %97 : vector<1x32xf32> to vector<8x32xf32>
    %111 = arith.mulf %110, %104 : vector<8x32xf32>
    %112 = math.sqrt %109 : vector<8x1xf32>
    %cst_48 = arith.constant 9.99999997E-7 : f32
    %113 = vector.broadcast %cst_48 : f32 to vector<8x1xf32>
    %114 = arith.addf %112, %113 : vector<8x1xf32>
    %115 = vector.broadcast %114 : vector<8x1xf32> to vector<8x32xf32>
    %116 = arith.divf %111, %115 : vector<8x32xf32>
    %117 = vector.broadcast %98 : vector<1x32xf32> to vector<8x32xf32>
    %118 = arith.addf %116, %117 : vector<8x32xf32>
    %c0_49 = arith.constant 0 : index
    %c0_50 = arith.constant 0 : index
    %c0_51 = arith.constant 0 : index
    %119 = vector.load %arg7[%c0_49, %c0_50, %c0_51] : memref<2x32x96xbf16, #tpu.memory_space<vmem>>, vector<1x32x96xbf16>
    %120 = vector.shape_cast %119 : vector<1x32x96xbf16> to vector<32x96xbf16>
    %c0_52 = arith.constant 0 : index
    %c0_53 = arith.constant 0 : index
    %c0_54 = arith.constant 0 : index
    %121 = vector.load %arg8[%c0_52, %c0_53, %c0_54] : memref<2x1x96xf32, #tpu.memory_space<vmem>>, vector<1x1x96xf32>
    %122 = vector.shape_cast %121 : vector<1x1x96xf32> to vector<1x96xf32>
    %c0_55 = arith.constant 0 : index
    %c0_56 = arith.constant 0 : index
    %c0_57 = arith.constant 0 : index
    %123 = vector.load %arg9[%c0_55, %c0_56, %c0_57] : memref<2x32x32xbf16, #tpu.memory_space<vmem>>, vector<1x32x32xbf16>
    %124 = vector.shape_cast %123 : vector<1x32x32xbf16> to vector<32x32xbf16>
    %c0_58 = arith.constant 0 : index
    %c0_59 = arith.constant 0 : index
    %c0_60 = arith.constant 0 : index
    %125 = vector.load %arg10[%c0_58, %c0_59, %c0_60] : memref<2x1x32xf32, #tpu.memory_space<vmem>>, vector<1x1x32xf32>
    %126 = vector.shape_cast %125 : vector<1x1x32xf32> to vector<1x32xf32>
    %127 = arith.truncf %118 : vector<8x32xf32> to vector<8x32xbf16>
    %128 = arith.truncf %1 : vector<8x32xf32> to vector<8x32xbf16>
    %129 = vector.extract_strided_slice %120 {offsets = [0, 0], sizes = [32, 32], strides = [1, 1]} : vector<32x96xbf16> to vector<32x32xbf16>
    %cst_61 = arith.constant dense<0.000000e+00> : vector<8x32xf32>
    %130 = tpu.matmul %127, %129, %cst_61 {dimension_numbers = #tpu.dot_dimension_numbers<[1], [0], [0], [1], [0, 0, 1, 1], [], []>} : vector<8x32xbf16>, vector<32x32xbf16>, vector<8x32xf32> -> vector<8x32xf32>
    %131 = vector.extract_strided_slice %122 {offsets = [0, 0], sizes = [1, 32], strides = [1, 1]} : vector<1x96xf32> to vector<1x32xf32>
    %132 = vector.broadcast %131 : vector<1x32xf32> to vector<8x32xf32>
    %133 = arith.addf %130, %132 : vector<8x32xf32>
    %134 = vector.extract_strided_slice %120 {offsets = [0, 32], sizes = [32, 64], strides = [1, 1]} : vector<32x96xbf16> to vector<32x64xbf16>
    %cst_62 = arith.constant dense<0.000000e+00> : vector<8x64xf32>
    %135 = tpu.matmul %128, %134, %cst_62 {dimension_numbers = #tpu.dot_dimension_numbers<[1], [0], [0], [1], [0, 0, 1, 1], [], []>} : vector<8x32xbf16>, vector<32x64xbf16>, vector<8x64xf32> -> vector<8x64xf32>
    %136 = vector.extract_strided_slice %122 {offsets = [0, 32], sizes = [1, 64], strides = [1, 1]} : vector<1x96xf32> to vector<1x64xf32>
    %137 = vector.broadcast %136 : vector<1x64xf32> to vector<8x64xf32>
    %138 = arith.addf %135, %137 : vector<8x64xf32>
    %139 = vector.extract_strided_slice %138 {offsets = [0, 0], sizes = [8, 32], strides = [1, 1]} : vector<8x64xf32> to vector<8x32xf32>
    %140 = vector.extract_strided_slice %138 {offsets = [0, 32], sizes = [8, 32], strides = [1, 1]} : vector<8x64xf32> to vector<8x32xf32>
    %141 = vector.extract_strided_slice %133 {offsets = [0, 0], sizes = [8, 8], strides = [1, 1]} : vector<8x32xf32> to vector<8x8xf32>
    %142 = vector.extract_strided_slice %139 {offsets = [0, 0], sizes = [8, 8], strides = [1, 1]} : vector<8x32xf32> to vector<8x8xf32>
    %143 = vector.extract_strided_slice %140 {offsets = [0, 0], sizes = [8, 8], strides = [1, 1]} : vector<8x32xf32> to vector<8x8xf32>
    %cst_63 = arith.constant dense<0.000000e+00> : vector<8x8xf32>
    %144 = tpu.matmul %141, %142, %cst_63 {dimension_numbers = #tpu.dot_dimension_numbers<[1], [1], [0], [0], [0, 0, 1, 0], [], []>} : vector<8x8xf32>, vector<8x8xf32>, vector<8x8xf32> -> vector<8x8xf32>
    %cst_64 = arith.constant 0.353553385 : f32
    %145 = vector.broadcast %cst_64 : f32 to vector<8x8xf32>
    %146 = arith.mulf %144, %145 : vector<8x8xf32>
    %cst_65 = arith.constant dense<0xFF800000> : vector<8xf32>
    %147 = vector.multi_reduction <maximumf>, %146, %cst_65 [1] : vector<8x8xf32> to vector<8xf32>
    %148 = vector.shape_cast %147 : vector<8xf32> to vector<8x1xf32>
    %149 = vector.broadcast %148 : vector<8x1xf32> to vector<8x8xf32>
    %150 = arith.subf %146, %149 : vector<8x8xf32>
    %151 = math.exp %150 : vector<8x8xf32>
    %cst_66 = arith.constant dense<0.000000e+00> : vector<8xf32>
    %152 = vector.multi_reduction <add>, %151, %cst_66 [1] : vector<8x8xf32> to vector<8xf32>
    %153 = vector.shape_cast %152 : vector<8xf32> to vector<8x1xf32>
    %154 = tpu.reciprocal %153 {approx = true} : vector<8x1xf32> -> vector<8x1xf32>
    %155 = vector.broadcast %154 : vector<8x1xf32> to vector<8x8xf32>
    %156 = arith.mulf %151, %155 : vector<8x8xf32>
    %cst_67 = arith.constant dense<0.000000e+00> : vector<8x8xf32>
    %157 = tpu.matmul %156, %143, %cst_67 {dimension_numbers = #tpu.dot_dimension_numbers<[1], [0], [0], [1], [0, 0, 1, 1], [], []>} : vector<8x8xf32>, vector<8x8xf32>, vector<8x8xf32> -> vector<8x8xf32>
    %158 = vector.extract_strided_slice %133 {offsets = [0, 8], sizes = [8, 8], strides = [1, 1]} : vector<8x32xf32> to vector<8x8xf32>
    %159 = vector.extract_strided_slice %139 {offsets = [0, 8], sizes = [8, 8], strides = [1, 1]} : vector<8x32xf32> to vector<8x8xf32>
    %160 = vector.extract_strided_slice %140 {offsets = [0, 8], sizes = [8, 8], strides = [1, 1]} : vector<8x32xf32> to vector<8x8xf32>
    %cst_68 = arith.constant dense<0.000000e+00> : vector<8x8xf32>
    %161 = tpu.matmul %158, %159, %cst_68 {dimension_numbers = #tpu.dot_dimension_numbers<[1], [1], [0], [0], [0, 0, 1, 0], [], []>} : vector<8x8xf32>, vector<8x8xf32>, vector<8x8xf32> -> vector<8x8xf32>
    %cst_69 = arith.constant 0.353553385 : f32
    %162 = vector.broadcast %cst_69 : f32 to vector<8x8xf32>
    %163 = arith.mulf %161, %162 : vector<8x8xf32>
    %cst_70 = arith.constant dense<0xFF800000> : vector<8xf32>
    %164 = vector.multi_reduction <maximumf>, %163, %cst_70 [1] : vector<8x8xf32> to vector<8xf32>
    %165 = vector.shape_cast %164 : vector<8xf32> to vector<8x1xf32>
    %166 = vector.broadcast %165 : vector<8x1xf32> to vector<8x8xf32>
    %167 = arith.subf %163, %166 : vector<8x8xf32>
    %168 = math.exp %167 : vector<8x8xf32>
    %cst_71 = arith.constant dense<0.000000e+00> : vector<8xf32>
    %169 = vector.multi_reduction <add>, %168, %cst_71 [1] : vector<8x8xf32> to vector<8xf32>
    %170 = vector.shape_cast %169 : vector<8xf32> to vector<8x1xf32>
    %171 = tpu.reciprocal %170 {approx = true} : vector<8x1xf32> -> vector<8x1xf32>
    %172 = vector.broadcast %171 : vector<8x1xf32> to vector<8x8xf32>
    %173 = arith.mulf %168, %172 : vector<8x8xf32>
    %cst_72 = arith.constant dense<0.000000e+00> : vector<8x8xf32>
    %174 = tpu.matmul %173, %160, %cst_72 {dimension_numbers = #tpu.dot_dimension_numbers<[1], [0], [0], [1], [0, 0, 1, 1], [], []>} : vector<8x8xf32>, vector<8x8xf32>, vector<8x8xf32> -> vector<8x8xf32>
    %175 = vector.extract_strided_slice %133 {offsets = [0, 16], sizes = [8, 8], strides = [1, 1]} : vector<8x32xf32> to vector<8x8xf32>
    %176 = vector.extract_strided_slice %139 {offsets = [0, 16], sizes = [8, 8], strides = [1, 1]} : vector<8x32xf32> to vector<8x8xf32>
    %177 = vector.extract_strided_slice %140 {offsets = [0, 16], sizes = [8, 8], strides = [1, 1]} : vector<8x32xf32> to vector<8x8xf32>
    %cst_73 = arith.constant dense<0.000000e+00> : vector<8x8xf32>
    %178 = tpu.matmul %175, %176, %cst_73 {dimension_numbers = #tpu.dot_dimension_numbers<[1], [1], [0], [0], [0, 0, 1, 0], [], []>} : vector<8x8xf32>, vector<8x8xf32>, vector<8x8xf32> -> vector<8x8xf32>
    %cst_74 = arith.constant 0.353553385 : f32
    %179 = vector.broadcast %cst_74 : f32 to vector<8x8xf32>
    %180 = arith.mulf %178, %179 : vector<8x8xf32>
    %cst_75 = arith.constant dense<0xFF800000> : vector<8xf32>
    %181 = vector.multi_reduction <maximumf>, %180, %cst_75 [1] : vector<8x8xf32> to vector<8xf32>
    %182 = vector.shape_cast %181 : vector<8xf32> to vector<8x1xf32>
    %183 = vector.broadcast %182 : vector<8x1xf32> to vector<8x8xf32>
    %184 = arith.subf %180, %183 : vector<8x8xf32>
    %185 = math.exp %184 : vector<8x8xf32>
    %cst_76 = arith.constant dense<0.000000e+00> : vector<8xf32>
    %186 = vector.multi_reduction <add>, %185, %cst_76 [1] : vector<8x8xf32> to vector<8xf32>
    %187 = vector.shape_cast %186 : vector<8xf32> to vector<8x1xf32>
    %188 = tpu.reciprocal %187 {approx = true} : vector<8x1xf32> -> vector<8x1xf32>
    %189 = vector.broadcast %188 : vector<8x1xf32> to vector<8x8xf32>
    %190 = arith.mulf %185, %189 : vector<8x8xf32>
    %cst_77 = arith.constant dense<0.000000e+00> : vector<8x8xf32>
    %191 = tpu.matmul %190, %177, %cst_77 {dimension_numbers = #tpu.dot_dimension_numbers<[1], [0], [0], [1], [0, 0, 1, 1], [], []>} : vector<8x8xf32>, vector<8x8xf32>, vector<8x8xf32> -> vector<8x8xf32>
    %192 = vector.extract_strided_slice %133 {offsets = [0, 24], sizes = [8, 8], strides = [1, 1]} : vector<8x32xf32> to vector<8x8xf32>
    %193 = vector.extract_strided_slice %139 {offsets = [0, 24], sizes = [8, 8], strides = [1, 1]} : vector<8x32xf32> to vector<8x8xf32>
    %194 = vector.extract_strided_slice %140 {offsets = [0, 24], sizes = [8, 8], strides = [1, 1]} : vector<8x32xf32> to vector<8x8xf32>
    %cst_78 = arith.constant dense<0.000000e+00> : vector<8x8xf32>
    %195 = tpu.matmul %192, %193, %cst_78 {dimension_numbers = #tpu.dot_dimension_numbers<[1], [1], [0], [0], [0, 0, 1, 0], [], []>} : vector<8x8xf32>, vector<8x8xf32>, vector<8x8xf32> -> vector<8x8xf32>
    %cst_79 = arith.constant 0.353553385 : f32
    %196 = vector.broadcast %cst_79 : f32 to vector<8x8xf32>
    %197 = arith.mulf %195, %196 : vector<8x8xf32>
    %cst_80 = arith.constant dense<0xFF800000> : vector<8xf32>
    %198 = vector.multi_reduction <maximumf>, %197, %cst_80 [1] : vector<8x8xf32> to vector<8xf32>
    %199 = vector.shape_cast %198 : vector<8xf32> to vector<8x1xf32>
    %200 = vector.broadcast %199 : vector<8x1xf32> to vector<8x8xf32>
    %201 = arith.subf %197, %200 : vector<8x8xf32>
    %202 = math.exp %201 : vector<8x8xf32>
    %cst_81 = arith.constant dense<0.000000e+00> : vector<8xf32>
    %203 = vector.multi_reduction <add>, %202, %cst_81 [1] : vector<8x8xf32> to vector<8xf32>
    %204 = vector.shape_cast %203 : vector<8xf32> to vector<8x1xf32>
    %205 = tpu.reciprocal %204 {approx = true} : vector<8x1xf32> -> vector<8x1xf32>
    %206 = vector.broadcast %205 : vector<8x1xf32> to vector<8x8xf32>
    %207 = arith.mulf %202, %206 : vector<8x8xf32>
    %cst_82 = arith.constant dense<0.000000e+00> : vector<8x8xf32>
    %208 = tpu.matmul %207, %194, %cst_82 {dimension_numbers = #tpu.dot_dimension_numbers<[1], [0], [0], [1], [0, 0, 1, 1], [], []>} : vector<8x8xf32>, vector<8x8xf32>, vector<8x8xf32> -> vector<8x8xf32>
    %209 = tpu.concatenate %157, %174, %191, %208 in 1 : vector<8x8xf32>, vector<8x8xf32>, vector<8x8xf32>, vector<8x8xf32> -> vector<8x32xf32>
    %210 = arith.truncf %209 : vector<8x32xf32> to vector<8x32xbf16>
    %cst_83 = arith.constant dense<0.000000e+00> : vector<8x32xf32>
    %211 = tpu.matmul %210, %124, %cst_83 {dimension_numbers = #tpu.dot_dimension_numbers<[1], [0], [0], [1], [0, 0, 1, 1], [], []>} : vector<8x32xbf16>, vector<32x32xbf16>, vector<8x32xf32> -> vector<8x32xf32>
    %212 = vector.broadcast %126 : vector<1x32xf32> to vector<8x32xf32>
    %213 = arith.addf %211, %212 : vector<8x32xf32>
    %214 = arith.addf %118, %213 : vector<8x32xf32>
    %215 = vector.extract_strided_slice %5 {offsets = [1, 0], sizes = [1, 32], strides = [1, 1]} : vector<3x32xf32> to vector<1x32xf32>
    %216 = vector.extract_strided_slice %7 {offsets = [1, 0], sizes = [1, 32], strides = [1, 1]} : vector<3x32xf32> to vector<1x32xf32>
    %cst_84 = arith.constant dense<0.000000e+00> : vector<8xf32>
    %217 = vector.multi_reduction <add>, %214, %cst_84 [1] : vector<8x32xf32> to vector<8xf32>
    %218 = vector.shape_cast %217 : vector<8xf32> to vector<8x1xf32>
    %cst_85 = arith.constant 3.200000e+01 : f32
    %219 = vector.broadcast %cst_85 : f32 to vector<8x1xf32>
    %220 = arith.divf %218, %219 : vector<8x1xf32>
    %221 = vector.broadcast %220 : vector<8x1xf32> to vector<8x32xf32>
    %222 = arith.subf %214, %221 : vector<8x32xf32>
    %223 = arith.mulf %222, %222 : vector<8x32xf32>
    %cst_86 = arith.constant dense<0.000000e+00> : vector<8xf32>
    %224 = vector.multi_reduction <add>, %223, %cst_86 [1] : vector<8x32xf32> to vector<8xf32>
    %225 = vector.shape_cast %224 : vector<8xf32> to vector<8x1xf32>
    %cst_87 = arith.constant 0.0322580636 : f32
    %226 = vector.broadcast %cst_87 : f32 to vector<8x1xf32>
    %227 = arith.mulf %225, %226 : vector<8x1xf32>
    %228 = vector.broadcast %215 : vector<1x32xf32> to vector<8x32xf32>
    %229 = arith.mulf %228, %222 : vector<8x32xf32>
    %230 = math.sqrt %227 : vector<8x1xf32>
    %cst_88 = arith.constant 9.99999997E-7 : f32
    %231 = vector.broadcast %cst_88 : f32 to vector<8x1xf32>
    %232 = arith.addf %230, %231 : vector<8x1xf32>
    %233 = vector.broadcast %232 : vector<8x1xf32> to vector<8x32xf32>
    %234 = arith.divf %229, %233 : vector<8x32xf32>
    %235 = vector.broadcast %216 : vector<1x32xf32> to vector<8x32xf32>
    %236 = arith.addf %234, %235 : vector<8x32xf32>
    %237 = arith.truncf %236 : vector<8x32xf32> to vector<8x32xbf16>
    %c0_89 = arith.constant 0 : index
    %c0_90 = arith.constant 0 : index
    %c0_91 = arith.constant 0 : index
    %238 = vector.load %arg11[%c0_89, %c0_90, %c0_91] : memref<2x32x64xbf16, #tpu.memory_space<vmem>>, vector<1x32x64xbf16>
    %239 = vector.shape_cast %238 : vector<1x32x64xbf16> to vector<32x64xbf16>
    %cst_92 = arith.constant dense<0.000000e+00> : vector<8x64xf32>
    %240 = tpu.matmul %237, %239, %cst_92 {dimension_numbers = #tpu.dot_dimension_numbers<[1], [0], [0], [1], [0, 0, 1, 1], [], []>} : vector<8x32xbf16>, vector<32x64xbf16>, vector<8x64xf32> -> vector<8x64xf32>
    %c0_93 = arith.constant 0 : index
    %c0_94 = arith.constant 0 : index
    %c0_95 = arith.constant 0 : index
    %241 = vector.load %arg12[%c0_93, %c0_94, %c0_95] : memref<2x1x64xf32, #tpu.memory_space<vmem>>, vector<1x1x64xf32>
    %242 = vector.shape_cast %241 : vector<1x1x64xf32> to vector<1x64xf32>
    %243 = vector.broadcast %242 : vector<1x64xf32> to vector<8x64xf32>
    %244 = arith.addf %240, %243 : vector<8x64xf32>
    %cst_96 = arith.constant 0.000000e+00 : f32
    %245 = vector.broadcast %cst_96 : f32 to vector<8x64xf32>
    %246 = arith.maximumf %244, %245 : vector<8x64xf32>
    %247 = arith.truncf %246 : vector<8x64xf32> to vector<8x64xbf16>
    %c0_97 = arith.constant 0 : index
    %c0_98 = arith.constant 0 : index
    %c0_99 = arith.constant 0 : index
    %248 = vector.load %arg13[%c0_97, %c0_98, %c0_99] : memref<2x64x32xbf16, #tpu.memory_space<vmem>>, vector<1x64x32xbf16>
    %249 = vector.shape_cast %248 : vector<1x64x32xbf16> to vector<64x32xbf16>
    %cst_100 = arith.constant dense<0.000000e+00> : vector<8x32xf32>
    %250 = tpu.matmul %247, %249, %cst_100 {dimension_numbers = #tpu.dot_dimension_numbers<[1], [0], [0], [1], [0, 0, 1, 1], [], []>} : vector<8x64xbf16>, vector<64x32xbf16>, vector<8x32xf32> -> vector<8x32xf32>
    %c0_101 = arith.constant 0 : index
    %c0_102 = arith.constant 0 : index
    %c0_103 = arith.constant 0 : index
    %251 = vector.load %arg14[%c0_101, %c0_102, %c0_103] : memref<2x1x32xf32, #tpu.memory_space<vmem>>, vector<1x1x32xf32>
    %252 = vector.shape_cast %251 : vector<1x1x32xf32> to vector<1x32xf32>
    %253 = vector.broadcast %252 : vector<1x32xf32> to vector<8x32xf32>
    %254 = arith.addf %250, %253 : vector<8x32xf32>
    %255 = arith.addf %236, %254 : vector<8x32xf32>
    %256 = vector.extract_strided_slice %5 {offsets = [2, 0], sizes = [1, 32], strides = [1, 1]} : vector<3x32xf32> to vector<1x32xf32>
    %257 = vector.extract_strided_slice %7 {offsets = [2, 0], sizes = [1, 32], strides = [1, 1]} : vector<3x32xf32> to vector<1x32xf32>
    %cst_104 = arith.constant dense<0.000000e+00> : vector<8xf32>
    %258 = vector.multi_reduction <add>, %255, %cst_104 [1] : vector<8x32xf32> to vector<8xf32>
    %259 = vector.shape_cast %258 : vector<8xf32> to vector<8x1xf32>
    %cst_105 = arith.constant 3.200000e+01 : f32
    %260 = vector.broadcast %cst_105 : f32 to vector<8x1xf32>
    %261 = arith.divf %259, %260 : vector<8x1xf32>
    %262 = vector.broadcast %261 : vector<8x1xf32> to vector<8x32xf32>
    %263 = arith.subf %255, %262 : vector<8x32xf32>
    %264 = arith.mulf %263, %263 : vector<8x32xf32>
    %cst_106 = arith.constant dense<0.000000e+00> : vector<8xf32>
    %265 = vector.multi_reduction <add>, %264, %cst_106 [1] : vector<8x32xf32> to vector<8xf32>
    %266 = vector.shape_cast %265 : vector<8xf32> to vector<8x1xf32>
    %cst_107 = arith.constant 0.0322580636 : f32
    %267 = vector.broadcast %cst_107 : f32 to vector<8x1xf32>
    %268 = arith.mulf %266, %267 : vector<8x1xf32>
    %269 = vector.broadcast %256 : vector<1x32xf32> to vector<8x32xf32>
    %270 = arith.mulf %269, %263 : vector<8x32xf32>
    %271 = math.sqrt %268 : vector<8x1xf32>
    %cst_108 = arith.constant 9.99999997E-7 : f32
    %272 = vector.broadcast %cst_108 : f32 to vector<8x1xf32>
    %273 = arith.addf %271, %272 : vector<8x1xf32>
    %274 = vector.broadcast %273 : vector<8x1xf32> to vector<8x32xf32>
    %275 = arith.divf %270, %274 : vector<8x32xf32>
    %276 = vector.broadcast %257 : vector<1x32xf32> to vector<8x32xf32>
    %277 = arith.addf %275, %276 : vector<8x32xf32>
    %c1 = arith.constant 1 : index
    %c0_109 = arith.constant 0 : index
    %c0_110 = arith.constant 0 : index
    %278 = vector.load %arg15[%c1, %c0_109, %c0_110] : memref<2x3x32xf32, #tpu.memory_space<vmem>>, vector<1x3x32xf32>
    %279 = vector.shape_cast %278 : vector<1x3x32xf32> to vector<3x32xf32>
    %c1_111 = arith.constant 1 : index
    %c0_112 = arith.constant 0 : index
    %c0_113 = arith.constant 0 : index
    %280 = vector.load %arg16[%c1_111, %c0_112, %c0_113] : memref<2x3x32xf32, #tpu.memory_space<vmem>>, vector<1x3x32xf32>
    %281 = vector.shape_cast %280 : vector<1x3x32xf32> to vector<3x32xf32>
    %c1_114 = arith.constant 1 : index
    %c0_115 = arith.constant 0 : index
    %c0_116 = arith.constant 0 : index
    %282 = vector.load %arg3[%c1_114, %c0_115, %c0_116] : memref<2x32x96xbf16, #tpu.memory_space<vmem>>, vector<1x32x96xbf16>
    %283 = vector.shape_cast %282 : vector<1x32x96xbf16> to vector<32x96xbf16>
    %c1_117 = arith.constant 1 : index
    %c0_118 = arith.constant 0 : index
    %c0_119 = arith.constant 0 : index
    %284 = vector.load %arg4[%c1_117, %c0_118, %c0_119] : memref<2x1x96xf32, #tpu.memory_space<vmem>>, vector<1x1x96xf32>
    %285 = vector.shape_cast %284 : vector<1x1x96xf32> to vector<1x96xf32>
    %c1_120 = arith.constant 1 : index
    %c0_121 = arith.constant 0 : index
    %c0_122 = arith.constant 0 : index
    %286 = vector.load %arg5[%c1_120, %c0_121, %c0_122] : memref<2x32x32xbf16, #tpu.memory_space<vmem>>, vector<1x32x32xbf16>
    %287 = vector.shape_cast %286 : vector<1x32x32xbf16> to vector<32x32xbf16>
    %c1_123 = arith.constant 1 : index
    %c0_124 = arith.constant 0 : index
    %c0_125 = arith.constant 0 : index
    %288 = vector.load %arg6[%c1_123, %c0_124, %c0_125] : memref<2x1x32xf32, #tpu.memory_space<vmem>>, vector<1x1x32xf32>
    %289 = vector.shape_cast %288 : vector<1x1x32xf32> to vector<1x32xf32>
    %290 = arith.truncf %3 : vector<8x32xf32> to vector<8x32xbf16>
    %cst_126 = arith.constant dense<0.000000e+00> : vector<8x96xf32>
    %291 = tpu.matmul %290, %283, %cst_126 {dimension_numbers = #tpu.dot_dimension_numbers<[1], [0], [0], [1], [0, 0, 1, 1], [], []>} : vector<8x32xbf16>, vector<32x96xbf16>, vector<8x96xf32> -> vector<8x96xf32>
    %292 = vector.broadcast %285 : vector<1x96xf32> to vector<8x96xf32>
    %293 = arith.addf %291, %292 : vector<8x96xf32>
    %294 = vector.extract_strided_slice %293 {offsets = [0, 0], sizes = [8, 32], strides = [1, 1]} : vector<8x96xf32> to vector<8x32xf32>
    %295 = vector.extract_strided_slice %293 {offsets = [0, 32], sizes = [8, 32], strides = [1, 1]} : vector<8x96xf32> to vector<8x32xf32>
    %296 = vector.extract_strided_slice %293 {offsets = [0, 64], sizes = [8, 32], strides = [1, 1]} : vector<8x96xf32> to vector<8x32xf32>
    %297 = vector.extract_strided_slice %294 {offsets = [0, 0], sizes = [8, 8], strides = [1, 1]} : vector<8x32xf32> to vector<8x8xf32>
    %298 = vector.extract_strided_slice %295 {offsets = [0, 0], sizes = [8, 8], strides = [1, 1]} : vector<8x32xf32> to vector<8x8xf32>
    %299 = vector.extract_strided_slice %296 {offsets = [0, 0], sizes = [8, 8], strides = [1, 1]} : vector<8x32xf32> to vector<8x8xf32>
    %cst_127 = arith.constant dense<0.000000e+00> : vector<8x8xf32>
    %300 = tpu.matmul %297, %298, %cst_127 {dimension_numbers = #tpu.dot_dimension_numbers<[1], [1], [0], [0], [0, 0, 1, 0], [], []>} : vector<8x8xf32>, vector<8x8xf32>, vector<8x8xf32> -> vector<8x8xf32>
    %cst_128 = arith.constant 0.353553385 : f32
    %301 = vector.broadcast %cst_128 : f32 to vector<8x8xf32>
    %302 = arith.mulf %300, %301 : vector<8x8xf32>
    %cst_129 = arith.constant dense<0xFF800000> : vector<8xf32>
    %303 = vector.multi_reduction <maximumf>, %302, %cst_129 [1] : vector<8x8xf32> to vector<8xf32>
    %304 = vector.shape_cast %303 : vector<8xf32> to vector<8x1xf32>
    %305 = vector.broadcast %304 : vector<8x1xf32> to vector<8x8xf32>
    %306 = arith.subf %302, %305 : vector<8x8xf32>
    %307 = math.exp %306 : vector<8x8xf32>
    %cst_130 = arith.constant dense<0.000000e+00> : vector<8xf32>
    %308 = vector.multi_reduction <add>, %307, %cst_130 [1] : vector<8x8xf32> to vector<8xf32>
    %309 = vector.shape_cast %308 : vector<8xf32> to vector<8x1xf32>
    %310 = tpu.reciprocal %309 {approx = true} : vector<8x1xf32> -> vector<8x1xf32>
    %311 = vector.broadcast %310 : vector<8x1xf32> to vector<8x8xf32>
    %312 = arith.mulf %307, %311 : vector<8x8xf32>
    %cst_131 = arith.constant dense<0.000000e+00> : vector<8x8xf32>
    %313 = tpu.matmul %312, %299, %cst_131 {dimension_numbers = #tpu.dot_dimension_numbers<[1], [0], [0], [1], [0, 0, 1, 1], [], []>} : vector<8x8xf32>, vector<8x8xf32>, vector<8x8xf32> -> vector<8x8xf32>
    %314 = vector.extract_strided_slice %294 {offsets = [0, 8], sizes = [8, 8], strides = [1, 1]} : vector<8x32xf32> to vector<8x8xf32>
    %315 = vector.extract_strided_slice %295 {offsets = [0, 8], sizes = [8, 8], strides = [1, 1]} : vector<8x32xf32> to vector<8x8xf32>
    %316 = vector.extract_strided_slice %296 {offsets = [0, 8], sizes = [8, 8], strides = [1, 1]} : vector<8x32xf32> to vector<8x8xf32>
    %cst_132 = arith.constant dense<0.000000e+00> : vector<8x8xf32>
    %317 = tpu.matmul %314, %315, %cst_132 {dimension_numbers = #tpu.dot_dimension_numbers<[1], [1], [0], [0], [0, 0, 1, 0], [], []>} : vector<8x8xf32>, vector<8x8xf32>, vector<8x8xf32> -> vector<8x8xf32>
    %cst_133 = arith.constant 0.353553385 : f32
    %318 = vector.broadcast %cst_133 : f32 to vector<8x8xf32>
    %319 = arith.mulf %317, %318 : vector<8x8xf32>
    %cst_134 = arith.constant dense<0xFF800000> : vector<8xf32>
    %320 = vector.multi_reduction <maximumf>, %319, %cst_134 [1] : vector<8x8xf32> to vector<8xf32>
    %321 = vector.shape_cast %320 : vector<8xf32> to vector<8x1xf32>
    %322 = vector.broadcast %321 : vector<8x1xf32> to vector<8x8xf32>
    %323 = arith.subf %319, %322 : vector<8x8xf32>
    %324 = math.exp %323 : vector<8x8xf32>
    %cst_135 = arith.constant dense<0.000000e+00> : vector<8xf32>
    %325 = vector.multi_reduction <add>, %324, %cst_135 [1] : vector<8x8xf32> to vector<8xf32>
    %326 = vector.shape_cast %325 : vector<8xf32> to vector<8x1xf32>
    %327 = tpu.reciprocal %326 {approx = true} : vector<8x1xf32> -> vector<8x1xf32>
    %328 = vector.broadcast %327 : vector<8x1xf32> to vector<8x8xf32>
    %329 = arith.mulf %324, %328 : vector<8x8xf32>
    %cst_136 = arith.constant dense<0.000000e+00> : vector<8x8xf32>
    %330 = tpu.matmul %329, %316, %cst_136 {dimension_numbers = #tpu.dot_dimension_numbers<[1], [0], [0], [1], [0, 0, 1, 1], [], []>} : vector<8x8xf32>, vector<8x8xf32>, vector<8x8xf32> -> vector<8x8xf32>
    %331 = vector.extract_strided_slice %294 {offsets = [0, 16], sizes = [8, 8], strides = [1, 1]} : vector<8x32xf32> to vector<8x8xf32>
    %332 = vector.extract_strided_slice %295 {offsets = [0, 16], sizes = [8, 8], strides = [1, 1]} : vector<8x32xf32> to vector<8x8xf32>
    %333 = vector.extract_strided_slice %296 {offsets = [0, 16], sizes = [8, 8], strides = [1, 1]} : vector<8x32xf32> to vector<8x8xf32>
    %cst_137 = arith.constant dense<0.000000e+00> : vector<8x8xf32>
    %334 = tpu.matmul %331, %332, %cst_137 {dimension_numbers = #tpu.dot_dimension_numbers<[1], [1], [0], [0], [0, 0, 1, 0], [], []>} : vector<8x8xf32>, vector<8x8xf32>, vector<8x8xf32> -> vector<8x8xf32>
    %cst_138 = arith.constant 0.353553385 : f32
    %335 = vector.broadcast %cst_138 : f32 to vector<8x8xf32>
    %336 = arith.mulf %334, %335 : vector<8x8xf32>
    %cst_139 = arith.constant dense<0xFF800000> : vector<8xf32>
    %337 = vector.multi_reduction <maximumf>, %336, %cst_139 [1] : vector<8x8xf32> to vector<8xf32>
    %338 = vector.shape_cast %337 : vector<8xf32> to vector<8x1xf32>
    %339 = vector.broadcast %338 : vector<8x1xf32> to vector<8x8xf32>
    %340 = arith.subf %336, %339 : vector<8x8xf32>
    %341 = math.exp %340 : vector<8x8xf32>
    %cst_140 = arith.constant dense<0.000000e+00> : vector<8xf32>
    %342 = vector.multi_reduction <add>, %341, %cst_140 [1] : vector<8x8xf32> to vector<8xf32>
    %343 = vector.shape_cast %342 : vector<8xf32> to vector<8x1xf32>
    %344 = tpu.reciprocal %343 {approx = true} : vector<8x1xf32> -> vector<8x1xf32>
    %345 = vector.broadcast %344 : vector<8x1xf32> to vector<8x8xf32>
    %346 = arith.mulf %341, %345 : vector<8x8xf32>
    %cst_141 = arith.constant dense<0.000000e+00> : vector<8x8xf32>
    %347 = tpu.matmul %346, %333, %cst_141 {dimension_numbers = #tpu.dot_dimension_numbers<[1], [0], [0], [1], [0, 0, 1, 1], [], []>} : vector<8x8xf32>, vector<8x8xf32>, vector<8x8xf32> -> vector<8x8xf32>
    %348 = vector.extract_strided_slice %294 {offsets = [0, 24], sizes = [8, 8], strides = [1, 1]} : vector<8x32xf32> to vector<8x8xf32>
    %349 = vector.extract_strided_slice %295 {offsets = [0, 24], sizes = [8, 8], strides = [1, 1]} : vector<8x32xf32> to vector<8x8xf32>
    %350 = vector.extract_strided_slice %296 {offsets = [0, 24], sizes = [8, 8], strides = [1, 1]} : vector<8x32xf32> to vector<8x8xf32>
    %cst_142 = arith.constant dense<0.000000e+00> : vector<8x8xf32>
    %351 = tpu.matmul %348, %349, %cst_142 {dimension_numbers = #tpu.dot_dimension_numbers<[1], [1], [0], [0], [0, 0, 1, 0], [], []>} : vector<8x8xf32>, vector<8x8xf32>, vector<8x8xf32> -> vector<8x8xf32>
    %cst_143 = arith.constant 0.353553385 : f32
    %352 = vector.broadcast %cst_143 : f32 to vector<8x8xf32>
    %353 = arith.mulf %351, %352 : vector<8x8xf32>
    %cst_144 = arith.constant dense<0xFF800000> : vector<8xf32>
    %354 = vector.multi_reduction <maximumf>, %353, %cst_144 [1] : vector<8x8xf32> to vector<8xf32>
    %355 = vector.shape_cast %354 : vector<8xf32> to vector<8x1xf32>
    %356 = vector.broadcast %355 : vector<8x1xf32> to vector<8x8xf32>
    %357 = arith.subf %353, %356 : vector<8x8xf32>
    %358 = math.exp %357 : vector<8x8xf32>
    %cst_145 = arith.constant dense<0.000000e+00> : vector<8xf32>
    %359 = vector.multi_reduction <add>, %358, %cst_145 [1] : vector<8x8xf32> to vector<8xf32>
    %360 = vector.shape_cast %359 : vector<8xf32> to vector<8x1xf32>
    %361 = tpu.reciprocal %360 {approx = true} : vector<8x1xf32> -> vector<8x1xf32>
    %362 = vector.broadcast %361 : vector<8x1xf32> to vector<8x8xf32>
    %363 = arith.mulf %358, %362 : vector<8x8xf32>
    %cst_146 = arith.constant dense<0.000000e+00> : vector<8x8xf32>
    %364 = tpu.matmul %363, %350, %cst_146 {dimension_numbers = #tpu.dot_dimension_numbers<[1], [0], [0], [1], [0, 0, 1, 1], [], []>} : vector<8x8xf32>, vector<8x8xf32>, vector<8x8xf32> -> vector<8x8xf32>
    %365 = tpu.concatenate %313, %330, %347, %364 in 1 : vector<8x8xf32>, vector<8x8xf32>, vector<8x8xf32>, vector<8x8xf32> -> vector<8x32xf32>
    %366 = arith.truncf %365 : vector<8x32xf32> to vector<8x32xbf16>
    %cst_147 = arith.constant dense<0.000000e+00> : vector<8x32xf32>
    %367 = tpu.matmul %366, %287, %cst_147 {dimension_numbers = #tpu.dot_dimension_numbers<[1], [0], [0], [1], [0, 0, 1, 1], [], []>} : vector<8x32xbf16>, vector<32x32xbf16>, vector<8x32xf32> -> vector<8x32xf32>
    %368 = vector.broadcast %289 : vector<1x32xf32> to vector<8x32xf32>
    %369 = arith.addf %367, %368 : vector<8x32xf32>
    %370 = arith.addf %3, %369 : vector<8x32xf32>
    %371 = vector.extract_strided_slice %279 {offsets = [0, 0], sizes = [1, 32], strides = [1, 1]} : vector<3x32xf32> to vector<1x32xf32>
    %372 = vector.extract_strided_slice %281 {offsets = [0, 0], sizes = [1, 32], strides = [1, 1]} : vector<3x32xf32> to vector<1x32xf32>
    %cst_148 = arith.constant dense<0.000000e+00> : vector<8xf32>
    %373 = vector.multi_reduction <add>, %370, %cst_148 [1] : vector<8x32xf32> to vector<8xf32>
    %374 = vector.shape_cast %373 : vector<8xf32> to vector<8x1xf32>
    %cst_149 = arith.constant 3.200000e+01 : f32
    %375 = vector.broadcast %cst_149 : f32 to vector<8x1xf32>
    %376 = arith.divf %374, %375 : vector<8x1xf32>
    %377 = vector.broadcast %376 : vector<8x1xf32> to vector<8x32xf32>
    %378 = arith.subf %370, %377 : vector<8x32xf32>
    %379 = arith.mulf %378, %378 : vector<8x32xf32>
    %cst_150 = arith.constant dense<0.000000e+00> : vector<8xf32>
    %380 = vector.multi_reduction <add>, %379, %cst_150 [1] : vector<8x32xf32> to vector<8xf32>
    %381 = vector.shape_cast %380 : vector<8xf32> to vector<8x1xf32>
    %cst_151 = arith.constant 0.0322580636 : f32
    %382 = vector.broadcast %cst_151 : f32 to vector<8x1xf32>
    %383 = arith.mulf %381, %382 : vector<8x1xf32>
    %384 = vector.broadcast %371 : vector<1x32xf32> to vector<8x32xf32>
    %385 = arith.mulf %384, %378 : vector<8x32xf32>
    %386 = math.sqrt %383 : vector<8x1xf32>
    %cst_152 = arith.constant 9.99999997E-7 : f32
    %387 = vector.broadcast %cst_152 : f32 to vector<8x1xf32>
    %388 = arith.addf %386, %387 : vector<8x1xf32>
    %389 = vector.broadcast %388 : vector<8x1xf32> to vector<8x32xf32>
    %390 = arith.divf %385, %389 : vector<8x32xf32>
    %391 = vector.broadcast %372 : vector<1x32xf32> to vector<8x32xf32>
    %392 = arith.addf %390, %391 : vector<8x32xf32>
    %c1_153 = arith.constant 1 : index
    %c0_154 = arith.constant 0 : index
    %c0_155 = arith.constant 0 : index
    %393 = vector.load %arg7[%c1_153, %c0_154, %c0_155] : memref<2x32x96xbf16, #tpu.memory_space<vmem>>, vector<1x32x96xbf16>
    %394 = vector.shape_cast %393 : vector<1x32x96xbf16> to vector<32x96xbf16>
    %c1_156 = arith.constant 1 : index
    %c0_157 = arith.constant 0 : index
    %c0_158 = arith.constant 0 : index
    %395 = vector.load %arg8[%c1_156, %c0_157, %c0_158] : memref<2x1x96xf32, #tpu.memory_space<vmem>>, vector<1x1x96xf32>
    %396 = vector.shape_cast %395 : vector<1x1x96xf32> to vector<1x96xf32>
    %c1_159 = arith.constant 1 : index
    %c0_160 = arith.constant 0 : index
    %c0_161 = arith.constant 0 : index
    %397 = vector.load %arg9[%c1_159, %c0_160, %c0_161] : memref<2x32x32xbf16, #tpu.memory_space<vmem>>, vector<1x32x32xbf16>
    %398 = vector.shape_cast %397 : vector<1x32x32xbf16> to vector<32x32xbf16>
    %c1_162 = arith.constant 1 : index
    %c0_163 = arith.constant 0 : index
    %c0_164 = arith.constant 0 : index
    %399 = vector.load %arg10[%c1_162, %c0_163, %c0_164] : memref<2x1x32xf32, #tpu.memory_space<vmem>>, vector<1x1x32xf32>
    %400 = vector.shape_cast %399 : vector<1x1x32xf32> to vector<1x32xf32>
    %401 = arith.truncf %392 : vector<8x32xf32> to vector<8x32xbf16>
    %402 = arith.truncf %277 : vector<8x32xf32> to vector<8x32xbf16>
    %403 = vector.extract_strided_slice %394 {offsets = [0, 0], sizes = [32, 32], strides = [1, 1]} : vector<32x96xbf16> to vector<32x32xbf16>
    %cst_165 = arith.constant dense<0.000000e+00> : vector<8x32xf32>
    %404 = tpu.matmul %401, %403, %cst_165 {dimension_numbers = #tpu.dot_dimension_numbers<[1], [0], [0], [1], [0, 0, 1, 1], [], []>} : vector<8x32xbf16>, vector<32x32xbf16>, vector<8x32xf32> -> vector<8x32xf32>
    %405 = vector.extract_strided_slice %396 {offsets = [0, 0], sizes = [1, 32], strides = [1, 1]} : vector<1x96xf32> to vector<1x32xf32>
    %406 = vector.broadcast %405 : vector<1x32xf32> to vector<8x32xf32>
    %407 = arith.addf %404, %406 : vector<8x32xf32>
    %408 = vector.extract_strided_slice %394 {offsets = [0, 32], sizes = [32, 64], strides = [1, 1]} : vector<32x96xbf16> to vector<32x64xbf16>
    %cst_166 = arith.constant dense<0.000000e+00> : vector<8x64xf32>
    %409 = tpu.matmul %402, %408, %cst_166 {dimension_numbers = #tpu.dot_dimension_numbers<[1], [0], [0], [1], [0, 0, 1, 1], [], []>} : vector<8x32xbf16>, vector<32x64xbf16>, vector<8x64xf32> -> vector<8x64xf32>
    %410 = vector.extract_strided_slice %396 {offsets = [0, 32], sizes = [1, 64], strides = [1, 1]} : vector<1x96xf32> to vector<1x64xf32>
    %411 = vector.broadcast %410 : vector<1x64xf32> to vector<8x64xf32>
    %412 = arith.addf %409, %411 : vector<8x64xf32>
    %413 = vector.extract_strided_slice %412 {offsets = [0, 0], sizes = [8, 32], strides = [1, 1]} : vector<8x64xf32> to vector<8x32xf32>
    %414 = vector.extract_strided_slice %412 {offsets = [0, 32], sizes = [8, 32], strides = [1, 1]} : vector<8x64xf32> to vector<8x32xf32>
    %415 = vector.extract_strided_slice %407 {offsets = [0, 0], sizes = [8, 8], strides = [1, 1]} : vector<8x32xf32> to vector<8x8xf32>
    %416 = vector.extract_strided_slice %413 {offsets = [0, 0], sizes = [8, 8], strides = [1, 1]} : vector<8x32xf32> to vector<8x8xf32>
    %417 = vector.extract_strided_slice %414 {offsets = [0, 0], sizes = [8, 8], strides = [1, 1]} : vector<8x32xf32> to vector<8x8xf32>
    %cst_167 = arith.constant dense<0.000000e+00> : vector<8x8xf32>
    %418 = tpu.matmul %415, %416, %cst_167 {dimension_numbers = #tpu.dot_dimension_numbers<[1], [1], [0], [0], [0, 0, 1, 0], [], []>} : vector<8x8xf32>, vector<8x8xf32>, vector<8x8xf32> -> vector<8x8xf32>
    %cst_168 = arith.constant 0.353553385 : f32
    %419 = vector.broadcast %cst_168 : f32 to vector<8x8xf32>
    %420 = arith.mulf %418, %419 : vector<8x8xf32>
    %cst_169 = arith.constant dense<0xFF800000> : vector<8xf32>
    %421 = vector.multi_reduction <maximumf>, %420, %cst_169 [1] : vector<8x8xf32> to vector<8xf32>
    %422 = vector.shape_cast %421 : vector<8xf32> to vector<8x1xf32>
    %423 = vector.broadcast %422 : vector<8x1xf32> to vector<8x8xf32>
    %424 = arith.subf %420, %423 : vector<8x8xf32>
    %425 = math.exp %424 : vector<8x8xf32>
    %cst_170 = arith.constant dense<0.000000e+00> : vector<8xf32>
    %426 = vector.multi_reduction <add>, %425, %cst_170 [1] : vector<8x8xf32> to vector<8xf32>
    %427 = vector.shape_cast %426 : vector<8xf32> to vector<8x1xf32>
    %428 = tpu.reciprocal %427 {approx = true} : vector<8x1xf32> -> vector<8x1xf32>
    %429 = vector.broadcast %428 : vector<8x1xf32> to vector<8x8xf32>
    %430 = arith.mulf %425, %429 : vector<8x8xf32>
    %cst_171 = arith.constant dense<0.000000e+00> : vector<8x8xf32>
    %431 = tpu.matmul %430, %417, %cst_171 {dimension_numbers = #tpu.dot_dimension_numbers<[1], [0], [0], [1], [0, 0, 1, 1], [], []>} : vector<8x8xf32>, vector<8x8xf32>, vector<8x8xf32> -> vector<8x8xf32>
    %432 = vector.extract_strided_slice %407 {offsets = [0, 8], sizes = [8, 8], strides = [1, 1]} : vector<8x32xf32> to vector<8x8xf32>
    %433 = vector.extract_strided_slice %413 {offsets = [0, 8], sizes = [8, 8], strides = [1, 1]} : vector<8x32xf32> to vector<8x8xf32>
    %434 = vector.extract_strided_slice %414 {offsets = [0, 8], sizes = [8, 8], strides = [1, 1]} : vector<8x32xf32> to vector<8x8xf32>
    %cst_172 = arith.constant dense<0.000000e+00> : vector<8x8xf32>
    %435 = tpu.matmul %432, %433, %cst_172 {dimension_numbers = #tpu.dot_dimension_numbers<[1], [1], [0], [0], [0, 0, 1, 0], [], []>} : vector<8x8xf32>, vector<8x8xf32>, vector<8x8xf32> -> vector<8x8xf32>
    %cst_173 = arith.constant 0.353553385 : f32
    %436 = vector.broadcast %cst_173 : f32 to vector<8x8xf32>
    %437 = arith.mulf %435, %436 : vector<8x8xf32>
    %cst_174 = arith.constant dense<0xFF800000> : vector<8xf32>
    %438 = vector.multi_reduction <maximumf>, %437, %cst_174 [1] : vector<8x8xf32> to vector<8xf32>
    %439 = vector.shape_cast %438 : vector<8xf32> to vector<8x1xf32>
    %440 = vector.broadcast %439 : vector<8x1xf32> to vector<8x8xf32>
    %441 = arith.subf %437, %440 : vector<8x8xf32>
    %442 = math.exp %441 : vector<8x8xf32>
    %cst_175 = arith.constant dense<0.000000e+00> : vector<8xf32>
    %443 = vector.multi_reduction <add>, %442, %cst_175 [1] : vector<8x8xf32> to vector<8xf32>
    %444 = vector.shape_cast %443 : vector<8xf32> to vector<8x1xf32>
    %445 = tpu.reciprocal %444 {approx = true} : vector<8x1xf32> -> vector<8x1xf32>
    %446 = vector.broadcast %445 : vector<8x1xf32> to vector<8x8xf32>
    %447 = arith.mulf %442, %446 : vector<8x8xf32>
    %cst_176 = arith.constant dense<0.000000e+00> : vector<8x8xf32>
    %448 = tpu.matmul %447, %434, %cst_176 {dimension_numbers = #tpu.dot_dimension_numbers<[1], [0], [0], [1], [0, 0, 1, 1], [], []>} : vector<8x8xf32>, vector<8x8xf32>, vector<8x8xf32> -> vector<8x8xf32>
    %449 = vector.extract_strided_slice %407 {offsets = [0, 16], sizes = [8, 8], strides = [1, 1]} : vector<8x32xf32> to vector<8x8xf32>
    %450 = vector.extract_strided_slice %413 {offsets = [0, 16], sizes = [8, 8], strides = [1, 1]} : vector<8x32xf32> to vector<8x8xf32>
    %451 = vector.extract_strided_slice %414 {offsets = [0, 16], sizes = [8, 8], strides = [1, 1]} : vector<8x32xf32> to vector<8x8xf32>
    %cst_177 = arith.constant dense<0.000000e+00> : vector<8x8xf32>
    %452 = tpu.matmul %449, %450, %cst_177 {dimension_numbers = #tpu.dot_dimension_numbers<[1], [1], [0], [0], [0, 0, 1, 0], [], []>} : vector<8x8xf32>, vector<8x8xf32>, vector<8x8xf32> -> vector<8x8xf32>
    %cst_178 = arith.constant 0.353553385 : f32
    %453 = vector.broadcast %cst_178 : f32 to vector<8x8xf32>
    %454 = arith.mulf %452, %453 : vector<8x8xf32>
    %cst_179 = arith.constant dense<0xFF800000> : vector<8xf32>
    %455 = vector.multi_reduction <maximumf>, %454, %cst_179 [1] : vector<8x8xf32> to vector<8xf32>
    %456 = vector.shape_cast %455 : vector<8xf32> to vector<8x1xf32>
    %457 = vector.broadcast %456 : vector<8x1xf32> to vector<8x8xf32>
    %458 = arith.subf %454, %457 : vector<8x8xf32>
    %459 = math.exp %458 : vector<8x8xf32>
    %cst_180 = arith.constant dense<0.000000e+00> : vector<8xf32>
    %460 = vector.multi_reduction <add>, %459, %cst_180 [1] : vector<8x8xf32> to vector<8xf32>
    %461 = vector.shape_cast %460 : vector<8xf32> to vector<8x1xf32>
    %462 = tpu.reciprocal %461 {approx = true} : vector<8x1xf32> -> vector<8x1xf32>
    %463 = vector.broadcast %462 : vector<8x1xf32> to vector<8x8xf32>
    %464 = arith.mulf %459, %463 : vector<8x8xf32>
    %cst_181 = arith.constant dense<0.000000e+00> : vector<8x8xf32>
    %465 = tpu.matmul %464, %451, %cst_181 {dimension_numbers = #tpu.dot_dimension_numbers<[1], [0], [0], [1], [0, 0, 1, 1], [], []>} : vector<8x8xf32>, vector<8x8xf32>, vector<8x8xf32> -> vector<8x8xf32>
    %466 = vector.extract_strided_slice %407 {offsets = [0, 24], sizes = [8, 8], strides = [1, 1]} : vector<8x32xf32> to vector<8x8xf32>
    %467 = vector.extract_strided_slice %413 {offsets = [0, 24], sizes = [8, 8], strides = [1, 1]} : vector<8x32xf32> to vector<8x8xf32>
    %468 = vector.extract_strided_slice %414 {offsets = [0, 24], sizes = [8, 8], strides = [1, 1]} : vector<8x32xf32> to vector<8x8xf32>
    %cst_182 = arith.constant dense<0.000000e+00> : vector<8x8xf32>
    %469 = tpu.matmul %466, %467, %cst_182 {dimension_numbers = #tpu.dot_dimension_numbers<[1], [1], [0], [0], [0, 0, 1, 0], [], []>} : vector<8x8xf32>, vector<8x8xf32>, vector<8x8xf32> -> vector<8x8xf32>
    %cst_183 = arith.constant 0.353553385 : f32
    %470 = vector.broadcast %cst_183 : f32 to vector<8x8xf32>
    %471 = arith.mulf %469, %470 : vector<8x8xf32>
    %cst_184 = arith.constant dense<0xFF800000> : vector<8xf32>
    %472 = vector.multi_reduction <maximumf>, %471, %cst_184 [1] : vector<8x8xf32> to vector<8xf32>
    %473 = vector.shape_cast %472 : vector<8xf32> to vector<8x1xf32>
    %474 = vector.broadcast %473 : vector<8x1xf32> to vector<8x8xf32>
    %475 = arith.subf %471, %474 : vector<8x8xf32>
    %476 = math.exp %475 : vector<8x8xf32>
    %cst_185 = arith.constant dense<0.000000e+00> : vector<8xf32>
    %477 = vector.multi_reduction <add>, %476, %cst_185 [1] : vector<8x8xf32> to vector<8xf32>
    %478 = vector.shape_cast %477 : vector<8xf32> to vector<8x1xf32>
    %479 = tpu.reciprocal %478 {approx = true} : vector<8x1xf32> -> vector<8x1xf32>
    %480 = vector.broadcast %479 : vector<8x1xf32> to vector<8x8xf32>
    %481 = arith.mulf %476, %480 : vector<8x8xf32>
    %cst_186 = arith.constant dense<0.000000e+00> : vector<8x8xf32>
    %482 = tpu.matmul %481, %468, %cst_186 {dimension_numbers = #tpu.dot_dimension_numbers<[1], [0], [0], [1], [0, 0, 1, 1], [], []>} : vector<8x8xf32>, vector<8x8xf32>, vector<8x8xf32> -> vector<8x8xf32>
    %483 = tpu.concatenate %431, %448, %465, %482 in 1 : vector<8x8xf32>, vector<8x8xf32>, vector<8x8xf32>, vector<8x8xf32> -> vector<8x32xf32>
    %484 = arith.truncf %483 : vector<8x32xf32> to vector<8x32xbf16>
    %cst_187 = arith.constant dense<0.000000e+00> : vector<8x32xf32>
    %485 = tpu.matmul %484, %398, %cst_187 {dimension_numbers = #tpu.dot_dimension_numbers<[1], [0], [0], [1], [0, 0, 1, 1], [], []>} : vector<8x32xbf16>, vector<32x32xbf16>, vector<8x32xf32> -> vector<8x32xf32>
    %486 = vector.broadcast %400 : vector<1x32xf32> to vector<8x32xf32>
    %487 = arith.addf %485, %486 : vector<8x32xf32>
    %488 = arith.addf %392, %487 : vector<8x32xf32>
    %489 = vector.extract_strided_slice %279 {offsets = [1, 0], sizes = [1, 32], strides = [1, 1]} : vector<3x32xf32> to vector<1x32xf32>
    %490 = vector.extract_strided_slice %281 {offsets = [1, 0], sizes = [1, 32], strides = [1, 1]} : vector<3x32xf32> to vector<1x32xf32>
    %cst_188 = arith.constant dense<0.000000e+00> : vector<8xf32>
    %491 = vector.multi_reduction <add>, %488, %cst_188 [1] : vector<8x32xf32> to vector<8xf32>
    %492 = vector.shape_cast %491 : vector<8xf32> to vector<8x1xf32>
    %cst_189 = arith.constant 3.200000e+01 : f32
    %493 = vector.broadcast %cst_189 : f32 to vector<8x1xf32>
    %494 = arith.divf %492, %493 : vector<8x1xf32>
    %495 = vector.broadcast %494 : vector<8x1xf32> to vector<8x32xf32>
    %496 = arith.subf %488, %495 : vector<8x32xf32>
    %497 = arith.mulf %496, %496 : vector<8x32xf32>
    %cst_190 = arith.constant dense<0.000000e+00> : vector<8xf32>
    %498 = vector.multi_reduction <add>, %497, %cst_190 [1] : vector<8x32xf32> to vector<8xf32>
    %499 = vector.shape_cast %498 : vector<8xf32> to vector<8x1xf32>
    %cst_191 = arith.constant 0.0322580636 : f32
    %500 = vector.broadcast %cst_191 : f32 to vector<8x1xf32>
    %501 = arith.mulf %499, %500 : vector<8x1xf32>
    %502 = vector.broadcast %489 : vector<1x32xf32> to vector<8x32xf32>
    %503 = arith.mulf %502, %496 : vector<8x32xf32>
    %504 = math.sqrt %501 : vector<8x1xf32>
    %cst_192 = arith.constant 9.99999997E-7 : f32
    %505 = vector.broadcast %cst_192 : f32 to vector<8x1xf32>
    %506 = arith.addf %504, %505 : vector<8x1xf32>
    %507 = vector.broadcast %506 : vector<8x1xf32> to vector<8x32xf32>
    %508 = arith.divf %503, %507 : vector<8x32xf32>
    %509 = vector.broadcast %490 : vector<1x32xf32> to vector<8x32xf32>
    %510 = arith.addf %508, %509 : vector<8x32xf32>
    %511 = arith.truncf %510 : vector<8x32xf32> to vector<8x32xbf16>
    %c1_193 = arith.constant 1 : index
    %c0_194 = arith.constant 0 : index
    %c0_195 = arith.constant 0 : index
    %512 = vector.load %arg11[%c1_193, %c0_194, %c0_195] : memref<2x32x64xbf16, #tpu.memory_space<vmem>>, vector<1x32x64xbf16>
    %513 = vector.shape_cast %512 : vector<1x32x64xbf16> to vector<32x64xbf16>
    %cst_196 = arith.constant dense<0.000000e+00> : vector<8x64xf32>
    %514 = tpu.matmul %511, %513, %cst_196 {dimension_numbers = #tpu.dot_dimension_numbers<[1], [0], [0], [1], [0, 0, 1, 1], [], []>} : vector<8x32xbf16>, vector<32x64xbf16>, vector<8x64xf32> -> vector<8x64xf32>
    %c1_197 = arith.constant 1 : index
    %c0_198 = arith.constant 0 : index
    %c0_199 = arith.constant 0 : index
    %515 = vector.load %arg12[%c1_197, %c0_198, %c0_199] : memref<2x1x64xf32, #tpu.memory_space<vmem>>, vector<1x1x64xf32>
    %516 = vector.shape_cast %515 : vector<1x1x64xf32> to vector<1x64xf32>
    %517 = vector.broadcast %516 : vector<1x64xf32> to vector<8x64xf32>
    %518 = arith.addf %514, %517 : vector<8x64xf32>
    %cst_200 = arith.constant 0.000000e+00 : f32
    %519 = vector.broadcast %cst_200 : f32 to vector<8x64xf32>
    %520 = arith.maximumf %518, %519 : vector<8x64xf32>
    %521 = arith.truncf %520 : vector<8x64xf32> to vector<8x64xbf16>
    %c1_201 = arith.constant 1 : index
    %c0_202 = arith.constant 0 : index
    %c0_203 = arith.constant 0 : index
    %522 = vector.load %arg13[%c1_201, %c0_202, %c0_203] : memref<2x64x32xbf16, #tpu.memory_space<vmem>>, vector<1x64x32xbf16>
    %523 = vector.shape_cast %522 : vector<1x64x32xbf16> to vector<64x32xbf16>
    %cst_204 = arith.constant dense<0.000000e+00> : vector<8x32xf32>
    %524 = tpu.matmul %521, %523, %cst_204 {dimension_numbers = #tpu.dot_dimension_numbers<[1], [0], [0], [1], [0, 0, 1, 1], [], []>} : vector<8x64xbf16>, vector<64x32xbf16>, vector<8x32xf32> -> vector<8x32xf32>
    %c1_205 = arith.constant 1 : index
    %c0_206 = arith.constant 0 : index
    %c0_207 = arith.constant 0 : index
    %525 = vector.load %arg14[%c1_205, %c0_206, %c0_207] : memref<2x1x32xf32, #tpu.memory_space<vmem>>, vector<1x1x32xf32>
    %526 = vector.shape_cast %525 : vector<1x1x32xf32> to vector<1x32xf32>
    %527 = vector.broadcast %526 : vector<1x32xf32> to vector<8x32xf32>
    %528 = arith.addf %524, %527 : vector<8x32xf32>
    %529 = arith.addf %510, %528 : vector<8x32xf32>
    %530 = vector.extract_strided_slice %279 {offsets = [2, 0], sizes = [1, 32], strides = [1, 1]} : vector<3x32xf32> to vector<1x32xf32>
    %531 = vector.extract_strided_slice %281 {offsets = [2, 0], sizes = [1, 32], strides = [1, 1]} : vector<3x32xf32> to vector<1x32xf32>
    %cst_208 = arith.constant dense<0.000000e+00> : vector<8xf32>
    %532 = vector.multi_reduction <add>, %529, %cst_208 [1] : vector<8x32xf32> to vector<8xf32>
    %533 = vector.shape_cast %532 : vector<8xf32> to vector<8x1xf32>
    %cst_209 = arith.constant 3.200000e+01 : f32
    %534 = vector.broadcast %cst_209 : f32 to vector<8x1xf32>
    %535 = arith.divf %533, %534 : vector<8x1xf32>
    %536 = vector.broadcast %535 : vector<8x1xf32> to vector<8x32xf32>
    %537 = arith.subf %529, %536 : vector<8x32xf32>
    %538 = arith.mulf %537, %537 : vector<8x32xf32>
    %cst_210 = arith.constant dense<0.000000e+00> : vector<8xf32>
    %539 = vector.multi_reduction <add>, %538, %cst_210 [1] : vector<8x32xf32> to vector<8xf32>
    %540 = vector.shape_cast %539 : vector<8xf32> to vector<8x1xf32>
    %cst_211 = arith.constant 0.0322580636 : f32
    %541 = vector.broadcast %cst_211 : f32 to vector<8x1xf32>
    %542 = arith.mulf %540, %541 : vector<8x1xf32>
    %543 = vector.broadcast %530 : vector<1x32xf32> to vector<8x32xf32>
    %544 = arith.mulf %543, %537 : vector<8x32xf32>
    %545 = math.sqrt %542 : vector<8x1xf32>
    %cst_212 = arith.constant 9.99999997E-7 : f32
    %546 = vector.broadcast %cst_212 : f32 to vector<8x1xf32>
    %547 = arith.addf %545, %546 : vector<8x1xf32>
    %548 = vector.broadcast %547 : vector<8x1xf32> to vector<8x32xf32>
    %549 = arith.divf %544, %548 : vector<8x32xf32>
    %550 = vector.broadcast %531 : vector<1x32xf32> to vector<8x32xf32>
    %551 = arith.addf %549, %550 : vector<8x32xf32>
    %c0_213 = arith.constant 0 : index
    %c0_214 = arith.constant 0 : index
    %552 = vector.load %arg17[%c0_213, %c0_214] : memref<1x32xf32, #tpu.memory_space<vmem>>, vector<1x32xf32>
    %c0_215 = arith.constant 0 : index
    %c0_216 = arith.constant 0 : index
    %553 = vector.load %arg18[%c0_215, %c0_216] : memref<1x32xf32, #tpu.memory_space<vmem>>, vector<1x32xf32>
    %cst_217 = arith.constant dense<0.000000e+00> : vector<8xf32>
    %554 = vector.multi_reduction <add>, %551, %cst_217 [1] : vector<8x32xf32> to vector<8xf32>
    %555 = vector.shape_cast %554 : vector<8xf32> to vector<8x1xf32>
    %cst_218 = arith.constant 3.200000e+01 : f32
    %556 = vector.broadcast %cst_218 : f32 to vector<8x1xf32>
    %557 = arith.divf %555, %556 : vector<8x1xf32>
    %558 = vector.broadcast %557 : vector<8x1xf32> to vector<8x32xf32>
    %559 = arith.subf %551, %558 : vector<8x32xf32>
    %560 = arith.mulf %559, %559 : vector<8x32xf32>
    %cst_219 = arith.constant dense<0.000000e+00> : vector<8xf32>
    %561 = vector.multi_reduction <add>, %560, %cst_219 [1] : vector<8x32xf32> to vector<8xf32>
    %562 = vector.shape_cast %561 : vector<8xf32> to vector<8x1xf32>
    %cst_220 = arith.constant 0.0322580636 : f32
    %563 = vector.broadcast %cst_220 : f32 to vector<8x1xf32>
    %564 = arith.mulf %562, %563 : vector<8x1xf32>
    %565 = vector.broadcast %552 : vector<1x32xf32> to vector<8x32xf32>
    %566 = arith.mulf %565, %559 : vector<8x32xf32>
    %567 = math.sqrt %564 : vector<8x1xf32>
    %cst_221 = arith.constant 9.99999997E-7 : f32
    %568 = vector.broadcast %cst_221 : f32 to vector<8x1xf32>
    %569 = arith.addf %567, %568 : vector<8x1xf32>
    %570 = vector.broadcast %569 : vector<8x1xf32> to vector<8x32xf32>
    %571 = arith.divf %566, %570 : vector<8x32xf32>
    %572 = vector.broadcast %553 : vector<1x32xf32> to vector<8x32xf32>
    %573 = arith.addf %571, %572 : vector<8x32xf32>
    %c0_222 = arith.constant 0 : index
    %c0_223 = arith.constant 0 : index
    %574 = vector.load %arg19[%c0_222, %c0_223] : memref<1x32xf32, #tpu.memory_space<vmem>>, vector<1x32xf32>
    %575 = vector.broadcast %574 : vector<1x32xf32> to vector<8x32xf32>
    %576 = arith.mulf %573, %575 : vector<8x32xf32>
    %cst_224 = arith.constant dense<0.000000e+00> : vector<8xf32>
    %577 = vector.multi_reduction <add>, %576, %cst_224 [1] : vector<8x32xf32> to vector<8xf32>
    %578 = vector.shape_cast %577 : vector<8xf32> to vector<8x1xf32>
    %c0_225 = arith.constant 0 : index
    %c0_226 = arith.constant 0 : index
    %579 = vector.load %arg20[%c0_225, %c0_226] : memref<1x1xf32, #tpu.memory_space<vmem>>, vector<1x1xf32>
    %580 = vector.broadcast %579 : vector<1x1xf32> to vector<8x1xf32>
    %581 = arith.addf %578, %580 : vector<8x1xf32>
    %c0_227 = arith.constant 0 : index
    %c0_228 = arith.constant 0 : index
    %582 = vector.load %arg21[%c0_227, %c0_228] : memref<8x8xf32, #tpu.memory_space<vmem>>, vector<8x8xf32>
    %583 = vector.broadcast %581 : vector<8x1xf32> to vector<8x8xf32>
    %584 = arith.mulf %583, %582 : vector<8x8xf32>
    %cst_229 = arith.constant dense<0.000000e+00> : vector<8xf32>
    %585 = vector.multi_reduction <add>, %584, %cst_229 [0] : vector<8x8xf32> to vector<8xf32>
    %586 = vector.shape_cast %585 : vector<8xf32> to vector<1x8xf32>
    %c0_230 = arith.constant 0 : index
    %c0_231 = arith.constant 0 : index
    %587 = vector.load %arg22[%c0_230, %c0_231] : memref<1x8xf32, #tpu.memory_space<vmem>>, vector<1x8xf32>
    %588 = arith.addf %586, %587 : vector<1x8xf32>
    %c0_232 = arith.constant 0 : index
    %c0_233 = arith.constant 0 : index
    %589 = vector.load %arg23[%c0_232, %c0_233] : memref<8x4xf32, #tpu.memory_space<vmem>>, vector<8x4xf32>
    %cst_234 = arith.constant dense<0.000000e+00> : vector<1x4xf32>
    %590 = tpu.matmul %588, %589, %cst_234 {dimension_numbers = #tpu.dot_dimension_numbers<[1], [0], [0], [1], [0, 0, 1, 1], [], []>} : vector<1x8xf32>, vector<8x4xf32>, vector<1x4xf32> -> vector<1x4xf32>
    %c0_235 = arith.constant 0 : index
    %c0_236 = arith.constant 0 : index
    %591 = vector.load %arg24[%c0_235, %c0_236] : memref<1x4xf32, #tpu.memory_space<vmem>>, vector<1x4xf32>
    %592 = arith.addf %590, %591 : vector<1x4xf32>
    %c0_237 = arith.constant 0 : index
    %c0_238 = arith.constant 0 : index
    %c0_239 = arith.constant 0 : index
    %593 = vector.load %arg25[%c0_237, %c0_238, %c0_239] : memref<1x1x4xf32, #tpu.memory_space<vmem>>, vector<1x1x4xf32>
    %594 = vector.shape_cast %593 : vector<1x1x4xf32> to vector<1x4xf32>
    %595 = vector.shape_cast %592 : vector<1x4xf32> to vector<1x1x4xf32>
    tpu.vector_store %arg25[%c0_237, %c0_238, %c0_239], %595 {strides = array<i32>} : memref<1x1x4xf32, #tpu.memory_space<vmem>>, vector<1x1x4xf32>,
    return
  }
  func.func @transform_0(%arg0: i32) -> (i32, i32, i32) {
    %c0_i32 = arith.constant 0 : i32
    %c0_i32_0 = arith.constant 0 : i32
    %c0_i32_1 = arith.constant 0 : i32
    return %arg0, %c0_i32, %c0_i32_0 : i32, i32, i32
  }
  func.func @transform_1(%arg0: i32) -> (i32, i32, i32) {
    %c0_i32 = arith.constant 0 : i32
    %c0_i32_0 = arith.constant 0 : i32
    %c0_i32_1 = arith.constant 0 : i32
    return %arg0, %c0_i32, %c0_i32_0 : i32, i32, i32
  }
  func.func @transform_2(%arg0: i32) -> (i32, i32, i32) {
    %c0_i32 = arith.constant 0 : i32
    %c0_i32_0 = arith.constant 0 : i32
    %c0_i32_1 = arith.constant 0 : i32
    %c0_i32_2 = arith.constant 0 : i32
    return %c0_i32, %c0_i32_0, %c0_i32_1 : i32, i32, i32
  }
  func.func @transform_3(%arg0: i32) -> (i32, i32, i32) {
    %c0_i32 = arith.constant 0 : i32
    %c0_i32_0 = arith.constant 0 : i32
    %c0_i32_1 = arith.constant 0 : i32
    %c0_i32_2 = arith.constant 0 : i32
    return %c0_i32, %c0_i32_0, %c0_i32_1 : i32, i32, i32
  }
  func.func @transform_4(%arg0: i32) -> (i32, i32, i32) {
    %c0_i32 = arith.constant 0 : i32
    %c0_i32_0 = arith.constant 0 : i32
    %c0_i32_1 = arith.constant 0 : i32
    %c0_i32_2 = arith.constant 0 : i32
    return %c0_i32, %c0_i32_0, %c0_i32_1 : i32, i32, i32
  }
  func.func @transform_5(%arg0: i32) -> (i32, i32, i32) {
    %c0_i32 = arith.constant 0 : i32
    %c0_i32_0 = arith.constant 0 : i32
    %c0_i32_1 = arith.constant 0 : i32
    %c0_i32_2 = arith.constant 0 : i32
    return %c0_i32, %c0_i32_0, %c0_i32_1 : i32, i32, i32
  }
  func.func @transform_6(%arg0: i32) -> (i32, i32, i32) {
    %c0_i32 = arith.constant 0 : i32
    %c0_i32_0 = arith.constant 0 : i32
    %c0_i32_1 = arith.constant 0 : i32
    %c0_i32_2 = arith.constant 0 : i32
    return %c0_i32, %c0_i32_0, %c0_i32_1 : i32, i32, i32
  }
  func.func @transform_7(%arg0: i32) -> (i32, i32, i32) {
    %c0_i32 = arith.constant 0 : i32
    %c0_i32_0 = arith.constant 0 : i32
    %c0_i32_1 = arith.constant 0 : i32
    %c0_i32_2 = arith.constant 0 : i32
    return %c0_i32, %c0_i32_0, %c0_i32_1 : i32, i32, i32
  }
  func.func @transform_8(%arg0: i32) -> (i32, i32, i32) {
    %c0_i32 = arith.constant 0 : i32
    %c0_i32_0 = arith.constant 0 : i32
    %c0_i32_1 = arith.constant 0 : i32
    %c0_i32_2 = arith.constant 0 : i32
    return %c0_i32, %c0_i32_0, %c0_i32_1 : i32, i32, i32
  }
  func.func @transform_9(%arg0: i32) -> (i32, i32, i32) {
    %c0_i32 = arith.constant 0 : i32
    %c0_i32_0 = arith.constant 0 : i32
    %c0_i32_1 = arith.constant 0 : i32
    %c0_i32_2 = arith.constant 0 : i32
    return %c0_i32, %c0_i32_0, %c0_i32_1 : i32, i32, i32
  }
  func.func @transform_10(%arg0: i32) -> (i32, i32, i32) {
    %c0_i32 = arith.constant 0 : i32
    %c0_i32_0 = arith.constant 0 : i32
    %c0_i32_1 = arith.constant 0 : i32
    %c0_i32_2 = arith.constant 0 : i32
    return %c0_i32, %c0_i32_0, %c0_i32_1 : i32, i32, i32
  }
  func.func @transform_11(%arg0: i32) -> (i32, i32, i32) {
    %c0_i32 = arith.constant 0 : i32
    %c0_i32_0 = arith.constant 0 : i32
    %c0_i32_1 = arith.constant 0 : i32
    %c0_i32_2 = arith.constant 0 : i32
    return %c0_i32, %c0_i32_0, %c0_i32_1 : i32, i32, i32
  }
  func.func @transform_12(%arg0: i32) -> (i32, i32, i32) {
    %c0_i32 = arith.constant 0 : i32
    %c0_i32_0 = arith.constant 0 : i32
    %c0_i32_1 = arith.constant 0 : i32
    %c0_i32_2 = arith.constant 0 : i32
    return %c0_i32, %c0_i32_0, %c0_i32_1 : i32, i32, i32
  }
  func.func @transform_13(%arg0: i32) -> (i32, i32, i32) {
    %c0_i32 = arith.constant 0 : i32
    %c0_i32_0 = arith.constant 0 : i32
    %c0_i32_1 = arith.constant 0 : i32
    %c0_i32_2 = arith.constant 0 : i32
    return %c0_i32, %c0_i32_0, %c0_i32_1 : i32, i32, i32
  }
  func.func @transform_14(%arg0: i32) -> (i32, i32, i32) {
    %c0_i32 = arith.constant 0 : i32
    %c0_i32_0 = arith.constant 0 : i32
    %c0_i32_1 = arith.constant 0 : i32
    %c0_i32_2 = arith.constant 0 : i32
    return %c0_i32, %c0_i32_0, %c0_i32_1 : i32, i32, i32
  }
  func.func @transform_15(%arg0: i32) -> (i32, i32, i32) {
    %c0_i32 = arith.constant 0 : i32
    %c0_i32_0 = arith.constant 0 : i32
    %c0_i32_1 = arith.constant 0 : i32
    %c0_i32_2 = arith.constant 0 : i32
    return %c0_i32, %c0_i32_0, %c0_i32_1 : i32, i32, i32
  }
  func.func @transform_16(%arg0: i32) -> (i32, i32) {
    %c0_i32 = arith.constant 0 : i32
    %c0_i32_0 = arith.constant 0 : i32
    %c0_i32_1 = arith.constant 0 : i32
    return %c0_i32, %c0_i32_0 : i32, i32
  }
  func.func @transform_17(%arg0: i32) -> (i32, i32) {
    %c0_i32 = arith.constant 0 : i32
    %c0_i32_0 = arith.constant 0 : i32
    %c0_i32_1 = arith.constant 0 : i32
    return %c0_i32, %c0_i32_0 : i32, i32
  }
  func.func @transform_18(%arg0: i32) -> (i32, i32) {
    %c0_i32 = arith.constant 0 : i32
    %c0_i32_0 = arith.constant 0 : i32
    %c0_i32_1 = arith.constant 0 : i32
    return %c0_i32, %c0_i32_0 : i32, i32
  }
  func.func @transform_19(%arg0: i32) -> (i32, i32) {
    %c0_i32 = arith.constant 0 : i32
    %c0_i32_0 = arith.constant 0 : i32
    %c0_i32_1 = arith.constant 0 : i32
    return %c0_i32, %c0_i32_0 : i32, i32
  }
  func.func @transform_20(%arg0: i32) -> (i32, i32) {
    %c0_i32 = arith.constant 0 : i32
    %c0_i32_0 = arith.constant 0 : i32
    %c0_i32_1 = arith.constant 0 : i32
    return %c0_i32, %c0_i32_0 : i32, i32
  }
  func.func @transform_21(%arg0: i32) -> (i32, i32) {
    %c0_i32 = arith.constant 0 : i32
    %c0_i32_0 = arith.constant 0 : i32
    %c0_i32_1 = arith.constant 0 : i32
    return %c0_i32, %c0_i32_0 : i32, i32
  }
  func.func @transform_22(%arg0: i32) -> (i32, i32) {
    %c0_i32 = arith.constant 0 : i32
    %c0_i32_0 = arith.constant 0 : i32
    %c0_i32_1 = arith.constant 0 : i32
    return %c0_i32, %c0_i32_0 : i32, i32
  }
  func.func @transform_23(%arg0: i32) -> (i32, i32) {
    %c0_i32 = arith.constant 0 : i32
    %c0_i32_0 = arith.constant 0 : i32
    %c0_i32_1 = arith.constant 0 : i32
    return %c0_i32, %c0_i32_0 : i32, i32
  }
  func.func @transform_24(%arg0: i32) -> (i32, i32, i32) {
    %c0_i32 = arith.constant 0 : i32
    %c0_i32_0 = arith.constant 0 : i32
    %c0_i32_1 = arith.constant 0 : i32
    return %arg0, %c0_i32, %c0_i32_0 : i32, i32, i32
  }
}

</mosaic_0001>

<bundles_post_ra>
// kernel: decoder_forward_pallas.1
= control target key start
LH: loop header
LB: loop body
LE: loop exit
PB: predicated region body
PF: predicated region fallthrough
CT: control target
= control target key end

     0   :  { %s7549_s0 = inlined_call_operand.vmem [shape: f32[2,8,32], index: 0, kind: input, shape index: {}]   ;;  %s7550_s1 = inlined_call_operand.hbm [shape: f32[2,8,32], index: 1, kind: input, shape index: {}]   ;;  %s7551_s2 = inlined_call_operand.vmem [shape: bf16[2,32,96], index: 2, kind: input, shape index: {}]   ;;  %s7552_s3 = inlined_call_operand.hbm [shape: f32[2,1,96], index: 3, kind: input, shape index: {}]   ;;  %s7553_s4 = inlined_call_operand.vmem [shape: bf16[2,32,32], index: 4, kind: input, shape index: {}]   ;;  %s7554_s5 = inlined_call_operand.hbm [shape: f32[2,1,32], index: 5, kind: input, shape index: {}]   ;;  %s7555_s6 = inlined_call_operand.vmem [shape: bf16[2,32,96], index: 6, kind: input, shape index: {}]   ;;  %s7556_s7 = inlined_call_operand.hbm [shape: f32[2,1,96], index: 7, kind: input, shape index: {}]   ;;  %s7557_s8 = inlined_call_operand.hbm [shape: bf16[2,32,32], index: 8, kind: input, shape index: {}]   ;;  %s7558_s9 = inlined_call_operand.hbm [shape: f32[2,1,32], index: 9, kind: input, shape index: {}]   ;;  %s7559_s10 = inlined_call_operand.vmem [shape: bf16[2,32,64], index: 10, kind: input, shape index: {}]   ;;  %s7560_s11 = inlined_call_operand.hbm [shape: f32[2,1,64], index: 11, kind: input, shape index: {}]   ;;  %s7561_s12 = inlined_call_operand.vmem [shape: bf16[2,64,32], index: 12, kind: input, shape index: {}]   ;;  %s7562_s13 = inlined_call_operand.hbm [shape: f32[2,1,32], index: 13, kind: input, shape index: {}]   ;;  %s7563_s14 = inlined_call_operand.vmem [shape: f32[2,3,32], index: 14, kind: input, shape index: {}]   ;;  %s7564_s15 = inlined_call_operand.vmem [shape: f32[2,3,32], index: 15, kind: input, shape index: {}]   ;;  %s7565_s16 = inlined_call_operand.hbm [shape: f32[1,32], index: 16, kind: input, shape index: {}]   ;;  %s7566_s17 = inlined_call_operand.hbm [shape: f32[1,32], index: 17, kind: input, shape index: {}]   ;;  %s7567_s18 = inlined_call_operand.hbm [shape: f32[1,32], index: 18, kind: input, shape index: {}]   ;;  %s7568_s19 = inlined_call_operand.<no memory space> [shape: f32[1,1], index: 19, kind: input, shape index: {}]   ;;  %s7569_s20 = inlined_call_operand.hbm [shape: f32[8,8], index: 20, kind: input, shape index: {}]   ;;  %s7570_s21 = inlined_call_operand.hbm [shape: f32[1,8], index: 21, kind: input, shape index: {}]   ;;  %s7571_s22 = inlined_call_operand.vmem [shape: f32[8,4], index: 22, kind: input, shape index: {}]   ;;  %s7572_s23 = inlined_call_operand.hbm [shape: f32[1,4], index: 23, kind: input, shape index: {}]   ;;  %s7573_s24 = inlined_call_operand.hbm [shape: f32[2,1,4], index: 24, kind: output, shape index: {}]  }
   0x1   :  { %7613 = sst [smem:[#allocation36_spill]] %s7549_s0  ;;  %v29_v0 = vstv %s7568_s19 }
   0x2   :  { %7614 = sst [smem:[#allocation37_spill]] %s7550_s1  ;;  %30 = vst [vmem:[#allocation2] sm:$0x1] %v29_v0 }
   0x3   :  { %7615 = sst [smem:[#allocation38_spill]] %s7551_s2 }
   0x4   :  { %7616 = sst [smem:[#allocation39_spill]] %s7552_s3 }
   0x5   :  { %7617 = sst [smem:[#allocation40_spill]] %s7553_s4 }
   0x6   :  { %7618 = sst [smem:[#allocation41_spill]] %s7554_s5 }
   0x7   :  { %7619 = sst [smem:[#allocation42_spill]] %s7555_s6 }
   0x8   :  { %7620 = sst [smem:[#allocation43_spill]] %s7556_s7 }
   0x9   :  { %7621 = sst [smem:[#allocation44_spill]] %s7557_s8 }
   0xa   :  { %7622 = sst [smem:[#allocation45_spill]] %s7558_s9 }
   0xb   :  { %7623 = sst [smem:[#allocation46_spill]] %s7560_s11 }
   0xc   :  { %7624 = sst [smem:[#allocation47_spill]] %s7562_s13 }
   0xd   :  { %7625 = sst [smem:[#allocation48_spill]] %s7565_s16 }
   0xe   :  { %7626 = sst [smem:[#allocation49_spill]] %s7566_s17 }
   0xf   :  { %7627 = sst [smem:[#allocation50_spill]] %s7567_s18 }
  0x10   :  { %7628 = sst [smem:[#allocation51_spill]] %s7569_s20 }
  0x11   :  { %7629 = sst [smem:[#allocation52_spill]] %s7570_s21 }
  0x12   :  { %7630 = sst [smem:[#allocation53_spill]] %s7571_s22 }
  0x13   :  { %7631 = sst [smem:[#allocation54_spill]] %s7572_s23 }
  0x14   :  { %7632 = sst [smem:[#allocation55_spill]] %s7573_s24 }
  0x15   :  { %31 = vsyncpa [#allocation4], 0 }
  0x16   :  { %33 = vsyncpa [#allocation4 + $0x1], 0 }
  0x17   :  { %34 = vsyncpa [#allocation7], 0 }
  0x18   :  { %35 = vsyncpa [#allocation10], 0 }
  0x19   :  { %36 = vsyncpa [#allocation13], 0 }
  0x1a   :  { %37 = vsyncpa [#allocation16], 0 }
  0x1b   :  { %38 = vsyncpa [#allocation19], 0 }
  0x1c   :  { %39 = vsyncpa [#allocation22], 0 }
  0x1d   :  { %40 = vsyncpa [#allocation25], 0 }
  0x1e   :  { %41 = vsyncpa [#allocation5], 0 }
  0x1f   :  { %43 = vsyncpa [#allocation5 + $0x1], 0  ;;  %s6685_s27 = smov 0   ;;  %s6687_s28 = smov 0  }
  0x20   :  { %s6689_s6 = smov 0   ;;  %s6691_s2 = smov 0  }
  0x21 LB: > { %s6521_s19 = smov [#allocation6]   ;;  %s6706_s0 = sadd.s32 4294967295, %s6519_s2   ;;  %s6519_s2 = sphi %s6691_s2, %s7699_s2   ;;  %s6515_s6 = sphi %s6689_s6, %s7698_s6   ;;  %s6511_s28 = sphi %s6687_s28, %s7697_s28   ;;  %s6507_s27 = sphi %s6685_s27, %s7696_s27  }
  0x22   : > { %s609_s29 = sshll.u32 %s6521_s19, 4  ;;  %p5175_p0 = scmp.ge.s32.totalorder %s6519_s2, 1  ;;  %s610_s29 = int_to_ptr.vmem [resolvable:$true] %s609_s29 }
  0x23   : > { %p7583_p1 = scmp.eq.s32.totalorder %s6706_s0, 0  ;;  %p594_p2 = scmp.lt.s32.totalorder %s6519_s2, 3 }
  0x24   : > { %s6522_s30 = smov [#allocation9]   ;;  %s6523_s8 = smov [#allocation12]  }
  0x25   : > { %p6711_p3 = pnand %p5175_p0, %p594_p2  ;;  %s641_s3 = sshll.u32 %s6522_s30, 4  ;;  %s6724_s3 = int_to_ptr.vmem [resolvable:$true] %s641_s3 }
  0x26   : > { %s667_s4 = sshll.u32 %s6523_s8, 4  ;;  %s6072_s5 = scalar_lea.vmem %s610_s29, 32  ;;  %s6726_s4 = int_to_ptr.vmem [resolvable:$true] %s667_s4 }
  0x27   : > { %s7633_s7 = scalar_select %p6711_p3, 1, 0 }
  0x28   : > { %p5797_p5 = pneg %p6711_p3  ;;  %p6073_p8 = scmp.ne.s32.totalorder %s610_s29, %s6072_s5 }
  0x29   : > { %p6080_p11 = scmp.lt.s32.totalorder %s610_s29, %s610_s29  ;;  %p6081_p12 = scmp.lt.s32.totalorder %s6072_s5, %s6072_s5 }
  0x2a   : > { %p6720_p6 = pnand %p5797_p5, %p7583_p1 }
  0x2b   : > { %p6082_p13 = por %p6081_p12, %p6080_p11 }
  0x2c   : > { %p6730_p7 = pneg %p6720_p6 }
  0x2e   : > { %p6075_p9 = pnand %p6073_p8, %p6730_p7 }
  0x30   : > { %p6076_p10 = pneg %p6075_p9 }
  0x32   : > { %p6083_p0 = pnand %p6082_p13, %p6076_p10 }
  0x34   : > { %6086 = shalt.err (!%p6083_p0)
}
  0x35   : > { %s7579_s26 = smov 16   ;;  %s7581_s19 = smov 1  }
  0x36   : > { %s7636_s24 = sld [smem:[#allocation39_spill]]  ;;  %s6098_s22 = scalar_lea.vmem %s6724_s3, 32 }
  0x37   : > { %p6099_p2 = scmp.ne.s32.totalorder %s6724_s3, %s6098_s22  ;;  %p6106_p9 = scmp.lt.s32.totalorder %s6724_s3, %s6724_s3 }
  0x38   : > { %p6107_p10 = scmp.lt.s32.totalorder %s6098_s22, %s6098_s22 }
  0x39   : > { %p6101_p5 = pnand %p6099_p2, %p6730_p7 }
  0x3a   : > { %p6108_p11 = por %p6107_p10, %p6106_p9 }
  0x3b   : > { %p6102_p8 = pneg %p6101_p5 }
  0x3c   : > { %5800 = dma.hbm_to_vmem [thread:$0]  (!%p6720_p6), %s7636_s24, 32, %s610_s29, [#allocation7], %s7579_s26, %s7579_s26, %s7581_s19  }
  0x3d   : > { %p6109_p12 = pnand %p6108_p11, %p6102_p8 }
  0x3f   : > { %6112 = shalt.err (!%p6109_p12)
}
  0x40   : > { %s7637_s24 = sld [smem:[#allocation43_spill]]  ;;  %s6124_s29 = scalar_lea.vmem %s6726_s4, 32 }
  0x41   : > { %p6125_p13 = scmp.ne.s32.totalorder %s6726_s4, %s6124_s29  ;;  %p6132_p5 = scmp.lt.s32.totalorder %s6726_s4, %s6726_s4 }
  0x42   : > { %p6133_p8 = scmp.lt.s32.totalorder %s6124_s29, %s6124_s29 }
  0x43   : > { %p6127_p0 = pnand %p6125_p13, %p6730_p7 }
  0x44   : > { %p6134_p9 = por %p6133_p8, %p6132_p5 }
  0x45   : > { %p6128_p2 = pneg %p6127_p0 }
  0x46   : > { %5806 = dma.hbm_to_vmem [thread:$0]  (!%p6720_p6), %s7637_s24, 32, %s6724_s3, [#allocation10], %s7579_s26, %s7579_s26, %s7581_s19  }
  0x47   : > { %p6135_p10 = pnand %p6134_p9, %p6128_p2 }
  0x49   : > { %6138 = shalt.err (!%p6135_p10)
}
  0x4a   : > { %s7638_s9 = sld [smem:[#allocation45_spill]]  ;;  %s6526_s3 = smov [#allocation15]  }
  0x4b   : > { %s699_s5 = sshll.u32 %s6526_s3, 4  ;;  %s6527_s30 = smov [#allocation18]   ;;  %s700_s5 = int_to_ptr.vmem [resolvable:$true] %s699_s5 }
  0x4c   : > { %s730_s24 = sshll.u32 %s6527_s30, 4  ;;  %s6150_s29 = scalar_lea.vmem %s700_s5, 32  ;;  %s731_s24 = int_to_ptr.vmem [resolvable:$true] %s730_s24 }
  0x4d   : > { %p6151_p11 = scmp.ne.s32.totalorder %s700_s5, %s6150_s29  ;;  %p6158_p0 = scmp.lt.s32.totalorder %s700_s5, %s700_s5 }
  0x4e   : > { %p6159_p2 = scmp.lt.s32.totalorder %s6150_s29, %s6150_s29 }
  0x4f   : > { %p6153_p12 = pnand %p6151_p11, %p6730_p7 }
  0x50   : > { %5812 = dma.hbm_to_vmem [thread:$0]  (!%p6720_p6), %s7638_s9, 32, %s6726_s4, [#allocation13], %s7579_s26, %s7579_s26, %s7581_s19  }
  0x51   : > { %p6154_p13 = pneg %p6153_p12  ;;  %p6160_p5 = por %p6159_p2, %p6158_p0 }
  0x53   : > { %p6161_p8 = pnand %p6160_p5, %p6154_p13 }
  0x55   : > { %6164 = shalt.err (!%p6161_p8)
}
  0x56   : > { %s7639_s13 = sld [smem:[#allocation47_spill]]  ;;  %s6176_s8 = scalar_lea.vmem %s731_s24, 16 }
  0x57   : > { %p6177_p9 = scmp.ne.s32.totalorder %s731_s24, %s6176_s8  ;;  %s6183_s3 = scalar_lea.vmem %s731_s24, 32 }
  0x58   : > { %p6184_p12 = scmp.lt.s32.totalorder %s731_s24, %s731_s24  ;;  %p6185_p13 = scmp.lt.s32.totalorder %s6183_s3, %s6176_s8 }
  0x59   : > { %p6179_p10 = pnand %p6177_p9, %p6730_p7 }
  0x5a   : > { %p6186_p0 = por %p6185_p13, %p6184_p12 }
  0x5b   : > { %p6180_p11 = pneg %p6179_p10 }
  0x5c   : > { %5818 = dma.hbm_to_vmem [thread:$0]  (!%p6720_p6), %s7639_s13, 32, %s700_s5, [#allocation16], %s7579_s26, %s7579_s26, %s7581_s19  }
  0x5d   : > { %p6187_p2 = pnand %p6186_p0, %p6180_p11 }
  0x5f   : > { %6190 = shalt.err (!%p6187_p2)
}
  0x60   : > { %s7640_s17 = sld [smem:[#allocation49_spill]]  ;;  %s6528_s5 = smov [#allocation21]  }
  0x61   : > { %s755_s4 = sshll.u32 %s6528_s5, 4  ;;  %s6529_s22 = smov [#allocation8]   ;;  %s756_s4 = int_to_ptr.vmem [resolvable:$true] %s755_s4 }
  0x62   : > { %s625_s26 = sshll.u32 %s6529_s22, 4  ;;  %s6202_s19 = scalar_lea.vmem %s756_s4, 128  ;;  %s626_s26 = int_to_ptr.vmem [resolvable:$true] %s625_s26 }
  0x63   : > { %p6203_p5 = scmp.ne.s32.totalorder %s756_s4, %s6202_s19  ;;  %p6210_p10 = scmp.lt.s32.totalorder %s756_s4, %s756_s4 }
  0x64   : > { %p6211_p11 = scmp.lt.s32.totalorder %s6202_s19, %s6202_s19 }
  0x65   : > { %p6205_p8 = pnand %p6203_p5, %p6730_p7 }
  0x66   : > { %5824 = dma.hbm_to_vmem [thread:$0]  (!%p6720_p6), %s7640_s17, 16, %s731_s24, [#allocation19]  }
  0x67   : > { %p6206_p9 = pneg %p6205_p8  ;;  %p6212_p12 = por %p6211_p11, %p6210_p10 }
  0x69   : > { %p6213_p13 = pnand %p6212_p12, %p6206_p9 }
  0x6b   : > { %6216 = shalt.err (!%p6213_p13)
}
  0x6c   : > { %s7641_s20 = sld [smem:[#allocation51_spill]]  ;;  %s6228_s24 = scalar_lea.vmem %s626_s26, 32 }
  0x6d   : > { %p6229_p0 = scmp.ne.s32.totalorder %s626_s26, %s6228_s24  ;;  %p6236_p5 = scmp.lt.s32.totalorder %s626_s26, %s626_s26 }
  0x6e   : > { %p6237_p8 = scmp.lt.s32.totalorder %s6228_s24, %s6228_s24 }
  0x6f   : > { %p6231_p2 = pnand %p6229_p0, %p6730_p7 }
  0x70   : > { %p6238_p1 = por %p6237_p8, %p6236_p5 }
  0x71   : > { %p6232_p4 = pneg %p6231_p2 }
  0x72   : > { %5830 = dma.hbm_to_vmem [thread:$0]  (!%p6720_p6), %s7641_s20, 128, %s756_s4, [#allocation22]  }
  0x73   : > { %p6239_p3 = pnand %p6238_p1, %p6232_p4 }
  0x75   : > { %6242 = shalt.err (!%p6239_p3)
}
  0x76   : > { %s7642_s19 = smov 1   ;;  %s7643_s30 = smov 16  }
  0x77   : > { %s7644_s22 = sld [smem:[#allocation41_spill]]  ;;  %s6530_s4 = smov [#allocation11]  }
  0x78   : > { %s654_s8 = sshll.u32 %s6530_s4, 4  ;;  %s655_s8 = int_to_ptr.vmem [resolvable:$true] %s654_s8 }
  0x79   : > { %s6254_s3 = scalar_lea.vmem %s655_s8, 512  ;;  %p6262_p1 = scmp.lt.s32.totalorder %s655_s8, %s655_s8 }
  0x7a   : > { %p6255_p9 = scmp.ne.s32.totalorder %s655_s8, %s6254_s3  ;;  %p6263_p3 = scmp.lt.s32.totalorder %s6254_s3, %s6254_s3 }
  0x7c   : > { %p6257_p10 = pnand %p6255_p9, %p6730_p7  ;;  %p6264_p4 = por %p6263_p3, %p6262_p1 }
  0x7d   : > { %5803 = dma.hbm_to_vmem [thread:$0]  (!%p6720_p6), %s7644_s22, 32, %s626_s26, [#allocation7], %s7643_s30, %s7643_s30, %s7642_s19  }
  0x7e   : > { %p6258_p11 = pneg %p6257_p10 }
  0x80   : > { %p6265_p12 = pnand %p6264_p4, %p6258_p11 }
  0x82   : > { %6268 = shalt.err (!%p6265_p12)
}
  0x83   : > { %s6531_s24 = smov 64   ;;  %s6532_s9 = smov 4  }
  0x84   : > { %s7645_s5 = sld [smem:[#allocation44_spill]]  ;;  %s6533_s22 = smov [#allocation14]  }
  0x85   : > { %s683_s4 = sshll.u32 %s6533_s22, 4  ;;  %s6534_s13 = smov [#allocation17]   ;;  %s684_s4 = int_to_ptr.vmem [resolvable:$true] %s683_s4 }
  0x86   : > { %s719_s17 = sshll.u32 %s6534_s13, 4  ;;  %s6280_s20 = scalar_lea.vmem %s684_s4, 32  ;;  %s720_s17 = int_to_ptr.vmem [resolvable:$true] %s719_s17 }
  0x87   : > { %p6281_p13 = scmp.ne.s32.totalorder %s684_s4, %s6280_s20  ;;  %p6288_p5 = scmp.lt.s32.totalorder %s684_s4, %s684_s4 }
  0x88   : > { %p6289_p8 = scmp.lt.s32.totalorder %s6280_s20, %s6280_s20 }
  0x89   : > { %p6283_p0 = pnand %p6281_p13, %p6730_p7 }
  0x8a   : > { %5809 = dma.hbm_to_vmem [thread:$0]  (!%p6720_p6), %s7645_s5, 512, %s655_s8, [#allocation10], %s6531_s24, %s6531_s24, %s6532_s9  }
  0x8b   : > { %p6284_p2 = pneg %p6283_p0  ;;  %p6290_p9 = por %p6289_p8, %p6288_p5 }
  0x8d   : > { %p6291_p10 = pnand %p6290_p9, %p6284_p2 }
  0x8f   : > { %6294 = shalt.err (!%p6291_p10)
}
  0x90   : > { %s7646_s11 = sld [smem:[#allocation46_spill]]  ;;  %s6306_s13 = scalar_lea.vmem %s720_s17, 16 }
  0x91   : > { %p6307_p11 = scmp.ne.s32.totalorder %s720_s17, %s6306_s13  ;;  %s6313_s3 = scalar_lea.vmem %s720_s17, 32 }
  0x92   : > { %p6314_p4 = scmp.lt.s32.totalorder %s720_s17, %s720_s17  ;;  %p6315_p12 = scmp.lt.s32.totalorder %s6313_s3, %s6306_s13 }
  0x93   : > { %p6309_p1 = pnand %p6307_p11, %p6730_p7 }
  0x94   : > { %p6316_p13 = por %p6315_p12, %p6314_p4 }
  0x95   : > { %p6310_p3 = pneg %p6309_p1 }
  0x96   : > { %5815 = dma.hbm_to_vmem [thread:$0]  (!%p6720_p6), %s7646_s11, 32, %s684_s4, [#allocation13], %s7643_s30, %s7643_s30, %s7642_s19  }
  0x97   : > { %p6317_p0 = pnand %p6316_p13, %p6310_p3 }
  0x99   : > { %6320 = shalt.err (!%p6317_p0)
}
  0x9a   : > { %s7647_s16 = sld [smem:[#allocation48_spill]]  ;;  %s6535_s29 = smov [#allocation20]  }
  0x9b   : > { %s741_s19 = sshll.u32 %s6535_s29, 4  ;;  %s6536_s30 = smov [#allocation23]   ;;  %s742_s19 = int_to_ptr.vmem [resolvable:$true] %s741_s19 }
  0x9c   : > { %s766_s26 = sshll.u32 %s6536_s30, 4  ;;  %s6332_s5 = scalar_lea.vmem %s742_s19, 16  ;;  %s767_s26 = int_to_ptr.vmem [resolvable:$true] %s766_s26 }
  0x9d   : > { %p6333_p2 = scmp.ne.s32.totalorder %s742_s19, %s6332_s5  ;;  %s6339_s22 = scalar_lea.vmem %s742_s19, 32 }
  0x9e   : > { %p6340_p9 = scmp.lt.s32.totalorder %s742_s19, %s742_s19  ;;  %p6341_p10 = scmp.lt.s32.totalorder %s6339_s22, %s6332_s5 }
  0x9f   : > { %p6335_p5 = pnand %p6333_p2, %p6730_p7 }
  0xa0   : > { %5821 = dma.hbm_to_vmem [thread:$0]  (!%p6720_p6), %s7647_s16, 16, %s720_s17, [#allocation16]  }
  0xa1   : > { %p6336_p8 = pneg %p6335_p5  ;;  %p6342_p11 = por %p6341_p10, %p6340_p9 }
  0xa3   : > { %p6343_p1 = pnand %p6342_p11, %p6336_p8 }
  0xa5   : > { %6346 = shalt.err (!%p6343_p1)
}
  0xa6   : > { %s7648_s18 = sld [smem:[#allocation50_spill]]  ;;  %s6358_s9 = scalar_lea.vmem %s767_s26, 16 }
  0xa7   : > { %p6359_p3 = scmp.ne.s32.totalorder %s767_s26, %s6358_s9  ;;  %s6365_s8 = scalar_lea.vmem %s767_s26, 32 }
  0xa8   : > { %p6366_p13 = scmp.lt.s32.totalorder %s767_s26, %s767_s26  ;;  %p6367_p0 = scmp.lt.s32.totalorder %s6365_s8, %s6358_s9 }
  0xa9   : > { %p6361_p4 = pnand %p6359_p3, %p6730_p7 }
  0xaa   : > { %p6368_p2 = por %p6367_p0, %p6366_p13 }
  0xab   : > { %p6362_p12 = pneg %p6361_p4 }
  0xac   : > { %5827 = dma.hbm_to_vmem [thread:$0]  (!%p6720_p6), %s7648_s18, 16, %s742_s19, [#allocation19]  }
  0xad   : > { %p6369_p5 = pnand %p6368_p2, %p6362_p12 }
  0xaf   : > { %6372 = shalt.err (!%p6369_p5)
}
  0xb0   : > { %s7649_s21 = sld [smem:[#allocation52_spill]]  ;;  %s6537_s20 = smov [#allocation24]  }
  0xb1   : > { %s780_s24 = sshll.u32 %s6537_s20, 4  ;;  %s781_s24 = int_to_ptr.vmem [resolvable:$true] %s780_s24 }
  0xb2   : > { %s6384_s29 = scalar_lea.vmem %s781_s24, 16  ;;  %s6391_s19 = scalar_lea.vmem %s781_s24, 32 }
  0xb3   : > { %p6385_p8 = scmp.ne.s32.totalorder %s781_s24, %s6384_s29  ;;  %p6392_p11 = scmp.lt.s32.totalorder %s781_s24, %s781_s24 }
  0xb4   : > { %p6393_p1 = scmp.lt.s32.totalorder %s6391_s19, %s6384_s29 }
  0xb5   : > { %p6387_p9 = pnand %p6385_p8, %p6730_p7 }
  0xb6   : > { %5833 = dma.hbm_to_vmem [thread:$0]  (!%p6720_p6), %s7649_s21, 16, %s767_s26, [#allocation22]  }
  0xb7   : > { %p6388_p10 = pneg %p6387_p9  ;;  %p6394_p3 = por %p6393_p1, %p6392_p11 }
  0xb9   : > { %p6395_p4 = pnand %p6394_p3, %p6388_p10 }
  0xbb   : > { %6398 = shalt.err (!%p6395_p4)
}
  0xbc   : > { %s7650_s23 = sld [smem:[#allocation54_spill]]  ;;  %s5174_s1 = sadd.s32 4294967294, %s6519_s2  }
  0xbd   : > { %s6855_s25 = sadd.s32 1, %s6519_s2   ;;  %s82_s26 = sadd.s32 1, %s6515_s6 }
  0xbe   : > { %s79_s22 = ssub.s32 %s6519_s2, %s6855_s25  ;;  %p89_p7 = scmp.ne.s32.totalorder %s6515_s6, %s6511_s28 }
  0xbf   : > { %p80_p12 = scmp.eq.s32.totalorder %s79_s22, 0  ;;  %p90_p13 = scmp.eq.s32.totalorder %s6519_s2, 0 }
  0xc0   : > { %p95_p0 = scmp.ne.s32.totalorder %s6511_s28, %s6507_s27  ;;  %p581_p2 = scmp.eq.s32.totalorder %s6706_s0, 1 }
  0xc1   : > { %s6867_s17 = scalar_select %p80_p12, %s6515_s6, %s82_s26  }
  0xc2   : > { %5836 = dma.hbm_to_vmem [thread:$0]  (!%p6720_p6), %s7650_s23, 16, %s781_s24, [#allocation25]  }
  0xc3   : > { %p91_p5 = por %p90_p13, %p89_p7  ;;  %p7651_p8 = scmp.eq.s32.totalorder %s6706_s0, 0 }
  0xc4   : > { %p6875_p6 = por %p581_p2, %p89_p7  ;;  %p587_p10 = scmp.eq.s32.totalorder %s5174_s1, 1 }
  0xc5   : > { %p6871_p9 = por %p7651_p8, %p95_p0  ;;  %p5858_p11 = scmp.lt.s32.totalorder %s6519_s2, 2 }
  0xc6   : > { %s7653_s9 = scalar_select %p6875_p6, 1, 0 }
  0xc7   : > { %s7652_s4 = scalar_select %p6871_p9, 1, 0 }
  0xc8   : > { %s798_s8 = sand.u32 1, %s6515_s6   ;;  %p6881_p1 = por %p587_p10, %p95_p0 }
  0xc9   : > { %s5190_s3 = sshll.u32 %s798_s8, 3  ;;  %s5191_s20 = sshll.u32 %s6519_s2, 7 }
  0xca   : > { %s7654_s13 = scalar_select %p6881_p1, 1, 0 }
  0xcb   : > { %s7655_s19 = sld [smem:[#allocation37_spill]]  ;;  %s802_s5 = scalar_lea.vmem [#allocation3], %s5190_s3 }
  0xcc   : > { %s809_s26 = sshll.u32 %s802_s5, 4  ;;  %p6891_p3 = pnand %p5858_p11, %p91_p5  ;;  %s810_s26 = int_to_ptr.vmem [resolvable:$true] %s809_s26 }
  0xcd   : > { %s799_s22 = scalar_lea.sflag [#allocation4], %s798_s8 }
  0xce   : > { %p6401_p7 = pneg %p6891_p3 }
  0xd1   : > { %s6889_s30 = scalar_lea.hbm %s7655_s19, %s5191_s20  ;;  %s6404_s29 = scalar_lea.hbm %s7655_s19, 256 }
  0xd2   : > { %s6399_s11 = scalar_lea.hbm %s6889_s30, 128  ;;  %p6405_p0 = scmp.lt.s32.totalorder %s6889_s30, %s7655_s19 }
  0xd3   : > { %p6400_p4 = scmp.ne.s32.totalorder %s6889_s30, %s6399_s11  ;;  %p6406_p2 = scmp.lt.s32.totalorder %s6404_s29, %s6399_s11 }
  0xd5   : > { %p6402_p12 = pnand %p6401_p7, %p6400_p4  ;;  %p6407_p5 = por %p6406_p2, %p6405_p0 }
  0xd7   : > { %p6403_p13 = pneg %p6402_p12 }
  0xd9   : > { %p6408_p8 = pnand %p6407_p5, %p6403_p13 }
  0xdb   : > { %6411 = shalt.err (!%p6408_p8)
}
  0xdc   : > { %s6412_s5 = scalar_lea.vmem %s810_s26, 128  ;;  %s6538_s8 = smov [#allocation3]  }
  0xdd   : > { %p6413_p10 = scmp.ne.s32.totalorder %s810_s26, %s6412_s5  ;;  %s6417_s18 = sshll.u32 %s6538_s8, 4  ;;  %s6418_s18 = int_to_ptr.vmem [resolvable:$false] %s6417_s18 }
  0xde   : > { %s6419_s21 = scalar_lea.vmem %s6418_s18, 256  ;;  %p6420_p4 = scmp.lt.s32.totalorder %s810_s26, %s6418_s18 }
  0xdf   : > { %p6415_p11 = pnand %p6413_p10, %p6401_p7  ;;  %p6421_p12 = scmp.lt.s32.totalorder %s6419_s21, %s6412_s5 }
  0xe1   : > { %p6416_p1 = pneg %p6415_p11  ;;  %p6422_p6 = por %p6421_p12, %p6420_p4 }
  0xe3   : > { %p6423_p9 = pnand %p6422_p6, %p6416_p1 }
  0xe5   : > { %6426 = shalt.err (!%p6423_p9)
}
  0xe6   : > { %5840 = dma.hbm_to_vmem [thread:$0]  (!%p6891_p3), %s6889_s30, 128, %s810_s26, %s799_s22  }
  0xe7   : > { %p7657_p13 = scmp.ne.s32.totalorder %s7633_s7, 0 }
  0xe8   : > { %s6912_s11 = sand.u32 (!%p7657_p13), 1, %s6511_s28   ;;  %p7658_p7 = scmp.ne.s32.totalorder (!%p7657_p13), %s7652_s4, 0 }
  0xe9   : > { %818 = sbr.rel (%p7657_p13) target bundleno = 9021 (0x233d), region = 116  ;;  %s5193_s16 = sshll.u32 (!%p7657_p13), %s6912_s11, 3 }
  0xea   : > { %s821_s20 = scalar_lea.sflag (!%p7657_p13), [#allocation4], %s6912_s11  ;;  %s6916_s18 = scalar_lea.vmem (!%p7657_p13), [#allocation3], %s5193_s16 }
  0xee   : > { %6470 = dma.done.wait (%p7658_p7), %s821_s20, 128  }
  0xef   : > { %6472 = vsyncadd (%p7658_p7), %s821_s20, 4294967168  ;;  %p7659_p9 = scmp.eq.s32.totalorder %s6706_s0, 0 }
  0xf1   : > { %6474 = dma.done.wait (%p7659_p9), [#allocation7], 64   ;;  %p7660_p6 = pmov %p7659_p9 }
  0xf3   : > { %6476 = vsyncadd (%p7660_p6), [#allocation7], 4294967232  ;;  %p7661_p1 = pmov %p7660_p6 }
  0xf5   : > { %6478 = dma.done.wait (%p7661_p1), [#allocation10], 544   ;;  %p7662_p3 = pmov %p7661_p1 }
  0xf6   : > { %p7663_p0 = pmov %p7661_p1 }
  0xf7   : > { %6480 = vsyncadd (%p7662_p3), [#allocation10], 4294966752 }
  0xf8   : > { %6482 = dma.done.wait (%p7663_p0), [#allocation13], 64   ;;  %p7664_p2 = pmov %p7663_p0 }
  0xf9   : > { %p7665_p5 = pmov %p7663_p0 }
  0xfa   : > { %6484 = vsyncadd (%p7664_p2), [#allocation13], 4294967232 }
  0xfb   : > { %6486 = dma.done.wait (%p7665_p5), [#allocation16], 48   ;;  %p7666_p8 = pmov %p7663_p0 }
  0xfc   : > { %p7667_p10 = pmov %p7663_p0 }
  0xfd   : > { %6488 = vsyncadd (%p7666_p8), [#allocation16], 4294967248 }
  0xfe   : > { %6490 = dma.done.wait (%p7667_p10), [#allocation19], 32   ;;  %p7668_p11 = pmov %p7663_p0 }
  0xff   : > { %p7669_p4 = pmov %p7663_p0 }
 0x100   : > { %6492 = vsyncadd (%p7668_p11), [#allocation19], 4294967264 }
 0x101   : > { %6494 = dma.done.wait (%p7669_p4), [#allocation22], 144   ;;  %p7670_p12 = pmov %p7663_p0 }
 0x102   : > { %p7671_p13 = pmov %p7663_p0 }
 0x103   : > { %6496 = vsyncadd (%p7670_p12), [#allocation22], 4294967152 }
 0x104   : > { %6498 = dma.done.wait (%p7671_p13), [#allocation25], 16   ;;  %p7672_p7 = pmov %p7663_p0 }
 0x105   : > { %v6539_v1 = vmov 0.0   ;;  %vm6540_vm0 = vmmov 0   ;;  %s7673_s4 = sld [smem:[#allocation38_spill]]  ;;  %v6963_v4 = vld [vmem:[%s6916_s18] sm:$0xff]  ;;  %vm982_vm1 = vcmask 261120   ;;  %s7589_s1 = smov 64  }
 0x106   : > { %6500 = vsyncadd (%p7672_p7), [#allocation25], 4294967280  ;;  %5456 = vmatprep.subr.bf16.mxu0 %v6539_v1  ;;  %5460 = vmatprep.mubr.msk.bf16.mxu0 %vm6540_vm0, %v6539_v1  ;;  %v6968_v5 = vpack.c.bf16 %v6963_v4, %v6963_v4  ;;  %v5208_v6 = vld [vmem:[#allocation6] ss:$0 sm:$0xff]  ;;  %s7607_s22 = smov 96   ;;  %s7609_s24 = smov 88  }
 0x107   : > { %5469 = vmatprep.subr.mxu1 %v6539_v1  ;;  %5471 = vmatprep.mubr.msk.f32.mxu1 %vm6540_vm0, %v6539_v1  ;;  %s7605_s29 = smov 120   ;;  %s7599_s3 = smov 80   ;;  %vm1029_vm2 = vcmask 64512   ;;  %vm1703_vm3 = vcmask 130048   ;;  %vm1705_vm4 = vcmask 195584   ;;  %vm2804_vm9 = vcmask 523264  }
 0x108   : > { %s7591_s5 = smov 72   ;;  %s7603_s8 = smov 112  }
 0x109   : > { %s7601_s16 = smov 104   ;;  %s7590_s20 = smov 56  }
 0x10a   : > { %s7587_s21 = smov 40   ;;  %s7588_s7 = smov 48  }
 0x10b   : > { %v5940_v2 = vld [vmem:[%s7673_s4 + $0x8] sm:$0xff]   ;;  %v5941_v3 = vld [vmem:[%s7673_s4] sm:$0xff]   ;;  %s7593_s30 = smov 24   ;;  %s7675_s26 = sld [smem:[#allocation42_spill]] }
 0x10c   : > { %5457 = vmatpush3.bf16.msra.mxu0 %v5940_v2  ;;  %p944_p9 = scmp.lt.s32.totalorder %s6706_s0, 1  ;;  %s7682_s23 = smov 88  }
 0x10d   : > { %5458 = vmatprep.subr.bf16.mxu0 %v6539_v1  ;;  %s7683_s19 = smov 96   ;;  %p7693_p1 = scmp.ne.s32.totalorder %s7653_s9, 0 }
 0x110   : > { %5459 = vmatpush3.bf16.msra.mxu0 %v5941_v3 }
 0x111   : > { %5464 = vmatprep.subr.mxu0 %v6539_v1 }
 0x113   : > { %5461 = vmatmul.mubr.msk.bf16.vlgmr.msra.gmra.mxu0 %vm982_vm1, %v6968_v5 }
 0x114   : > { %5466 = vmatprep.mubr.msk.f32.mxu0 %vm6540_vm0, %v6539_v1 }
 0x1d3   : > { %v1020_v7 = vpop.f32.mrf.mxu0 }
 0x1d4   : > { %v6975_v8 = vadd.f32 %v5208_v6, %v1020_v7 }
 0x1d5   : > { %v5462_v9 = vpop.f32.mrf.mxu0 }
 0x1d6   : > { %1116 = vrot.lane.b32.xlu1 %v6975_v8, %s7589_s1  ;;  %1027 = vrot.lane.b32.xlu0 %v6975_v8, %s7607_s22  ;;  %s7677_s1 = smov 80  }
 0x1d7   : > { %v1023_v10 = vpop.f32.mrf.mxu0 }
 0x1d9   : > { %v5463_v11 = vpop.f32.mrf.mxu0 }
 0x1da   : > { %1194 = vrot.lane.b32.xlu1 %v6975_v8, %s7609_s24 }
 0x1de   : > { %1192 = vrot.lane.b32.xlu1 %v6975_v8, %s7605_s29 }
 0x1e2   : > { %1360 = vrot.lane.b32.xlu1 %v6975_v8, %s7599_s3 }
 0x248   : > { %v1117_v12 = vpop.permute.xlu1 %1116  ;;  %v1028_v13 = vpop.permute.xlu0 %1027 }
 0x249   : > { %5465 = vmatpush3.xpose.msk.msra.mxu0 %vm1029_vm2, %v1028_v13  ;;  %5470 = vmatpush3.msra.mxu1 %v1117_v12 }
 0x24a   : > { %5474 = vmatprep.subr.mxu1 %v6539_v1  ;;  %5479 = vmatprep.subr.mxu0 %v6539_v1 }
 0x24c   : > { %5467 = vmatmul.mubr.msk.f32.vlgmr.msra.gmra.mxu0 %vm1029_vm2, %v6975_v8  ;;  %v1195_v23 = vpop.permute.xlu1 %1194 }
 0x24d   : > { %5481 = vmatprep.mubr.msk.f32.mxu0 %vm6540_vm0, %v6539_v1 }
 0x250   : > { %v1193_v24 = vpop.permute.xlu1 %1192 }
 0x254   : > { %v1361_v25 = vpop.permute.xlu1 %1360 }
 0x30c   : > { %v1100_v14 = vpop.f32.mrf.mxu0 }
 0x30d   : > { %v1104_v15 = vmul.f32 0.35355338, %v1100_v14 }
 0x30e   : > { %v5468_v16 = vpop.f32.mrf.mxu0 }
 0x30f   : > { %v1105_v17 = vsel %vm1029_vm2, %v1104_v15, -inf }
 0x310   : > { %1106 = vmax.xlane.f32.xlu0 %v1105_v17 }
 0x326   : > { %1526 = vrot.lane.b32.xlu0 %v6975_v8, %s7591_s5  ;;  %s7595_s5 = smov 16  }
 0x399   : > { %v1107_v18 = vpop.xlane.xlu0 %1106 }
 0x39a   : > { %v1108_v19 = vsub.f32 %v1104_v15, %v1107_v18 }
 0x39c   : > { %v1109_v20 = vmul.f32 1.442695, %v1108_v19 }
 0x39d   : > { %v1527_v30 = vpop.permute.xlu0 %1526 }
 0x39e   : > { %5968 = vpow2.f32 %v1109_v20 }
 0x3ab   : > { %v5969_v21 = vpop.eup %5968 }
 0x3ac   : > { %v1111_v22 = vsel %vm1029_vm2, %v5969_v21, 0.0 }
 0x3ad   : > { %1112 = vadd.xlane.f32.xlu1 %v1111_v22 }
 0x3be   : > { %1358 = vrot.lane.b32.xlu1 %v6975_v8, %s7603_s8 }
 0x3c2   : > { %1524 = vrot.lane.b32.xlu1 %v6975_v8, %s7601_s16 }
 0x436   : > { %v1113_v26 = vpop.xlane.xlu1 %1112 }
 0x437   : > { %5970 = vrcp.f32 %v1113_v26 }
 0x43a   : > { %v1359_v29 = vpop.permute.xlu1 %1358 }
 0x43e   : > { %v1525_v31 = vpop.permute.xlu1 %1524 }
 0x444   : > { %v5971_v27 = vpop.eup %5970 }
 0x445   : > { %v1115_v28 = vmul.f32 %v5971_v27, %v5969_v21  ;;  %v5224_v27 = vld [vmem:[#allocation8] ss:$0 sm:$0xff] }
 0x447   : > { %5472 = vmatmul.mubr.msk.f32.vlgmr.msra.gmra.mxu1 %vm1029_vm2, %v1115_v28 }
 0x448   : > { %5475 = vmatpush3.xpose.msk.msra.mxu1 %vm1029_vm2, %v1195_v23  ;;  %5476 = vmatprep.mubr.msk.f32.mxu1 %vm6540_vm0, %v6539_v1 }
 0x449   : > { %5484 = vmatprep.subr.mxu1 %v6539_v1 }
 0x44b   : > { %5477 = vmatmul.mubr.msk.f32.vlgmr.msra.gmra.mxu1 %vm1029_vm2, %v1193_v24 }
 0x44c   : > { %5485 = vmatpush3.xpose.msk.msra.mxu1 %vm1029_vm2, %v1361_v25  ;;  %5486 = vmatprep.mubr.msk.f32.mxu1 %vm6540_vm0, %v6539_v1 }
 0x44d   : > { %5494 = vmatprep.subr.mxu1 %v6539_v1 }
 0x44f   : > { %5487 = vmatmul.mubr.msk.f32.vlgmr.msra.gmra.mxu1 %vm1029_vm2, %v1359_v29 }
 0x450   : > { %5495 = vmatpush3.xpose.msk.msra.mxu1 %vm1029_vm2, %v1527_v30  ;;  %5496 = vmatprep.mubr.msk.f32.mxu1 %vm6540_vm0, %v6539_v1 }
 0x451   : > { %5504 = vmatprep.subr.bf16.mxu1 %v6539_v1 }
 0x453   : > { %5497 = vmatmul.mubr.msk.f32.vlgmr.msra.gmra.mxu1 %vm1029_vm2, %v1525_v31 }
 0x454   : > { %5508 = vmatprep.mubr.msk.bf16.mxu1 %vm6540_vm0, %v6539_v1 }
 0x507   : > { %v7020_v32 = vpop.f32.mrf.mxu1 }
 0x509   : > { %v5473_v33 = vpop.f32.mrf.mxu1 }
 0x50b   : > { %v1266_v34 = vpop.f32.mrf.mxu1 }
 0x50c   : > { %v1270_v35 = vmul.f32 0.35355338, %v1266_v34 }
 0x50d   : > { %v5478_v36 = vpop.f32.mrf.mxu1 }
 0x50e   : > { %v1271_v37 = vsel %vm1029_vm2, %v1270_v35, -inf  ;;  %v5945_v36 = vld [vmem:[%s7675_s26] sm:$0xff]  }
 0x50f   : > { %1272 = vmax.xlane.f32.xlu1 %v1271_v37  ;;  %v1432_v38 = vpop.f32.mrf.mxu1 }
 0x510   : > { %v1436_v39 = vmul.f32 0.35355338, %v1432_v38 }
 0x511   : > { %v5488_v40 = vpop.f32.mrf.mxu1 }
 0x512   : > { %v1437_v41 = vsel %vm1029_vm2, %v1436_v39, -inf }
 0x513   : > { %1438 = vmax.xlane.f32.xlu0 %v1437_v41  ;;  %v1598_v42 = vpop.f32.mrf.mxu1 }
 0x514   : > { %v1602_v43 = vmul.f32 0.35355338, %v1598_v42  ;;  %v5228_v42 = vld [vmem:[#allocation9] ss:$0 sm:$0xff] }
 0x515   : > { %v5498_v44 = vpop.f32.mrf.mxu1 }
 0x516   : > { %v1603_v45 = vsel %vm1029_vm2, %v1602_v43, -inf }
 0x517   : > { %1604 = vmax.xlane.f32.xlu1 %v1603_v45 }
 0x528   : > { %1282 = vrot.lane.b32.xlu1 %v6975_v8, %s7590_s20  ;;  %s7597_s20 = smov 8  }
 0x598   : > { %v1273_v46 = vpop.xlane.xlu1 %1272 }
 0x599   : > { %v1274_v47 = vsub.f32 %v1270_v35, %v1273_v46  ;;  %v5944_v35 = vld [vmem:[%s7675_s26 + $0x8] sm:$0xff]  }
 0x59b   : > { %v1275_v48 = vmul.f32 1.442695, %v1274_v47 }
 0x59c   : > { %v1439_v49 = vpop.xlane.xlu0 %1438 }
 0x59d   : > { %5972 = vpow2.f32 %v1275_v48  ;;  %v1440_v50 = vsub.f32 %v1436_v39, %v1439_v49 }
 0x59f   : > { %v1441_v51 = vmul.f32 1.442695, %v1440_v50 }
 0x5a0   : > { %v1605_v52 = vpop.xlane.xlu1 %1604 }
 0x5a1   : > { %5974 = vpow2.f32 %v1441_v51  ;;  %v1606_v53 = vsub.f32 %v1602_v43, %v1605_v52  ;;  %v1781_v51 = vlaneseq }
 0x5a3   : > { %v1607_v54 = vmul.f32 1.442695, %v1606_v53 }
 0x5a4   : > { %v1283_v55 = vpop.permute.xlu1 %1282 }
 0x5a5   : > { %5976 = vpow2.f32 %v1607_v54  ;;  %5480 = vmatpush3.msra.mxu0 %v1283_v55  ;;  %v7088_v55 = vshrl.u32 %v1781_v51, 7 }
 0x5a6   : > { %5489 = vmatprep.subr.mxu0 %v6539_v1 }
 0x5aa   : > { %v5973_v56 = vpop.eup %5972 }
 0x5ab   : > { %v1277_v57 = vsel %vm1029_vm2, %v5973_v56, 0.0 }
 0x5ac   : > { %1278 = vadd.xlane.f32.xlu1 %v1277_v57  ;;  %v7096_v57 = vld [vmem:[%s7563_s14] sm:$0x7] }
 0x5ae   : > { %v5975_v58 = vpop.eup %5974 }
 0x5af   : > { %v1443_v59 = vsel %vm1029_vm2, %v5975_v58, 0.0 }
 0x5b0   : > { %1444 = vadd.xlane.f32.xlu1 %v1443_v59  ;;  %v7103_v59 = vld [vmem:[%s7564_s15] sm:$0x7] }
 0x5b2   : > { %v5977_v60 = vpop.eup %5976 }
 0x5b3   : > { %v1609_v61 = vsel %vm1029_vm2, %v5977_v60, 0.0 }
 0x5b4   : > { %1610 = vadd.xlane.f32.xlu0 %v1609_v61 }
 0x5c1   : > { %1614 = vrot.lane.b32.xlu1 %v6975_v8, %s7587_s21  ;;  %s7674_s21 = sld [smem:[#allocation40_spill]] }
 0x5c7   : > { %v5942_v12 = vld [vmem:[%s7674_s21 + $0x8] sm:$0xff]   ;;  %v5943_v13 = vld [vmem:[%s7674_s21] sm:$0xff]  }
 0x5c8   : > { %5505 = vmatpush3.bf16.msra.mxu1 %v5942_v12 }
 0x5c9   : > { %5506 = vmatprep.subr.bf16.mxu1 %v6539_v1 }
 0x5ca   : > { %1448 = vrot.lane.b32.xlu0 %v6975_v8, %s7588_s7  ;;  %s7678_s7 = smov 72  }
 0x5cc   : > { %5507 = vmatpush3.bf16.msra.mxu1 %v5943_v13 }
 0x5cd   : > { %5520 = vmatprep.subr.bf16.mxu1 %v6539_v1 }
 0x635   : > { %v1279_v62 = vpop.xlane.xlu1 %1278 }
 0x636   : > { %5978 = vrcp.f32 %v1279_v62 }
 0x639   : > { %v1445_v63 = vpop.xlane.xlu1 %1444 }
 0x63a   : > { %5980 = vrcp.f32 %v1445_v63 }
 0x63d   : > { %v1611_v0 = vpop.xlane.xlu0 %1610  ;;  %v1615_v8 = vpop.permute.xlu1 %1614 }
 0x63e   : > { %5982 = vrcp.f32 %v1611_v0 }
 0x641   : > { %v1449_v6 = vpop.permute.xlu0 %1448 }
 0x643   : > { %v5979_v2 = vpop.eup %5978 }
 0x644   : > { %v1281_v3 = vmul.f32 %v5979_v2, %v5973_v56  ;;  %v7091_v56 = vsub.s32 0, %v7088_v55 }
 0x646   : > { %5482 = vmatmul.mubr.msk.f32.vlgmr.msra.gmra.mxu0 %vm1029_vm2, %v1281_v3  ;;  %v1799_v61 = vrot.slane %v7103_v59, %v7091_v56 }
 0x647   : > { %v5981_v7 = vpop.eup %5980  ;;  %5490 = vmatpush3.msra.mxu0 %v1449_v6  ;;  %5491 = vmatprep.mubr.msk.f32.mxu0 %vm6540_vm0, %v6539_v1 }
 0x648   : > { %5499 = vmatprep.subr.mxu0 %v6539_v1  ;;  %v1447_v9 = vmul.f32 %v5981_v7, %v5975_v58  ;;  %v1784_v58 = vrot.slane %v7096_v57, %v7091_v56 }
 0x64a   : > { %5492 = vmatmul.mubr.msk.f32.vlgmr.msra.gmra.mxu0 %vm1029_vm2, %v1447_v9 }
 0x64b   : > { %v5983_v10 = vpop.eup %5982  ;;  %5500 = vmatpush3.msra.mxu0 %v1615_v8  ;;  %5501 = vmatprep.mubr.msk.f32.mxu0 %vm6540_vm0, %v6539_v1 }
 0x64c   : > { %v1613_v11 = vmul.f32 %v5983_v10, %v5977_v60  ;;  %5512 = vmatprep.subr.bf16.mxu0 %v6539_v1 }
 0x64e   : > { %5502 = vmatmul.mubr.msk.f32.vlgmr.msra.gmra.mxu0 %vm1029_vm2, %v1613_v11 }
 0x64f   : > { %5516 = vmatprep.mubr.msk.bf16.mxu0 %vm6540_vm0, %v6539_v1  ;;  %5513 = vmatpush3.bf16.msra.mxu0 %v5944_v35 }
 0x650   : > { %5514 = vmatprep.subr.bf16.mxu0 %v6539_v1 }
 0x653   : > { %5515 = vmatpush3.bf16.msra.mxu0 %v5945_v36 }
 0x654   : > { %5528 = vmatprep.subr.mxu0 %v6539_v1 }
 0x706   : > { %v1354_v14 = vpop.f32.mrf.mxu0 }
 0x707   : > { %1691 = vrot.lane.b32.xlu1 %v1354_v14, %s7597_s20  ;;  %s7676_s20 = sld [smem:[#allocation36_spill]] }
 0x708   : > { %v5483_v15 = vpop.f32.mrf.mxu0 }
 0x70a   : > { %v1520_v16 = vpop.f32.mrf.mxu0 }
 0x70b   : > { %1695 = vrot.lane.b32.xlu0 %v1520_v16, %s7595_s5  ;;  %s945_s5 = scalar_select %p944_p9, %s6706_s0, 1 }
 0x70c   : > { %v5493_v17 = vpop.f32.mrf.mxu0 }
 0x70e   : > { %v1686_v18 = vpop.f32.mrf.mxu0 }
 0x70f   : > { %1699 = vrot.lane.b32.xlu1 %v1686_v18, %s7593_s30  ;;  %s5207_s30 = sshll.u32 %s945_s5, 3  ;;  %s7681_s5 = smov 24  }
 0x710   : > { %v5503_v19 = vpop.f32.mrf.mxu0  ;;  %s947_s3 = scalar_lea.vmem %s7676_s20, %s5207_s30  ;;  %s7680_s20 = smov 16  }
 0x711   : > { %v949_v45 = vld [vmem:[%s947_s3] sm:$0xff]  ;;  %s7679_s3 = smov 8   ;;  %s7689_s30 = smov 48  }
 0x712   : > { %v1812_v47 = vpack.c.bf16 %v949_v45, %v949_v45 }
 0x779   : > { %v1692_v20 = vpop.permute.xlu1 %1691 }
 0x77a   : > { %v1702_v22 = vsel %vm1029_vm2, %v7020_v32, %v1692_v20 }
 0x77d   : > { %v1696_v21 = vpop.permute.xlu0 %1695 }
 0x77e   : > { %v1704_v23 = vsel %vm1703_vm3, %v1702_v22, %v1696_v21 }
 0x781   : > { %v1700_v24 = vpop.permute.xlu1 %1699 }
 0x782   : > { %v1706_v25 = vsel %vm1705_vm4, %v1704_v23, %v1700_v24 }
 0x783   : > { %v1707_v26 = vpack.c.bf16 %v1706_v25, %v1706_v25 }
 0x785   : > { %5509 = vmatmul.mubr.msk.bf16.vlgmr.msra.gmra.mxu1 %vm982_vm1, %v1707_v26 }
 0x786   : > { %5524 = vmatprep.mubr.msk.bf16.mxu1 %vm6540_vm0, %v6539_v1 }
 0x845   : > { %v1763_v28 = vpop.f32.mrf.mxu1 }
 0x846   : > { %v1764_v29 = vadd.f32 %v5224_v27, %v1763_v28 }
 0x847   : > { %v5510_v30 = vpop.f32.mrf.mxu1 }
 0x848   : > { %v1769_v31 = vadd.f32 %v1764_v29, %v6963_v4 }
 0x849   : > { %v1766_v33 = vpop.f32.mrf.mxu1 }
 0x84a   : > { %v1770_v32 = vsel %vm982_vm1, %v1769_v31, 0.0 }
 0x84b   : > { %1771 = vadd.xlane.f32.xlu0 %v1770_v32  ;;  %v5511_v34 = vpop.f32.mrf.mxu1 }
 0x861   : > { %1876 = vrot.lane.b32.xlu0 %v5944_v35, %s7607_s22 }
 0x865   : > { %1880 = vrot.lane.b32.xlu0 %v5228_v42, %s7607_s22 }
 0x8d4   : > { %v1772_v4 = vpop.xlane.xlu0 %1771 }
 0x8d5   : > { %v1774_v37 = vmul.f32 0.03125, %v1772_v4 }
 0x8d7   : > { %v1775_v38 = vsub.f32 %v1769_v31, %v1774_v37 }
 0x8d8   : > { %v1877_v41 = vpop.permute.xlu0 %1876 }
 0x8d9   : > { %v1776_v39 = vmul.f32 %v1775_v38, %v1775_v38  ;;  %5521 = vmatpush3.bf16.msra.mxu1 %v1877_v41  ;;  %v1785_v60 = vmul.f32 %v1784_v58, %v1775_v38 }
 0x8da   : > { %5522 = vmatprep.subr.bf16.mxu1 %v6539_v1 }
 0x8db   : > { %v1777_v40 = vsel %vm982_vm1, %v1776_v39, 0.0 }
 0x8dc   : > { %1778 = vadd.xlane.f32.xlu1 %v1777_v40  ;;  %v1881_v3 = vpop.permute.xlu0 %1880 }
 0x8ed   : > { %1874 = vrot.lane.b32.xlu1 %v5945_v36, %s7607_s22 }
 0x965   : > { %v1779_v43 = vpop.xlane.xlu1 %1778 }
 0x966   : > { %v1780_v44 = vmul.f32 0.032258064, %v1779_v43 }
 0x968   : > { %5984 = vrsqrt.f32 %v1780_v44  ;;  %vm1788_vm5 = vcmp.eq.f32.partialorder %v1780_v44, inf  ;;  %v1791_v50 = vand.u32 2147483648, %v1780_v44  ;;  %vm1790_vm6 = vcmp.eq.f32.partialorder %v1780_v44, 0.0 }
 0x969   : > { %v1875_v46 = vpop.permute.xlu1 %1874 }
 0x96a   : > { %5523 = vmatpush3.bf16.msra.mxu1 %v1875_v46 }
 0x96b   : > { %5538 = vmatprep.subr.mxu1 %v6539_v1 }
 0x96d   : > { %5525 = vmatmul.mubr.msk.bf16.vlgmr.msra.gmra.mxu1 %vm982_vm1, %v1812_v47 }
 0x96e   : > { %5540 = vmatprep.mubr.msk.f32.mxu1 %vm6540_vm0, %v6539_v1 }
 0x975   : > { %v5985_v48 = vpop.eup %5984 }
 0x976   : > { %v1787_v49 = vmul.f32 %v5985_v48, %v1780_v44 }
 0x978   : > { %v1789_v52 = vsel %vm1788_vm5, %v1780_v44, %v1787_v49 }
 0x979   : > { %v1792_v53 = vsel %vm1790_vm6, %v1791_v50, %v1789_v52 }
 0x97a   : > { %v1793_v54 = vadd.f32 1e-06, %v1792_v53 }
 0x97c   : > { %5986 = vrcp.f32 %v1793_v54 }
 0x989   : > { %v5987_v62 = vpop.eup %5986 }
 0x98a   : > { %v1795_v63 = vmul.f32 %v5987_v62, %v1785_v60 }
 0x98c   : > { %v7107_v0 = vadd.f32 %v1799_v61, %v1795_v63 }
 0x98e   : > { %v1811_v2 = vpack.c.bf16 %v7107_v0, %v7107_v0 }
 0x990   : > { %5517 = vmatmul.mubr.msk.bf16.vlgmr.msra.gmra.mxu0 %vm982_vm1, %v1811_v2 }
 0x991   : > { %5530 = vmatprep.mubr.msk.f32.mxu0 %vm6540_vm0, %v6539_v1 }
 0xa2d   : > { %v1920_v6 = vpop.f32.mrf.mxu1 }
 0xa2e   : > { %v7114_v7 = vadd.f32 %v1920_v6, %v1881_v3 }
 0xa2f   : > { %v5526_v9 = vpop.f32.mrf.mxu1 }
 0xa30   : > { %2092 = vrot.lane.b32.xlu1 %v7114_v7, %s7605_s29  ;;  %5529 = vmatpush3.xpose.msk.msra.mxu0 %vm1029_vm2, %v7114_v7 }
 0xa31   : > { %v1923_v8 = vpop.f32.mrf.mxu1  ;;  %5533 = vmatprep.subr.mxu0 %v6539_v1 }
 0xa33   : > { %v5527_v10 = vpop.f32.mrf.mxu1 }
 0xa34   : > { %2258 = vrot.lane.b32.xlu1 %v7114_v7, %s7603_s8 }
 0xa38   : > { %2424 = vrot.lane.b32.xlu1 %v7114_v7, %s7601_s16 }
 0xa50   : > { %v1868_v11 = vpop.f32.mrf.mxu0 }
 0xa51   : > { %v1869_v12 = vadd.f32 %v5228_v42, %v1868_v11 }
 0xa52   : > { %v5518_v13 = vpop.f32.mrf.mxu0 }
 0xa53   : > { %2090 = vrot.lane.b32.xlu0 %v1869_v12, %s7605_s29  ;;  %5531 = vmatmul.mubr.msk.f32.vlgmr.msra.gmra.mxu0 %vm1029_vm2, %v1869_v12  ;;  %s7686_s29 = smov 104  }
 0xa54   : > { %v1871_v14 = vpop.f32.mrf.mxu0  ;;  %5535 = vmatprep.mubr.msk.f32.mxu0 %vm6540_vm0, %v6539_v1 }
 0xa56   : > { %v5519_v15 = vpop.f32.mrf.mxu0 }
 0xa57   : > { %2256 = vrot.lane.b32.xlu0 %v1869_v12, %s7603_s8  ;;  %s7687_s8 = smov 56  }
 0xa5b   : > { %2422 = vrot.lane.b32.xlu0 %v1869_v12, %s7601_s16  ;;  %s7688_s16 = smov 64  }
 0xaa2   : > { %v2093_v16 = vpop.permute.xlu1 %2092 }
 0xaa3   : > { %5539 = vmatpush3.xpose.msk.msra.mxu1 %vm1029_vm2, %v2093_v16 }
 0xaa4   : > { %5548 = vmatprep.subr.mxu1 %v6539_v1 }
 0xaa6   : > { %v2259_v17 = vpop.permute.xlu1 %2258 }
 0xaaa   : > { %v2425_v20 = vpop.permute.xlu1 %2424 }
 0xac5   : > { %v2091_v18 = vpop.permute.xlu0 %2090 }
 0xac6   : > { %5541 = vmatmul.mubr.msk.f32.vlgmr.msra.gmra.mxu1 %vm1029_vm2, %v2091_v18 }
 0xac7   : > { %5549 = vmatpush3.xpose.msk.msra.mxu1 %vm1029_vm2, %v2259_v17  ;;  %5550 = vmatprep.mubr.msk.f32.mxu1 %vm6540_vm0, %v6539_v1 }
 0xac8   : > { %5558 = vmatprep.subr.mxu1 %v6539_v1 }
 0xac9   : > { %v2257_v19 = vpop.permute.xlu0 %2256 }
 0xaca   : > { %5551 = vmatmul.mubr.msk.f32.vlgmr.msra.gmra.mxu1 %vm1029_vm2, %v2257_v19  ;;  %v5946_v19 = vld [vmem:[#allocation11 + $0x8] sm:$0xff]  }
 0xacb   : > { %5559 = vmatpush3.xpose.msk.msra.mxu1 %vm1029_vm2, %v2425_v20  ;;  %5560 = vmatprep.mubr.msk.f32.mxu1 %vm6540_vm0, %v6539_v1  ;;  %v5947_v20 = vld [vmem:[#allocation11] sm:$0xff]  }
 0xacc   : > { %5568 = vmatprep.subr.bf16.mxu1 %v6539_v1 }
 0xacd   : > { %v2423_v21 = vpop.permute.xlu0 %2422 }
 0xace   : > { %5561 = vmatmul.mubr.msk.f32.vlgmr.msra.gmra.mxu1 %vm1029_vm2, %v2423_v21 }
 0xacf   : > { %5572 = vmatprep.mubr.msk.bf16.mxu1 %vm6540_vm0, %v6539_v1  ;;  %5569 = vmatpush3.bf16.msra.mxu1 %v5946_v19 }
 0xad0   : > { %5570 = vmatprep.subr.bf16.mxu1 %v6539_v1 }
 0xad3   : > { %5571 = vmatpush3.bf16.msra.mxu1 %v5947_v20  ;;  %v5269_v20 = vld [vmem:[#allocation6 + $0x1] ss:$0 sm:$0xff] }
 0xad4   : > { %5584 = vmatprep.subr.bf16.mxu1 %v6539_v1 }
 0xb13   : > { %v1998_v22 = vpop.f32.mrf.mxu0 }
 0xb14   : > { %v2002_v23 = vmul.f32 0.35355338, %v1998_v22 }
 0xb15   : > { %v5532_v24 = vpop.f32.mrf.mxu0 }
 0xb16   : > { %v2003_v25 = vsel %vm1029_vm2, %v2002_v23, -inf }
 0xb17   : > { %2004 = vmax.xlane.f32.xlu1 %v2003_v25 }
 0xb86   : > { %v2164_v26 = vpop.f32.mrf.mxu1 }
 0xb87   : > { %v2168_v27 = vmul.f32 0.35355338, %v2164_v26 }
 0xb88   : > { %v5542_v28 = vpop.f32.mrf.mxu1 }
 0xb89   : > { %v2169_v29 = vsel %vm1029_vm2, %v2168_v27, -inf }
 0xb8a   : > { %2170 = vmax.xlane.f32.xlu0 %v2169_v29  ;;  %v2330_v30 = vpop.f32.mrf.mxu1 }
 0xb8b   : > { %v2334_v31 = vmul.f32 0.35355338, %v2330_v30 }
 0xb8c   : > { %v5552_v33 = vpop.f32.mrf.mxu1 }
 0xb8d   : > { %v2335_v32 = vsel %vm1029_vm2, %v2334_v31, -inf }
 0xb8e   : > { %2336 = vmax.xlane.f32.xlu0 %v2335_v32  ;;  %v2496_v34 = vpop.f32.mrf.mxu1 }
 0xb8f   : > { %v2500_v35 = vmul.f32 0.35355338, %v2496_v34  ;;  %v5245_v34 = vld [vmem:[#allocation12] ss:$0 sm:$0xff] }
 0xb90   : > { %v5562_v36 = vpop.f32.mrf.mxu1 }
 0xb91   : > { %v2501_v4 = vsel %vm1029_vm2, %v2500_v35, -inf }
 0xb92   : > { %2502 = vmax.xlane.f32.xlu1 %v2501_v4 }
 0xba0   : > { %v2005_v37 = vpop.xlane.xlu1 %2004 }
 0xba1   : > { %v2006_v38 = vsub.f32 %v2002_v23, %v2005_v37 }
 0xba3   : > { %v2007_v39 = vmul.f32 1.442695, %v2006_v38  ;;  %2180 = vrot.lane.b32.xlu1 %v7114_v7, %s7609_s24  ;;  %s7685_s24 = smov 112  }
 0xba5   : > { %5988 = vpow2.f32 %v2007_v39 }
 0xbb2   : > { %v5989_v40 = vpop.eup %5988 }
 0xbb3   : > { %v2009_v41 = vsel %vm1029_vm2, %v5989_v40, 0.0 }
 0xbb4   : > { %2010 = vadd.xlane.f32.xlu0 %v2009_v41 }
 0xbca   : > { %2014 = vrot.lane.b32.xlu0 %v7114_v7, %s7607_s22  ;;  %s7684_s22 = smov 120  }
 0xc13   : > { %v2171_v42 = vpop.xlane.xlu0 %2170 }
 0xc14   : > { %v2172_v43 = vsub.f32 %v2168_v27, %v2171_v42 }
 0xc16   : > { %v2173_v44 = vmul.f32 1.442695, %v2172_v43 }
 0xc17   : > { %v2337_v45 = vpop.xlane.xlu0 %2336 }
 0xc18   : > { %5990 = vpow2.f32 %v2173_v44  ;;  %v2338_v46 = vsub.f32 %v2334_v31, %v2337_v45 }
 0xc1a   : > { %v2339_v47 = vmul.f32 1.442695, %v2338_v46  ;;  %v5948_v46 = vld [vmem:[%s7559_s10 + $0x8] sm:$0xff]  }
 0xc1b   : > { %v2503_v48 = vpop.xlane.xlu1 %2502 }
 0xc1c   : > { %5992 = vpow2.f32 %v2339_v47  ;;  %v2504_v49 = vsub.f32 %v2500_v35, %v2503_v48  ;;  %v5952_v47 = vld [vmem:[%s7561_s12 + $0x18] sm:$0xff]   ;;  %v5953_v48 = vld [vmem:[%s7561_s12 + $0x10] sm:$0xff]  }
 0xc1e   : > { %v2505_v50 = vmul.f32 1.442695, %v2504_v49 }
 0xc1f   : > { %v2181_v3 = vpop.permute.xlu1 %2180 }
 0xc20   : > { %5994 = vpow2.f32 %v2505_v50 }
 0xc25   : > { %v5991_v51 = vpop.eup %5990 }
 0xc26   : > { %v2175_v52 = vsel %vm1029_vm2, %v5991_v51, 0.0 }
 0xc27   : > { %2176 = vadd.xlane.f32.xlu1 %v2175_v52 }
 0xc29   : > { %v5993_v53 = vpop.eup %5992 }
 0xc2a   : > { %v2341_v54 = vsel %vm1029_vm2, %v5993_v53, 0.0 }
 0xc2b   : > { %2342 = vadd.xlane.f32.xlu0 %v2341_v54 }
 0xc2d   : > { %v5995_v58 = vpop.eup %5994 }
 0xc2e   : > { %v2507_v60 = vsel %vm1029_vm2, %v5995_v58, 0.0 }
 0xc2f   : > { %2508 = vadd.xlane.f32.xlu1 %v2507_v60 }
 0xc3d   : > { %v2011_v61 = vpop.xlane.xlu0 %2010 }
 0xc3e   : > { %5996 = vrcp.f32 %v2011_v61  ;;  %v7209_v61 = vsub.s32 1, %v7088_v55 }
 0xc40   : > { %2346 = vrot.lane.b32.xlu1 %v7114_v7, %s7677_s1 }
 0xc41   : > { %2512 = vrot.lane.b32.xlu0 %v7114_v7, %s7678_s7  ;;  %v2015_v62 = vpop.permute.xlu0 %2014 }
 0xc42   : > { %5534 = vmatpush3.msra.mxu0 %v2015_v62  ;;  %v2679_v62 = vrot.slane %v7096_v57, %v7209_v61 }
 0xc43   : > { %5543 = vmatprep.subr.mxu0 %v6539_v1 }
 0xc4b   : > { %v5997_v63 = vpop.eup %5996 }
 0xc4c   : > { %v2013_v2 = vmul.f32 %v5997_v63, %v5989_v40 }
 0xc4e   : > { %5536 = vmatmul.mubr.msk.f32.vlgmr.msra.gmra.mxu0 %vm1029_vm2, %v2013_v2  ;;  %v2694_v2 = vrot.slane %v7103_v59, %v7209_v61 }
 0xc4f   : > { %5544 = vmatpush3.msra.mxu0 %v2181_v3  ;;  %5545 = vmatprep.mubr.msk.f32.mxu0 %vm6540_vm0, %v6539_v1 }
 0xc50   : > { %5553 = vmatprep.subr.mxu0 %v6539_v1 }
 0xcb0   : > { %v2177_v6 = vpop.xlane.xlu1 %2176 }
 0xcb1   : > { %5998 = vrcp.f32 %v2177_v6 }
 0xcb4   : > { %v2343_v9 = vpop.xlane.xlu0 %2342 }
 0xcb5   : > { %6000 = vrcp.f32 %v2343_v9 }
 0xcb8   : > { %v2509_v7 = vpop.xlane.xlu1 %2508  ;;  %v2513_v14 = vpop.permute.xlu0 %2512 }
 0xcb9   : > { %6002 = vrcp.f32 %v2509_v7  ;;  %v5950_v7 = vld [vmem:[%s7673_s4 + $0x18] sm:$0xff]  }
 0xcbc   : > { %v2347_v11 = vpop.permute.xlu1 %2346 }
 0xcbe   : > { %v5999_v8 = vpop.eup %5998 }
 0xcbf   : > { %v2179_v10 = vmul.f32 %v5999_v8, %v5991_v51 }
 0xcc1   : > { %5546 = vmatmul.mubr.msk.f32.vlgmr.msra.gmra.mxu0 %vm1029_vm2, %v2179_v10  ;;  %v5951_v10 = vld [vmem:[%s7673_s4 + $0x10] sm:$0xff]  }
 0xcc2   : > { %v6001_v12 = vpop.eup %6000  ;;  %5554 = vmatpush3.msra.mxu0 %v2347_v11  ;;  %5555 = vmatprep.mubr.msk.f32.mxu0 %vm6540_vm0, %v6539_v1  ;;  %v5954_v11 = vld [vmem:[%s7561_s12 + $0x8] sm:$0xff]  }
 0xcc3   : > { %5563 = vmatprep.subr.mxu0 %v6539_v1  ;;  %v2345_v13 = vmul.f32 %v6001_v12, %v5993_v53  ;;  %v5955_v12 = vld [vmem:[%s7561_s12] sm:$0xff]  }
 0xcc5   : > { %5556 = vmatmul.mubr.msk.f32.vlgmr.msra.gmra.mxu0 %vm1029_vm2, %v2345_v13  ;;  %v5249_v13 = vld [vmem:[#allocation14] ss:$0 sm:$0xff] }
 0xcc6   : > { %v6003_v15 = vpop.eup %6002  ;;  %5564 = vmatpush3.msra.mxu0 %v2513_v14  ;;  %5565 = vmatprep.mubr.msk.f32.mxu0 %vm6540_vm0, %v6539_v1 }
 0xcc7   : > { %v2511_v16 = vmul.f32 %v6003_v15, %v5995_v58  ;;  %5576 = vmatprep.subr.bf16.mxu0 %v6539_v1 }
 0xcc9   : > { %5566 = vmatmul.mubr.msk.f32.vlgmr.msra.gmra.mxu0 %vm1029_vm2, %v2511_v16 }
 0xcca   : > { %5580 = vmatprep.mubr.msk.bf16.mxu0 %vm6540_vm0, %v6539_v1  ;;  %5577 = vmatpush3.bf16.msra.mxu0 %v5948_v46 }
 0xccb   : > { %5578 = vmatprep.subr.bf16.mxu0 %v6539_v1 }
 0xd0e   : > { %v2086_v17 = vpop.f32.mrf.mxu0 }
 0xd10   : > { %v5537_v18 = vpop.f32.mrf.mxu0 }
 0xd81   : > { %v2252_v21 = vpop.f32.mrf.mxu0 }
 0xd82   : > { %2589 = vrot.lane.b32.xlu1 %v2252_v21, %s7679_s3 }
 0xd83   : > { %v5547_v22 = vpop.f32.mrf.mxu0 }
 0xd85   : > { %v2418_v23 = vpop.f32.mrf.mxu0 }
 0xd86   : > { %2593 = vrot.lane.b32.xlu0 %v2418_v23, %s7680_s20 }
 0xd87   : > { %v5557_v24 = vpop.f32.mrf.mxu0 }
 0xd89   : > { %v2584_v25 = vpop.f32.mrf.mxu0 }
 0xd8a   : > { %2597 = vrot.lane.b32.xlu1 %v2584_v25, %s7681_s5 }
 0xd8b   : > { %v5567_v26 = vpop.f32.mrf.mxu0 }
 0xdf4   : > { %v2590_v27 = vpop.permute.xlu1 %2589 }
 0xdf5   : > { %v2600_v29 = vsel %vm1029_vm2, %v2086_v17, %v2590_v27 }
 0xdf8   : > { %v2594_v28 = vpop.permute.xlu0 %2593 }
 0xdf9   : > { %v2601_v30 = vsel %vm1703_vm3, %v2600_v29, %v2594_v28 }
 0xdfc   : > { %v2598_v31 = vpop.permute.xlu1 %2597 }
 0xdfd   : > { %v2602_v33 = vsel %vm1705_vm4, %v2601_v30, %v2598_v31 }
 0xdfe   : > { %v2603_v32 = vpack.c.bf16 %v2602_v33, %v2602_v33 }
 0xe00   : > { %5573 = vmatmul.mubr.msk.bf16.vlgmr.msra.gmra.mxu1 %vm982_vm1, %v2603_v32 }
 0xe01   : > { %5592 = vmatprep.mubr.msk.bf16.mxu1 %vm6540_vm0, %v6539_v1  ;;  %5585 = vmatpush3.bf16.msra.mxu1 %v5952_v47 }
 0xe02   : > { %5586 = vmatprep.subr.bf16.mxu1 %v6539_v1 }
 0xe05   : > { %5587 = vmatpush3.bf16.msra.mxu1 %v5953_v48 }
 0xe06   : > { %5588 = vmatprep.subr.bf16.mxu1 %v6539_v1 }
 0xe09   : > { %5589 = vmatpush3.bf16.msra.mxu1 %v5954_v11 }
 0xe0a   : > { %5590 = vmatprep.subr.bf16.mxu1 %v6539_v1 }
 0xe0d   : > { %5591 = vmatpush3.bf16.msra.mxu1 %v5955_v12 }
 0xe0e   : > { %5614 = vmatprep.subr.mxu1 %v6539_v1 }
 0xec0   : > { %v2659_v35 = vpop.f32.mrf.mxu1 }
 0xec1   : > { %v2660_v36 = vadd.f32 %v5245_v34, %v2659_v35 }
 0xec2   : > { %v5574_v4 = vpop.f32.mrf.mxu1 }
 0xec3   : > { %v2665_v37 = vadd.f32 %v2660_v36, %v7107_v0  ;;  %v5949_v0 = vld [vmem:[%s7559_s10] sm:$0xff]  }
 0xec4   : > { %v2662_v38 = vpop.f32.mrf.mxu1  ;;  %5579 = vmatpush3.bf16.msra.mxu0 %v5949_v0 }
 0xec5   : > { %v2666_v39 = vsel %vm982_vm1, %v2665_v37, 0.0  ;;  %5596 = vmatprep.subr.bf16.mxu0 %v6539_v1 }
 0xec6   : > { %2667 = vadd.xlane.f32.xlu0 %v2666_v39  ;;  %v5575_v40 = vpop.f32.mrf.mxu1 }
 0xf4f   : > { %v2668_v41 = vpop.xlane.xlu0 %2667 }
 0xf50   : > { %v2669_v42 = vmul.f32 0.03125, %v2668_v41 }
 0xf52   : > { %v2670_v43 = vsub.f32 %v2665_v37, %v2669_v42 }
 0xf54   : > { %v2671_v44 = vmul.f32 %v2670_v43, %v2670_v43  ;;  %v2680_v63 = vmul.f32 %v2679_v62, %v2670_v43 }
 0xf56   : > { %v2672_v45 = vsel %vm982_vm1, %v2671_v44, 0.0 }
 0xf57   : > { %2673 = vadd.xlane.f32.xlu1 %v2672_v45 }
 0xfe0   : > { %v2674_v49 = vpop.xlane.xlu1 %2673 }
 0xfe1   : > { %v2675_v50 = vmul.f32 0.032258064, %v2674_v49 }
 0xfe3   : > { %6004 = vrsqrt.f32 %v2675_v50  ;;  %vm2683_vm7 = vcmp.eq.f32.partialorder %v2675_v50, inf  ;;  %v2686_v53 = vand.u32 2147483648, %v2675_v50  ;;  %vm2685_vm8 = vcmp.eq.f32.partialorder %v2675_v50, 0.0 }
 0xff0   : > { %v6005_v51 = vpop.eup %6004 }
 0xff1   : > { %v2682_v52 = vmul.f32 %v6005_v51, %v2675_v50 }
 0xff3   : > { %v2684_v54 = vsel %vm2683_vm7, %v2675_v50, %v2682_v52 }
 0xff4   : > { %v2687_v58 = vsel %vm2685_vm8, %v2686_v53, %v2684_v54 }
 0xff5   : > { %v2688_v60 = vadd.f32 1e-06, %v2687_v58 }
 0xff7   : > { %6006 = vrcp.f32 %v2688_v60 }
0x1004   : > { %v6007_v3 = vpop.eup %6006 }
0x1005   : > { %v2690_v6 = vmul.f32 %v6007_v3, %v2680_v63 }
0x1007   : > { %v7215_v9 = vadd.f32 %v2694_v2, %v2690_v6 }
0x1009   : > { %v2696_v8 = vpack.c.bf16 %v7215_v9, %v7215_v9 }
0x100b   : > { %5581 = vmatmul.mubr.msk.bf16.vlgmr.msra.gmra.mxu0 %vm982_vm1, %v2696_v8 }
0x100c   : > { %5597 = vmatpush3.bf16.msra.mxu0 %v5950_v7  ;;  %5600 = vmatprep.mubr.msk.bf16.mxu0 %vm6540_vm0, %v6539_v1 }
0x100d   : > { %5598 = vmatprep.subr.bf16.mxu0 %v6539_v1 }
0x1010   : > { %5599 = vmatpush3.bf16.msra.mxu0 %v5951_v10 }
0x1011   : > { %5604 = vmatprep.subr.mxu0 %v6539_v1 }
0x1013   : > { %5601 = vmatmul.mubr.msk.bf16.vlgmr.msra.gmra.mxu0 %vm982_vm1, %v6968_v5 }
0x1014   : > { %5606 = vmatprep.mubr.msk.f32.mxu0 %vm6540_vm0, %v6539_v1 }
0x10cb   : > { %v2757_v14 = vpop.f32.mrf.mxu0 }
0x10cc   : > { %v2758_v5 = vadd.f32 %v5249_v13, %v2757_v14 }
0x10cd   : > { %v5582_v15 = vpop.f32.mrf.mxu0 }
0x10ce   : > { %v2763_v16 = vmax.f32 %v2758_v5, 0.0 }
0x10cf   : > { %v2760_v17 = vpop.f32.mrf.mxu0 }
0x10d0   : > { %v2764_v18 = vpack.c.bf16 %v2763_v16, %v2763_v16 }
0x10d1   : > { %v5583_v19 = vpop.f32.mrf.mxu0 }
0x10d2   : > { %5593 = vmatmul.mubr.msk.bf16.vlgmr.msra.gmra.mxu1 %vm2804_vm9, %v2764_v18 }
0x10d3   : > { %v2949_v21 = vpop.f32.mrf.mxu0  ;;  %5616 = vmatprep.mubr.msk.f32.mxu1 %vm6540_vm0, %v6539_v1 }
0x10d4   : > { %v7245_v22 = vadd.f32 %v5269_v20, %v2949_v21 }
0x10d5   : > { %v5602_v23 = vpop.f32.mrf.mxu0 }
0x10d6   : > { %3122 = vrot.lane.b32.xlu1 %v7245_v22, %s7682_s23  ;;  %2956 = vrot.lane.b32.xlu0 %v7245_v22, %s7683_s19 }
0x10d7   : > { %v2952_v24 = vpop.f32.mrf.mxu0 }
0x10d9   : > { %v5603_v25 = vpop.f32.mrf.mxu0 }
0x10da   : > { %3288 = vrot.lane.b32.xlu1 %v7245_v22, %s7677_s1  ;;  %3120 = vrot.lane.b32.xlu0 %v7245_v22, %s7684_s22 }
0x10de   : > { %3454 = vrot.lane.b32.xlu1 %v7245_v22, %s7678_s7  ;;  %3286 = vrot.lane.b32.xlu0 %v7245_v22, %s7685_s24 }
0x10e2   : > { %3452 = vrot.lane.b32.xlu0 %v7245_v22, %s7686_s29 }
0x1148   : > { %v3123_v26 = vpop.permute.xlu1 %3122  ;;  %v2957_v27 = vpop.permute.xlu0 %2956 }
0x1149   : > { %5605 = vmatpush3.xpose.msk.msra.mxu0 %vm1029_vm2, %v2957_v27  ;;  %5615 = vmatpush3.xpose.msk.msra.mxu1 %vm1029_vm2, %v3123_v26 }
0x114a   : > { %5624 = vmatprep.subr.mxu1 %v6539_v1  ;;  %5609 = vmatprep.subr.mxu0 %v6539_v1 }
0x114c   : > { %v3289_v28 = vpop.permute.xlu1 %3288  ;;  %5607 = vmatmul.mubr.msk.f32.vlgmr.msra.gmra.mxu0 %vm1029_vm2, %v7245_v22  ;;  %v3121_v29 = vpop.permute.xlu0 %3120 }
0x114d   : > { %5617 = vmatmul.mubr.msk.f32.vlgmr.msra.gmra.mxu1 %vm1029_vm2, %v3121_v29  ;;  %5611 = vmatprep.mubr.msk.f32.mxu0 %vm6540_vm0, %v6539_v1 }
0x114e   : > { %5625 = vmatpush3.xpose.msk.msra.mxu1 %vm1029_vm2, %v3289_v28  ;;  %5626 = vmatprep.mubr.msk.f32.mxu1 %vm6540_vm0, %v6539_v1 }
0x114f   : > { %5634 = vmatprep.subr.mxu1 %v6539_v1 }
0x1150   : > { %v3455_v30 = vpop.permute.xlu1 %3454  ;;  %v3287_v31 = vpop.permute.xlu0 %3286 }
0x1151   : > { %5627 = vmatmul.mubr.msk.f32.vlgmr.msra.gmra.mxu1 %vm1029_vm2, %v3287_v31 }
0x1152   : > { %5635 = vmatpush3.xpose.msk.msra.mxu1 %vm1029_vm2, %v3455_v30  ;;  %5636 = vmatprep.mubr.msk.f32.mxu1 %vm6540_vm0, %v6539_v1 }
0x1153   : > { %5644 = vmatprep.subr.bf16.mxu1 %v6539_v1 }
0x1154   : > { %v3453_v33 = vpop.permute.xlu0 %3452 }
0x1155   : > { %5637 = vmatmul.mubr.msk.f32.vlgmr.msra.gmra.mxu1 %vm1029_vm2, %v3453_v33 }
0x1156   : > { %5648 = vmatprep.mubr.msk.bf16.mxu1 %vm6540_vm0, %v6539_v1 }
0x1192   : > { %v7282_v32 = vpop.f32.mrf.mxu1 }
0x1194   : > { %v5594_v34 = vpop.f32.mrf.mxu1 }
0x1196   : > { %v2845_v35 = vpop.f32.mrf.mxu1 }
0x1198   : > { %v5595_v36 = vpop.f32.mrf.mxu1 }
0x120c   : > { %v3028_v4 = vpop.f32.mrf.mxu0 }
0x120d   : > { %v3032_v37 = vmul.f32 0.35355338, %v3028_v4  ;;  %v3194_v38 = vpop.f32.mrf.mxu1  ;;  %v5956_v4 = vld [vmem:[%s7674_s21 + $0x18] sm:$0xff]  }
0x120e   : > { %v3198_v39 = vmul.f32 0.35355338, %v3194_v38  ;;  %v5608_v40 = vpop.f32.mrf.mxu0  ;;  %5645 = vmatpush3.bf16.msra.mxu1 %v5956_v4 }
0x120f   : > { %v5618_v41 = vpop.f32.mrf.mxu1  ;;  %v3033_v42 = vsel %vm1029_vm2, %v3032_v37, -inf  ;;  %5646 = vmatprep.subr.bf16.mxu1 %v6539_v1 }
0x1210   : > { %3034 = vmax.xlane.f32.xlu1 %v3033_v42  ;;  %v3199_v43 = vsel %vm1029_vm2, %v3198_v39, -inf  ;;  %v5253_v42 = vld [vmem:[#allocation15] ss:$0 sm:$0xff] }
0x1211   : > { %3200 = vmax.xlane.f32.xlu0 %v3199_v43  ;;  %v3360_v44 = vpop.f32.mrf.mxu1  ;;  %v2843_v43 = vadd.f32 %v5253_v42, %v7282_v32  ;;  %v7373_v42 = vld [vmem:[%s7564_s15 + $0x4] sm:$0x7] }
0x1212   : > { %v3364_v45 = vmul.f32 0.35355338, %v3360_v44 }
0x1213   : > { %v5628_v46 = vpop.f32.mrf.mxu1  ;;  %v2848_v44 = vadd.f32 %v2843_v43, %v7215_v9 }
0x1214   : > { %v3365_v0 = vsel %vm1029_vm2, %v3364_v45, -inf }
0x1215   : > { %3366 = vmax.xlane.f32.xlu0 %v3365_v0  ;;  %v3526_v47 = vpop.f32.mrf.mxu1 }
0x1216   : > { %v3530_v48 = vmul.f32 0.35355338, %v3526_v47 }
0x1217   : > { %v5638_v49 = vpop.f32.mrf.mxu1 }
0x1218   : > { %v3531_v50 = vsel %vm1029_vm2, %v3530_v48, -inf }
0x1219   : > { %3532 = vmax.xlane.f32.xlu1 %v3531_v50 }
0x122a   : > { %3210 = vrot.lane.b32.xlu1 %v7245_v22, %s7687_s8  ;;  %s7690_s8 = smov 40  }
0x1299   : > { %v3035_v51 = vpop.xlane.xlu1 %3034 }
0x129a   : > { %v3036_v52 = vsub.f32 %v3032_v37, %v3035_v51  ;;  %v3201_v53 = vpop.xlane.xlu0 %3200  ;;  %v5957_v37 = vld [vmem:[%s7674_s21 + $0x10] sm:$0xff]  }
0x129b   : > { %v3202_v54 = vsub.f32 %v3198_v39, %v3201_v53  ;;  %5647 = vmatpush3.bf16.msra.mxu1 %v5957_v37 }
0x129c   : > { %v3037_v58 = vmul.f32 1.442695, %v3036_v52  ;;  %5660 = vmatprep.subr.bf16.mxu1 %v6539_v1 }
0x129d   : > { %v3203_v60 = vmul.f32 1.442695, %v3202_v54 }
0x129e   : > { %6008 = vpow2.f32 %v3037_v58  ;;  %v3367_v12 = vpop.xlane.xlu0 %3366  ;;  %v5285_v58 = vld [vmem:[#allocation8 + $0x1] ss:$0 sm:$0xff] }
0x129f   : > { %6010 = vpow2.f32 %v3203_v60  ;;  %v3368_v13 = vsub.f32 %v3364_v45, %v3367_v12  ;;  %v2849_v45 = vsel %vm982_vm1, %v2848_v44, 0.0 }
0x12a1   : > { %v3369_v14 = vmul.f32 1.442695, %v3368_v13 }
0x12a2   : > { %v3533_v62 = vpop.xlane.xlu1 %3532 }
0x12a3   : > { %v3534_v63 = vsub.f32 %v3530_v48, %v3533_v62 }
0x12a5   : > { %v3535_v2 = vmul.f32 1.442695, %v3534_v63 }
0x12a6   : > { %v3211_v16 = vpop.permute.xlu1 %3210 }
0x12a7   : > { %6012 = vpow2.f32 %v3535_v2  ;;  %v6060_v2 = vld [vmem:[%s6916_s18] sm:$0xff] }
0x12a8   : > { %6014 = vpow2.f32 %v3369_v14 }
0x12ab   : > { %v6009_v3 = vpop.eup %6008 }
0x12ac   : > { %v6011_v6 = vpop.eup %6010  ;;  %v3039_v7 = vsel %vm1029_vm2, %v6009_v3, 0.0 }
0x12ad   : > { %3040 = vadd.xlane.f32.xlu0 %v3039_v7  ;;  %v3205_v8 = vsel %vm1029_vm2, %v6011_v6, 0.0 }
0x12ae   : > { %3206 = vadd.xlane.f32.xlu1 %v3205_v8 }
0x12b4   : > { %v6013_v10 = vpop.eup %6012 }
0x12b5   : > { %v3537_v11 = vsel %vm1029_vm2, %v6013_v10, 0.0  ;;  %v6015_v5 = vpop.eup %6014 }
0x12b6   : > { %3538 = vadd.xlane.f32.xlu1 %v3537_v11  ;;  %v3371_v15 = vsel %vm1029_vm2, %v6015_v5, 0.0  ;;  %v5959_v11 = vld [vmem:[%s7675_s26 + $0x10] sm:$0xff]  }
0x12c3   : > { %3044 = vrot.lane.b32.xlu0 %v7245_v22, %s7688_s16 }
0x12c7   : > { %3376 = vrot.lane.b32.xlu1 %v7245_v22, %s7689_s30  ;;  %s7691_s30 = sld [smem:[#allocation53_spill]] }
0x12e2   : > { %3372 = vadd.xlane.f32.xlu0 %v3371_v15 }
0x12f8   : > { %3542 = vrot.lane.b32.xlu0 %v7245_v22, %s7690_s8 }
0x1336   : > { %v3041_v17 = vpop.xlane.xlu0 %3040 }
0x1337   : > { %6016 = vrcp.f32 %v3041_v17  ;;  %v3207_v18 = vpop.xlane.xlu1 %3206  ;;  %v5293_v17 = vld [vmem:[#allocation9 + $0x1] ss:$0 sm:$0xff] }
0x1338   : > { %6018 = vrcp.f32 %v3207_v18 }
0x133a   : > { %v3045_v19 = vpop.permute.xlu0 %3044 }
0x133b   : > { %5610 = vmatpush3.msra.mxu0 %v3045_v19 }
0x133c   : > { %5619 = vmatprep.subr.mxu0 %v6539_v1 }
0x133f   : > { %v3539_v21 = vpop.xlane.xlu1 %3538 }
0x1343   : > { %v3377_v25 = vpop.permute.xlu1 %3376 }
0x1344   : > { %v6017_v20 = vpop.eup %6016 }
0x1345   : > { %v3043_v23 = vmul.f32 %v6017_v20, %v6009_v3  ;;  %v6019_v24 = vpop.eup %6018 }
0x1346   : > { %v3209_v22 = vmul.f32 %v6019_v24, %v6011_v6 }
0x1347   : > { %5612 = vmatmul.mubr.msk.f32.vlgmr.msra.gmra.mxu0 %vm1029_vm2, %v3043_v23 }
0x1348   : > { %5620 = vmatpush3.msra.mxu0 %v3211_v16  ;;  %5621 = vmatprep.mubr.msk.f32.mxu0 %vm6540_vm0, %v6539_v1 }
0x1349   : > { %5629 = vmatprep.subr.mxu0 %v6539_v1 }
0x134b   : > { %5622 = vmatmul.mubr.msk.f32.vlgmr.msra.gmra.mxu0 %vm1029_vm2, %v3209_v22 }
0x134c   : > { %5630 = vmatpush3.msra.mxu0 %v3377_v25  ;;  %5631 = vmatprep.mubr.msk.f32.mxu0 %vm6540_vm0, %v6539_v1 }
0x134d   : > { %5639 = vmatprep.subr.mxu0 %v6539_v1 }
0x136b   : > { %v3373_v26 = vpop.xlane.xlu0 %3372 }
0x136c   : > { %6020 = vrcp.f32 %v3373_v26  ;;  %v7353_v26 = vsub.s32 2, %v7088_v55 }
0x136d   : > { %6022 = vrcp.f32 %v3539_v21 }
0x136f   : > { %v3543_v30 = vpop.permute.xlu0 %3542 }
0x1379   : > { %v6021_v27 = vpop.eup %6020 }
0x137a   : > { %v3375_v28 = vmul.f32 %v6021_v27, %v6015_v5  ;;  %v6023_v29 = vpop.eup %6022  ;;  %v2862_v27 = vrot.slane %v7096_v57, %v7353_v26 }
0x137b   : > { %v3541_v31 = vmul.f32 %v6023_v29, %v6013_v10  ;;  %v5958_v10 = vld [vmem:[%s7675_s26 + $0x18] sm:$0xff]  }
0x137c   : > { %5632 = vmatmul.mubr.msk.f32.vlgmr.msra.gmra.mxu0 %vm1029_vm2, %v3375_v28 }
0x137d   : > { %5640 = vmatpush3.msra.mxu0 %v3543_v30  ;;  %5641 = vmatprep.mubr.msk.f32.mxu0 %vm6540_vm0, %v6539_v1 }
0x137e   : > { %5652 = vmatprep.subr.bf16.mxu0 %v6539_v1 }
0x1380   : > { %5642 = vmatmul.mubr.msk.f32.vlgmr.msra.gmra.mxu0 %vm1029_vm2, %v3541_v31  ;;  %v2877_v31 = vrot.slane %v7103_v59, %v7353_v26 }
0x1381   : > { %5656 = vmatprep.mubr.msk.bf16.mxu0 %vm6540_vm0, %v6539_v1  ;;  %5653 = vmatpush3.bf16.msra.mxu0 %v5958_v10 }
0x1382   : > { %5654 = vmatprep.subr.bf16.mxu0 %v6539_v1 }
0x1385   : > { %5655 = vmatpush3.bf16.msra.mxu0 %v5959_v11 }
0x1386   : > { %5668 = vmatprep.subr.mxu0 %v6539_v1 }
0x1407   : > { %v3116_v33 = vpop.f32.mrf.mxu0 }
0x1409   : > { %v5613_v34 = vpop.f32.mrf.mxu0 }
0x140b   : > { %v3282_v35 = vpop.f32.mrf.mxu0 }
0x140c   : > { %3619 = vrot.lane.b32.xlu1 %v3282_v35, %s7679_s3 }
0x140d   : > { %v5623_v36 = vpop.f32.mrf.mxu0 }
0x143c   : > { %v3448_v38 = vpop.f32.mrf.mxu0 }
0x143d   : > { %3623 = vrot.lane.b32.xlu0 %v3448_v38, %s7680_s20 }
0x143e   : > { %v5633_v39 = vpop.f32.mrf.mxu0 }
0x1440   : > { %v3614_v40 = vpop.f32.mrf.mxu0 }
0x1441   : > { %3627 = vrot.lane.b32.xlu1 %v3614_v40, %s7681_s5  ;;  %v7366_v40 = vld [vmem:[%s7563_s14 + $0x4] sm:$0x7] }
0x1442   : > { %v5643_v41 = vpop.f32.mrf.mxu0 }
0x1443   : > { %v3709_v41 = vrot.slane %v7366_v40, %v7091_v56 }
0x145c   : > { %2850 = vadd.xlane.f32.xlu0 %v2849_v45 }
0x147e   : > { %v3620_v46 = vpop.permute.xlu1 %3619 }
0x147f   : > { %v3630_v47 = vsel %vm1029_vm2, %v3116_v33, %v3620_v46 }
0x14af   : > { %v3624_v0 = vpop.permute.xlu0 %3623 }
0x14b0   : > { %v3631_v48 = vsel %vm1703_vm3, %v3630_v47, %v3624_v0 }
0x14b3   : > { %v3628_v49 = vpop.permute.xlu1 %3627 }
0x14b4   : > { %v3632_v50 = vsel %vm1705_vm4, %v3631_v48, %v3628_v49 }
0x14b5   : > { %v3633_v51 = vpack.c.bf16 %v3632_v50, %v3632_v50 }
0x14b7   : > { %5649 = vmatmul.mubr.msk.bf16.vlgmr.msra.gmra.mxu1 %vm982_vm1, %v3633_v51 }
0x14b8   : > { %5664 = vmatprep.mubr.msk.bf16.mxu1 %vm6540_vm0, %v6539_v1 }
0x14e5   : > { %v2851_v9 = vpop.xlane.xlu0 %2850 }
0x14e6   : > { %v2852_v32 = vmul.f32 0.03125, %v2851_v9 }
0x14e8   : > { %v2853_v52 = vsub.f32 %v2848_v44, %v2852_v32  ;;  %v3724_v44 = vrot.slane %v7373_v42, %v7091_v56 }
0x14ea   : > { %v2854_v53 = vmul.f32 %v2853_v52, %v2853_v52  ;;  %v2863_v29 = vmul.f32 %v2862_v27, %v2853_v52 }
0x14ec   : > { %v2855_v54 = vsel %vm982_vm1, %v2854_v53, 0.0 }
0x14ed   : > { %2856 = vadd.xlane.f32.xlu0 %v2855_v54 }
0x1576   : > { %v2857_v18 = vpop.xlane.xlu0 %2856 }
0x1577   : > { %v3689_v60 = vpop.f32.mrf.mxu1  ;;  %v2858_v19 = vmul.f32 0.032258064, %v2857_v18 }
0x1578   : > { %v3690_v62 = vadd.f32 %v5285_v58, %v3689_v60 }
0x1579   : > { %v5650_v63 = vpop.f32.mrf.mxu1  ;;  %6024 = vrsqrt.f32 %v2858_v19  ;;  %vm2866_vm10 = vcmp.eq.f32.partialorder %v2858_v19, inf  ;;  %v2869_v24 = vand.u32 2147483648, %v2858_v19  ;;  %vm2868_vm11 = vcmp.eq.f32.partialorder %v2858_v19, 0.0 }
0x157a   : > { %v3695_v3 = vadd.f32 %v6060_v2, %v3690_v62 }
0x157b   : > { %v3692_v6 = vpop.f32.mrf.mxu1 }
0x157c   : > { %v3696_v7 = vsel %vm982_vm1, %v3695_v3, 0.0 }
0x157d   : > { %3697 = vadd.xlane.f32.xlu1 %v3696_v7  ;;  %v5651_v8 = vpop.f32.mrf.mxu1 }
0x1586   : > { %v6025_v20 = vpop.eup %6024 }
0x1587   : > { %v2865_v21 = vmul.f32 %v6025_v20, %v2858_v19 }
0x1589   : > { %v2867_v23 = vsel %vm2866_vm10, %v2858_v19, %v2865_v21 }
0x158a   : > { %v2870_v22 = vsel %vm2868_vm11, %v2869_v24, %v2867_v23 }
0x158b   : > { %v2871_v25 = vadd.f32 1e-06, %v2870_v22 }
0x158d   : > { %6026 = vrcp.f32 %v2871_v25 }
0x158e   : > { %3805 = vrot.lane.b32.xlu1 %v5958_v10, %s7683_s19 }
0x1592   : > { %3809 = vrot.lane.b32.xlu1 %v5293_v17, %s7683_s19 }
0x159a   : > { %v6027_v28 = vpop.eup %6026 }
0x159b   : > { %v2873_v30 = vmul.f32 %v6027_v28, %v2863_v29 }
0x159d   : > { %v2878_v35 = vadd.f32 %v2877_v31, %v2873_v30 }
0x159f   : > { %v3741_v4 = vpack.c.bf16 %v2878_v35, %v2878_v35 }
0x1606   : > { %v3698_v12 = vpop.xlane.xlu1 %3697 }
0x1607   : > { %v3699_v13 = vmul.f32 0.03125, %v3698_v12 }
0x1609   : > { %v3700_v14 = vsub.f32 %v3695_v3, %v3699_v13 }
0x160a   : > { %v3806_v16 = vpop.permute.xlu1 %3805 }
0x160b   : > { %v3701_v5 = vmul.f32 %v3700_v14, %v3700_v14  ;;  %5661 = vmatpush3.bf16.msra.mxu1 %v3806_v16  ;;  %v3710_v43 = vmul.f32 %v3709_v41, %v3700_v14 }
0x160c   : > { %5662 = vmatprep.subr.bf16.mxu1 %v6539_v1 }
0x160d   : > { %v3702_v15 = vsel %vm982_vm1, %v3701_v5, 0.0 }
0x160e   : > { %3703 = vadd.xlane.f32.xlu0 %v3702_v15  ;;  %v3810_v48 = vpop.permute.xlu1 %3809 }
0x1624   : > { %3803 = vrot.lane.b32.xlu0 %v5959_v11, %s7683_s19 }
0x1697   : > { %v3704_v33 = vpop.xlane.xlu0 %3703 }
0x1698   : > { %v3705_v34 = vmul.f32 0.032258064, %v3704_v33 }
0x169a   : > { %6028 = vrsqrt.f32 %v3705_v34  ;;  %vm3713_vm12 = vcmp.eq.f32.partialorder %v3705_v34, inf  ;;  %v3716_v37 = vand.u32 2147483648, %v3705_v34  ;;  %vm3715_vm13 = vcmp.eq.f32.partialorder %v3705_v34, 0.0 }
0x169b   : > { %v3804_v36 = vpop.permute.xlu0 %3803 }
0x169c   : > { %5663 = vmatpush3.bf16.msra.mxu1 %v3804_v36 }
0x169d   : > { %5678 = vmatprep.subr.mxu1 %v6539_v1 }
0x169f   : > { %5665 = vmatmul.mubr.msk.bf16.vlgmr.msra.gmra.mxu1 %vm982_vm1, %v3741_v4 }
0x16a0   : > { %5680 = vmatprep.mubr.msk.f32.mxu1 %vm6540_vm0, %v6539_v1 }
0x16a7   : > { %v6029_v55 = vpop.eup %6028 }
0x16a8   : > { %v3712_v57 = vmul.f32 %v6029_v55, %v3705_v34 }
0x16aa   : > { %v3714_v38 = vsel %vm3713_vm12, %v3705_v34, %v3712_v57 }
0x16ab   : > { %v3717_v59 = vsel %vm3715_vm13, %v3716_v37, %v3714_v38 }
0x16ac   : > { %v3718_v39 = vadd.f32 1e-06, %v3717_v59 }
0x16ae   : > { %6030 = vrcp.f32 %v3718_v39 }
0x16bb   : > { %v6031_v45 = vpop.eup %6030 }
0x16bc   : > { %v3720_v46 = vmul.f32 %v6031_v45, %v3710_v43 }
0x16be   : > { %v7377_v0 = vadd.f32 %v3724_v44, %v3720_v46 }
0x16c0   : > { %v3740_v47 = vpack.c.bf16 %v7377_v0, %v7377_v0 }
0x16c2   : > { %5657 = vmatmul.mubr.msk.bf16.vlgmr.msra.gmra.mxu0 %vm982_vm1, %v3740_v47 }
0x16c3   : > { %5670 = vmatprep.mubr.msk.f32.mxu0 %vm6540_vm0, %v6539_v1 }
0x175f   : > { %v3849_v49 = vpop.f32.mrf.mxu1 }
0x1760   : > { %v7384_v50 = vadd.f32 %v3849_v49, %v3810_v48 }
0x1761   : > { %v5666_v51 = vpop.f32.mrf.mxu1 }
0x1762   : > { %4021 = vrot.lane.b32.xlu1 %v7384_v50, %s7684_s22  ;;  %5669 = vmatpush3.xpose.msk.msra.mxu0 %vm1029_vm2, %v7384_v50 }
0x1763   : > { %v3852_v56 = vpop.f32.mrf.mxu1  ;;  %5673 = vmatprep.subr.mxu0 %v6539_v1 }
0x1765   : > { %v5667_v9 = vpop.f32.mrf.mxu1 }
0x1766   : > { %4187 = vrot.lane.b32.xlu1 %v7384_v50, %s7685_s24 }
0x176a   : > { %4353 = vrot.lane.b32.xlu1 %v7384_v50, %s7686_s29 }
0x1782   : > { %v3797_v32 = vpop.f32.mrf.mxu0 }
0x1783   : > { %v3798_v52 = vadd.f32 %v5293_v17, %v3797_v32 }
0x1784   : > { %v5658_v53 = vpop.f32.mrf.mxu0 }
0x1785   : > { %4019 = vrot.lane.b32.xlu0 %v3798_v52, %s7684_s22  ;;  %5671 = vmatmul.mubr.msk.f32.vlgmr.msra.gmra.mxu0 %vm1029_vm2, %v3798_v52  ;;  %s4960_s22 = scalar_lea.sflag [#allocation5], %s6912_s11 }
0x1786   : > { %v3800_v54 = vpop.f32.mrf.mxu0  ;;  %5675 = vmatprep.mubr.msk.f32.mxu0 %vm6540_vm0, %v6539_v1 }
0x1788   : > { %v5659_v58 = vpop.f32.mrf.mxu0 }
0x1789   : > { %4185 = vrot.lane.b32.xlu0 %v3798_v52, %s7685_s24 }
0x178d   : > { %4351 = vrot.lane.b32.xlu0 %v3798_v52, %s7686_s29 }
0x17d4   : > { %v4022_v60 = vpop.permute.xlu1 %4021 }
0x17d5   : > { %5679 = vmatpush3.xpose.msk.msra.mxu1 %vm1029_vm2, %v4022_v60 }
0x17d6   : > { %5688 = vmatprep.subr.mxu1 %v6539_v1 }
0x17d8   : > { %v4188_v62 = vpop.permute.xlu1 %4187 }
0x17dc   : > { %v4354_v3 = vpop.permute.xlu1 %4353 }
0x17f7   : > { %v4020_v63 = vpop.permute.xlu0 %4019 }
0x17f8   : > { %5681 = vmatmul.mubr.msk.f32.vlgmr.msra.gmra.mxu1 %vm1029_vm2, %v4020_v63  ;;  %v5960_v63 = vld [vmem:[#allocation11 + $0x18] sm:$0xff]  }
0x17f9   : > { %5689 = vmatpush3.xpose.msk.msra.mxu1 %vm1029_vm2, %v4188_v62  ;;  %5690 = vmatprep.mubr.msk.f32.mxu1 %vm6540_vm0, %v6539_v1 }
0x17fa   : > { %5698 = vmatprep.subr.mxu1 %v6539_v1 }
0x17fb   : > { %v4186_v2 = vpop.permute.xlu0 %4185 }
0x17fc   : > { %5691 = vmatmul.mubr.msk.f32.vlgmr.msra.gmra.mxu1 %vm1029_vm2, %v4186_v2  ;;  %v5961_v2 = vld [vmem:[#allocation11 + $0x10] sm:$0xff]  }
0x17fd   : > { %5699 = vmatpush3.xpose.msk.msra.mxu1 %vm1029_vm2, %v4354_v3  ;;  %5700 = vmatprep.mubr.msk.f32.mxu1 %vm6540_vm0, %v6539_v1 }
0x17fe   : > { %5708 = vmatprep.subr.bf16.mxu1 %v6539_v1 }
0x17ff   : > { %v4352_v6 = vpop.permute.xlu0 %4351 }
0x1800   : > { %5701 = vmatmul.mubr.msk.f32.vlgmr.msra.gmra.mxu1 %vm1029_vm2, %v4352_v6 }
0x1801   : > { %5712 = vmatprep.mubr.msk.bf16.mxu1 %vm6540_vm0, %v6539_v1  ;;  %5709 = vmatpush3.bf16.msra.mxu1 %v5960_v63 }
0x1802   : > { %5710 = vmatprep.subr.bf16.mxu1 %v6539_v1 }
0x1805   : > { %5711 = vmatpush3.bf16.msra.mxu1 %v5961_v2 }
0x1806   : > { %5724 = vmatprep.subr.bf16.mxu1 %v6539_v1 }
0x1845   : > { %v3927_v7 = vpop.f32.mrf.mxu0 }
0x1846   : > { %v3931_v8 = vmul.f32 0.35355338, %v3927_v7 }
0x1847   : > { %v5672_v10 = vpop.f32.mrf.mxu0 }
0x1848   : > { %v3932_v11 = vsel %vm1029_vm2, %v3931_v8, -inf }
0x1849   : > { %3933 = vmax.xlane.f32.xlu1 %v3932_v11 }
0x18b8   : > { %v4093_v12 = vpop.f32.mrf.mxu1 }
0x18b9   : > { %v4097_v13 = vmul.f32 0.35355338, %v4093_v12 }
0x18ba   : > { %v5682_v14 = vpop.f32.mrf.mxu1 }
0x18bb   : > { %v4098_v5 = vsel %vm1029_vm2, %v4097_v13, -inf }
0x18bc   : > { %4099 = vmax.xlane.f32.xlu0 %v4098_v5  ;;  %v4259_v15 = vpop.f32.mrf.mxu1 }
0x18bd   : > { %v4263_v16 = vmul.f32 0.35355338, %v4259_v15 }
0x18be   : > { %v5692_v17 = vpop.f32.mrf.mxu1 }
0x18bf   : > { %v4264_v18 = vsel %vm1029_vm2, %v4263_v16, -inf }
0x18c0   : > { %4265 = vmax.xlane.f32.xlu0 %v4264_v18  ;;  %v4425_v19 = vpop.f32.mrf.mxu1  ;;  %v5310_v18 = vld [vmem:[#allocation12 + $0x1] ss:$0 sm:$0xff] }
0x18c1   : > { %v4429_v20 = vmul.f32 0.35355338, %v4425_v19 }
0x18c2   : > { %v5702_v21 = vpop.f32.mrf.mxu1 }
0x18c3   : > { %v4430_v23 = vsel %vm1029_vm2, %v4429_v20, -inf }
0x18c4   : > { %4431 = vmax.xlane.f32.xlu1 %v4430_v23 }
0x18d2   : > { %v3934_v24 = vpop.xlane.xlu1 %3933 }
0x18d3   : > { %v3935_v22 = vsub.f32 %v3931_v8, %v3934_v24 }
0x18d5   : > { %v3936_v25 = vmul.f32 1.442695, %v3935_v22  ;;  %4109 = vrot.lane.b32.xlu1 %v7384_v50, %s7682_s23  ;;  %s7692_s23 = sld [smem:[#allocation55_spill]] }
0x18d7   : > { %6032 = vpow2.f32 %v3936_v25 }
0x18e4   : > { %v6033_v27 = vpop.eup %6032 }
0x18e5   : > { %v3938_v28 = vsel %vm1029_vm2, %v6033_v27, 0.0 }
0x18e6   : > { %3939 = vadd.xlane.f32.xlu0 %v3938_v28 }
0x18fc   : > { %3943 = vrot.lane.b32.xlu0 %v7384_v50, %s7683_s19 }
0x1945   : > { %v4100_v29 = vpop.xlane.xlu0 %4099 }
0x1946   : > { %v4101_v30 = vsub.f32 %v4097_v13, %v4100_v29 }
0x1948   : > { %v4102_v31 = vmul.f32 1.442695, %v4101_v30 }
0x1949   : > { %v4266_v33 = vpop.xlane.xlu0 %4265 }
0x194a   : > { %6034 = vpow2.f32 %v4102_v31  ;;  %v4267_v34 = vsub.f32 %v4263_v16, %v4266_v33  ;;  %v5962_v33 = vld [vmem:[%s7559_s10 + $0x18] sm:$0xff]  }
0x194c   : > { %v4268_v35 = vmul.f32 1.442695, %v4267_v34  ;;  %v5964_v34 = vld [vmem:[%s7561_s12 + $0x38] sm:$0xff]  }
0x194d   : > { %v4432_v36 = vpop.xlane.xlu1 %4431 }
0x194e   : > { %6036 = vpow2.f32 %v4268_v35  ;;  %v4433_v4 = vsub.f32 %v4429_v20, %v4432_v36  ;;  %v5965_v35 = vld [vmem:[%s7561_s12 + $0x30] sm:$0xff]  }
0x1950   : > { %v4434_v55 = vmul.f32 1.442695, %v4433_v4 }
0x1951   : > { %v4110_v47 = vpop.permute.xlu1 %4109 }
0x1952   : > { %6038 = vpow2.f32 %v4434_v55 }
0x1957   : > { %v6035_v57 = vpop.eup %6034 }
0x1958   : > { %v4104_v37 = vsel %vm1029_vm2, %v6035_v57, 0.0 }
0x1959   : > { %4105 = vadd.xlane.f32.xlu1 %v4104_v37 }
0x195b   : > { %v6037_v38 = vpop.eup %6036 }
0x195c   : > { %v4270_v59 = vsel %vm1029_vm2, %v6037_v38, 0.0 }
0x195d   : > { %4271 = vadd.xlane.f32.xlu0 %v4270_v59 }
0x195f   : > { %v6039_v39 = vpop.eup %6038 }
0x1960   : > { %v4436_v41 = vsel %vm1029_vm2, %v6039_v39, 0.0 }
0x1961   : > { %4437 = vadd.xlane.f32.xlu1 %v4436_v41  ;;  %v4608_v41 = vrot.slane %v7366_v40, %v7209_v61 }
0x196f   : > { %v3940_v43 = vpop.xlane.xlu0 %3939 }
0x1970   : > { %6040 = vrcp.f32 %v3940_v43 }
0x1972   : > { %4275 = vrot.lane.b32.xlu1 %v7384_v50, %s7677_s1  ;;  %s5341_s1 = sshll.u32 %s6706_s0, 4  ;;  %s6556_s0 = smov [#allocation26]  }
0x1973   : > { %4441 = vrot.lane.b32.xlu0 %v7384_v50, %s7678_s7  ;;  %v3944_v44 = vpop.permute.xlu0 %3943  ;;  %s943_s7 = scalar_lea.vmem [#allocation26], %s6912_s11  ;;  %s7512_s19 = scalar_lea.hbm %s7692_s23, %s5341_s1 }
0x1974   : > { %5674 = vmatpush3.msra.mxu0 %v3944_v44  ;;  %v4623_v44 = vrot.slane %v7373_v42, %v7209_v61  ;;  %v5967_v61 = vld [vmem:[%s7561_s12 + $0x20] sm:$0xff]   ;;  %s6431_s29 = sshll.u32 %s6556_s0, 4  ;;  %s6432_s29 = int_to_ptr.vmem [resolvable:$false] %s6431_s29 }
0x1975   : > { %5683 = vmatprep.subr.mxu0 %v6539_v1  ;;  %s6433_s8 = scalar_lea.vmem %s6432_s29, 32 }
0x197d   : > { %v6041_v45 = vpop.eup %6040 }
0x197e   : > { %v3942_v46 = vmul.f32 %v6041_v45, %v6033_v27 }
0x1980   : > { %5676 = vmatmul.mubr.msk.f32.vlgmr.msra.gmra.mxu0 %vm1029_vm2, %v3942_v46 }
0x1981   : > { %5684 = vmatpush3.msra.mxu0 %v4110_v47  ;;  %5685 = vmatprep.mubr.msk.f32.mxu0 %vm6540_vm0, %v6539_v1 }
0x1982   : > { %5693 = vmatprep.subr.mxu0 %v6539_v1 }
0x19e2   : > { %v4106_v48 = vpop.xlane.xlu1 %4105 }
0x19e3   : > { %6042 = vrcp.f32 %v4106_v48 }
0x19e6   : > { %v4272_v49 = vpop.xlane.xlu0 %4271 }
0x19e7   : > { %6044 = vrcp.f32 %v4272_v49  ;;  %v5966_v49 = vld [vmem:[%s7561_s12 + $0x28] sm:$0xff]  }
0x19ea   : > { %v4438_v50 = vpop.xlane.xlu1 %4437  ;;  %v4442_v53 = vpop.permute.xlu0 %4441 }
0x19eb   : > { %6046 = vrcp.f32 %v4438_v50  ;;  %v5318_v50 = vld [vmem:[#allocation14 + $0x1] ss:$0 sm:$0xff] }
0x19ee   : > { %v4276_v9 = vpop.permute.xlu1 %4275 }
0x19f0   : > { %v6043_v51 = vpop.eup %6042 }
0x19f1   : > { %v4108_v56 = vmul.f32 %v6043_v51, %v6035_v57 }
0x19f3   : > { %5686 = vmatmul.mubr.msk.f32.vlgmr.msra.gmra.mxu0 %vm1029_vm2, %v4108_v56 }
0x19f4   : > { %v6045_v32 = vpop.eup %6044  ;;  %5694 = vmatpush3.msra.mxu0 %v4276_v9  ;;  %5695 = vmatprep.mubr.msk.f32.mxu0 %vm6540_vm0, %v6539_v1 }
0x19f5   : > { %5703 = vmatprep.subr.mxu0 %v6539_v1  ;;  %v4274_v52 = vmul.f32 %v6045_v32, %v6037_v38 }
0x19f7   : > { %5696 = vmatmul.mubr.msk.f32.vlgmr.msra.gmra.mxu0 %vm1029_vm2, %v4274_v52 }
0x19f8   : > { %v6047_v54 = vpop.eup %6046  ;;  %5704 = vmatpush3.msra.mxu0 %v4442_v53  ;;  %5705 = vmatprep.mubr.msk.f32.mxu0 %vm6540_vm0, %v6539_v1 }
0x19f9   : > { %v4440_v58 = vmul.f32 %v6047_v54, %v6039_v39  ;;  %5716 = vmatprep.subr.bf16.mxu0 %v6539_v1 }
0x19fb   : > { %5706 = vmatmul.mubr.msk.f32.vlgmr.msra.gmra.mxu0 %vm1029_vm2, %v4440_v58  ;;  %v5330_v58 = vld [vmem:[#allocation15 + $0x1] ss:$0 sm:$0xff] }
0x19fc   : > { %5720 = vmatprep.mubr.msk.bf16.mxu0 %vm6540_vm0, %v6539_v1  ;;  %5717 = vmatpush3.bf16.msra.mxu0 %v5962_v33 }
0x19fd   : > { %5718 = vmatprep.subr.bf16.mxu0 %v6539_v1 }
0x1a40   : > { %v4015_v60 = vpop.f32.mrf.mxu0 }
0x1a42   : > { %v5677_v62 = vpop.f32.mrf.mxu0 }
0x1ab3   : > { %v4181_v3 = vpop.f32.mrf.mxu0 }
0x1ab4   : > { %4518 = vrot.lane.b32.xlu1 %v4181_v3, %s7679_s3  ;;  %s4972_s3 = sshll.u32 %s943_s7, 4  ;;  %s4973_s3 = int_to_ptr.vmem [resolvable:$true] %s4972_s3 }
0x1ab5   : > { %v5687_v6 = vpop.f32.mrf.mxu0  ;;  %s6427_s24 = scalar_lea.vmem %s4973_s3, 16  ;;  %p6434_p2 = scmp.lt.s32.totalorder %s4973_s3, %s6432_s29 }
0x1ab6   : > { %p6428_p6 = scmp.ne.s32.totalorder %s4973_s3, %s6427_s24  ;;  %p6435_p5 = scmp.lt.s32.totalorder %s6433_s8, %s6427_s24 }
0x1ab7   : > { %v4347_v7 = vpop.f32.mrf.mxu0 }
0x1ab8   : > { %4522 = vrot.lane.b32.xlu0 %v4347_v7, %s7680_s20  ;;  %p6429_p3 = pnand %p6428_p6, %p7693_p1  ;;  %p6436_p8 = por %p6435_p5, %p6434_p2 }
0x1ab9   : > { %v5697_v8 = vpop.f32.mrf.mxu0 }
0x1aba   : > { %p6430_p0 = pneg %p6429_p3 }
0x1abb   : > { %v4513_v10 = vpop.f32.mrf.mxu0 }
0x1abc   : > { %4526 = vrot.lane.b32.xlu1 %v4513_v10, %s7681_s5  ;;  %p6437_p10 = pnand %p6436_p8, %p6430_p0 }
0x1abd   : > { %v5707_v11 = vpop.f32.mrf.mxu0 }
0x1b26   : > { %v4519_v12 = vpop.permute.xlu1 %4518 }
0x1b27   : > { %v4529_v14 = vsel %vm1029_vm2, %v4015_v60, %v4519_v12 }
0x1b2a   : > { %v4523_v13 = vpop.permute.xlu0 %4522 }
0x1b2b   : > { %v4530_v5 = vsel %vm1703_vm3, %v4529_v14, %v4523_v13 }
0x1b2e   : > { %v4527_v15 = vpop.permute.xlu1 %4526 }
0x1b2f   : > { %v4531_v16 = vsel %vm1705_vm4, %v4530_v5, %v4527_v15 }
0x1b30   : > { %v4532_v17 = vpack.c.bf16 %v4531_v16, %v4531_v16 }
0x1b32   : > { %5713 = vmatmul.mubr.msk.bf16.vlgmr.msra.gmra.mxu1 %vm982_vm1, %v4532_v17 }
0x1b33   : > { %5732 = vmatprep.mubr.msk.bf16.mxu1 %vm6540_vm0, %v6539_v1  ;;  %5725 = vmatpush3.bf16.msra.mxu1 %v5964_v34 }
0x1b34   : > { %5726 = vmatprep.subr.bf16.mxu1 %v6539_v1 }
0x1b37   : > { %5727 = vmatpush3.bf16.msra.mxu1 %v5965_v35 }
0x1b38   : > { %5728 = vmatprep.subr.bf16.mxu1 %v6539_v1 }
0x1b3b   : > { %5729 = vmatpush3.bf16.msra.mxu1 %v5966_v49  ;;  %v4882_v49 = vld [vmem:[%s7691_s30] sm:$0xff] }
0x1b3c   : > { %5730 = vmatprep.subr.bf16.mxu1 %v6539_v1 }
0x1b3f   : > { %5731 = vmatpush3.bf16.msra.mxu1 %v5967_v61  ;;  %v4866_v61 = vld [vmem:[#allocation21] sm:$0xff] }
0x1bf2   : > { %v4588_v19 = vpop.f32.mrf.mxu1 }
0x1bf3   : > { %v4589_v20 = vadd.f32 %v5310_v18, %v4588_v19 }
0x1bf4   : > { %v5714_v21 = vpop.f32.mrf.mxu1 }
0x1bf5   : > { %v4594_v23 = vadd.f32 %v4589_v20, %v7377_v0  ;;  %v5963_v0 = vld [vmem:[%s7559_s10 + $0x10] sm:$0xff]   ;;  %v4794_v20 = vrot.slane %v7366_v40, %v7353_v26 }
0x1bf6   : > { %v4591_v24 = vpop.f32.mrf.mxu1  ;;  %5719 = vmatpush3.bf16.msra.mxu0 %v5963_v0 }
0x1bf7   : > { %v4595_v22 = vsel %vm982_vm1, %v4594_v23, 0.0  ;;  %5736 = vmatprep.subr.mxu0 %v6539_v1 }
0x1bf8   : > { %4596 = vadd.xlane.f32.xlu0 %v4595_v22  ;;  %v5715_v25 = vpop.f32.mrf.mxu1 }
0x1c81   : > { %v4597_v27 = vpop.xlane.xlu0 %4596 }
0x1c82   : > { %v4598_v28 = vmul.f32 0.03125, %v4597_v27 }
0x1c84   : > { %v4599_v29 = vsub.f32 %v4594_v23, %v4598_v28  ;;  %v4809_v23 = vrot.slane %v7373_v42, %v7353_v26 }
0x1c86   : > { %v4600_v30 = vmul.f32 %v4599_v29, %v4599_v29  ;;  %v4609_v43 = vmul.f32 %v4608_v41, %v4599_v29 }
0x1c88   : > { %v4601_v31 = vsel %vm982_vm1, %v4600_v30, 0.0 }
0x1c89   : > { %4602 = vadd.xlane.f32.xlu1 %v4601_v31 }
0x1d12   : > { %v4603_v36 = vpop.xlane.xlu1 %4602 }
0x1d13   : > { %v4604_v4 = vmul.f32 0.032258064, %v4603_v36 }
0x1d15   : > { %6048 = vrsqrt.f32 %v4604_v4  ;;  %vm4612_vm14 = vcmp.eq.f32.partialorder %v4604_v4, inf  ;;  %v4615_v37 = vand.u32 2147483648, %v4604_v4  ;;  %vm4614_vm15 = vcmp.eq.f32.partialorder %v4604_v4, 0.0 }
0x1d22   : > { %v6049_v55 = vpop.eup %6048 }
0x1d23   : > { %v4611_v57 = vmul.f32 %v6049_v55, %v4604_v4  ;;  %v5336_v55 = vld [vmem:[#allocation17] ss:$0 sm:$0xff] }
0x1d25   : > { %v4613_v38 = vsel %vm4612_vm14, %v4604_v4, %v4611_v57 }
0x1d26   : > { %v4616_v59 = vsel %vm4614_vm15, %v4615_v37, %v4613_v38  ;;  %v5337_v38 = vld [vmem:[#allocation18] ss:$0 sm:$0xff] }
0x1d27   : > { %v4617_v39 = vadd.f32 1e-06, %v4616_v59 }
0x1d29   : > { %6050 = vrcp.f32 %v4617_v39  ;;  %v5338_v39 = vld [vmem:[#allocation20] ss:$0 sm:$0xff] }
0x1d36   : > { %v6051_v45 = vpop.eup %6050 }
0x1d37   : > { %v4619_v46 = vmul.f32 %v6051_v45, %v4609_v43  ;;  %v6555_v45 = vmov 0  }
0x1d38   : > { %5939 = vset.pattern.permute.xlu0 %v6555_v45 }
0x1d39   : > { %v4624_v47 = vadd.f32 %v4623_v44, %v4619_v46  ;;  %v5339_v46 = vld [vmem:[#allocation2] ss:$0 sm:$0xff] }
0x1d3b   : > { %v4625_v48 = vpack.c.bf16 %v4624_v47, %v4624_v47 }
0x1d3d   : > { %5721 = vmatmul.mubr.msk.bf16.vlgmr.msra.gmra.mxu0 %vm982_vm1, %v4625_v48 }
0x1d3e   : > { %5738 = vmatprep.mubr.msk.f32.mxu0 %vm6540_vm0, %v6539_v1  ;;  %5737 = vmatpush3.msra.mxu0 %v4882_v49 }
0x1dfd   : > { %v4688_v51 = vpop.f32.mrf.mxu0 }
0x1dfe   : > { %v4689_v56 = vadd.f32 %v5318_v50, %v4688_v51 }
0x1dff   : > { %v5722_v9 = vpop.f32.mrf.mxu0 }
0x1e00   : > { %v4694_v32 = vmax.f32 %v4689_v56, 0.0 }
0x1e01   : > { %v4691_v52 = vpop.f32.mrf.mxu0 }
0x1e02   : > { %v4695_v53 = vpack.c.bf16 %v4694_v32, %v4694_v32 }
0x1e03   : > { %v5723_v54 = vpop.f32.mrf.mxu0 }
0x1e04   : > { %5733 = vmatmul.mubr.msk.bf16.vlgmr.msra.gmra.mxu1 %vm2804_vm9, %v4695_v53 }
0x1ec4   : > { %v4774_v60 = vpop.f32.mrf.mxu1 }
0x1ec5   : > { %v4775_v62 = vadd.f32 %v5330_v58, %v4774_v60  ;;  %v4880_v58 = vld [vmem:[#allocation23] sm:$0x1] }
0x1ec6   : > { %v5734_v63 = vpop.f32.mrf.mxu1 }
0x1ec7   : > { %v4780_v1 = vadd.f32 %v4775_v62, %v4624_v47  ;;  %v4883_v63 = vld [vmem:[#allocation24] sm:$0x1] }
0x1ec8   : > { %v4777_v2 = vpop.f32.mrf.mxu1 }
0x1ec9   : > { %v4781_v3 = vsel %vm982_vm1, %v4780_v1, 0.0 }
0x1eca   : > { %4782 = vadd.xlane.f32.xlu0 %v4781_v3  ;;  %v5735_v6 = vpop.f32.mrf.mxu1 }
0x1f53   : > { %v4783_v7 = vpop.xlane.xlu0 %4782 }
0x1f54   : > { %v4784_v8 = vmul.f32 0.03125, %v4783_v7 }
0x1f56   : > { %v4785_v10 = vsub.f32 %v4780_v1, %v4784_v8 }
0x1f58   : > { %v4786_v11 = vmul.f32 %v4785_v10, %v4785_v10  ;;  %v4795_v21 = vmul.f32 %v4794_v20, %v4785_v10 }
0x1f5a   : > { %v4787_v12 = vsel %vm982_vm1, %v4786_v11, 0.0 }
0x1f5b   : > { %4788 = vadd.xlane.f32.xlu0 %v4787_v12 }
0x1fe4   : > { %v4789_v13 = vpop.xlane.xlu0 %4788 }
0x1fe5   : > { %v4790_v14 = vmul.f32 0.032258064, %v4789_v13 }
0x1fe7   : > { %6052 = vrsqrt.f32 %v4790_v14  ;;  %vm4798_vm0 = vcmp.eq.f32.partialorder %v4790_v14, inf  ;;  %v4801_v16 = vand.u32 2147483648, %v4790_v14  ;;  %vm4800_vm3 = vcmp.eq.f32.partialorder %v4790_v14, 0.0 }
0x1ff4   : > { %v6053_v5 = vpop.eup %6052 }
0x1ff5   : > { %v4797_v15 = vmul.f32 %v6053_v5, %v4790_v14 }
0x1ff7   : > { %v4799_v17 = vsel %vm4798_vm0, %v4790_v14, %v4797_v15 }
0x1ff8   : > { %v4802_v18 = vsel %vm4800_vm3, %v4801_v16, %v4799_v17 }
0x1ff9   : > { %v4803_v19 = vadd.f32 1e-06, %v4802_v18 }
0x1ffb   : > { %6054 = vrcp.f32 %v4803_v19 }
0x2008   : > { %v6055_v24 = vpop.eup %6054 }
0x2009   : > { %v4805_v22 = vmul.f32 %v6055_v24, %v4795_v21 }
0x200b   : > { %v4810_v25 = vadd.f32 %v4809_v23, %v4805_v22 }
0x200d   : > { %v4813_v27 = vsel %vm982_vm1, %v4810_v25, 0.0 }
0x200e   : > { %4814 = vadd.xlane.f32.xlu1 %v4813_v27 }
0x2097   : > { %v4815_v28 = vpop.xlane.xlu1 %4814 }
0x2098   : > { %v4816_v29 = vmul.f32 0.03125, %v4815_v28 }
0x209a   : > { %v4817_v30 = vsub.f32 %v4810_v25, %v4816_v29 }
0x209c   : > { %v4818_v31 = vmul.f32 %v4817_v30, %v4817_v30  ;;  %v4829_v57 = vmul.f32 %v5336_v55, %v4817_v30 }
0x209e   : > { %v4819_v33 = vsel %vm982_vm1, %v4818_v31, 0.0 }
0x209f   : > { %4820 = vadd.xlane.f32.xlu0 %v4819_v33 }
0x2128   : > { %v4821_v0 = vpop.xlane.xlu0 %4820 }
0x2129   : > { %v4822_v34 = vmul.f32 0.032258064, %v4821_v0 }
0x212b   : > { %6056 = vrsqrt.f32 %v4822_v34  ;;  %vm4832_vm4 = vcmp.eq.f32.partialorder %v4822_v34, inf  ;;  %v4835_v26 = vand.u32 2147483648, %v4822_v34  ;;  %vm4834_vm5 = vcmp.eq.f32.partialorder %v4822_v34, 0.0 }
0x2138   : > { %v6057_v40 = vpop.eup %6056 }
0x2139   : > { %v4831_v35 = vmul.f32 %v6057_v40, %v4822_v34 }
0x213b   : > { %v4833_v42 = vsel %vm4832_vm4, %v4822_v34, %v4831_v35 }
0x213c   : > { %v4836_v36 = vsel %vm4834_vm5, %v4835_v26, %v4833_v42 }
0x213d   : > { %v4837_v4 = vadd.f32 1e-06, %v4836_v36 }
0x213f   : > { %6058 = vrcp.f32 %v4837_v4 }
0x214c   : > { %v6059_v37 = vpop.eup %6058 }
0x214d   : > { %v4839_v59 = vmul.f32 %v6059_v37, %v4829_v57 }
0x214f   : > { %v4846_v41 = vadd.f32 %v5337_v38, %v4839_v59 }
0x2151   : > { %v4854_v43 = vmul.f32 %v5338_v39, %v4846_v41 }
0x2153   : > { %v4855_v44 = vsel %vm982_vm1, %v4854_v43, 0.0  ;;  %vm4957_vm1 = vcmask 24576  }
0x2154   : > { %4856 = vadd.xlane.f32.xlu1 %v4855_v44 }
0x21dd   : > { %v4857_v47 = vpop.xlane.xlu1 %4856 }
0x21de   : > { %v4865_v48 = vadd.f32 %v5339_v46, %v4857_v47 }
0x21e0   : > { %4869 = vperm.xlu0 %5939, %v4865_v48  }
0x225b   : > { %v4870_v50 = vpop.permute.xlu0 %4869 }
0x225c   : > { %v4872_v51 = vmul.f32 %v4870_v50, %v4866_v61 }
0x225e   : > { %v4873_v56 = vsel %vm1029_vm2, %v4872_v51, 0.0 }
0x225f   : > { %v4874_v9 = vrot.slane %v4873_v56, 4 }
0x2261   : > { %v4875_v32 = vadd.f32 %v4874_v9, %v4873_v56 }
0x2263   : > { %v4876_v52 = vrot.slane %v4875_v32, 2 }
0x2265   : > { %v4877_v53 = vadd.f32 %v4876_v52, %v4875_v32 }
0x2267   : > { %v4878_v54 = vrot.slane %v4877_v53, 1 }
0x2269   : > { %v4879_v60 = vadd.f32 %v4878_v54, %v4877_v53 }
0x226b   : > { %v4881_v62 = vadd.f32 %v4880_v58, %v4879_v60 }
0x226d   : > { %5739 = vmatmul.mubr.msk.f32.vlgmr.msra.gmra.mxu0 %vm1029_vm2, %v4881_v62 }
0x232d   : > { %v4953_v1 = vpop.f32.mrf.mxu0 }
0x232e   : > { %v4954_v2 = vadd.f32 %v4953_v1, %v4883_v63 }
0x232f   : > { %v5740_v3 = vpop.f32.mrf.mxu0 }
0x2330   : > { %4958 = vst.msk [vmem:[%s943_s7] sm:$0x1] %vm4957_vm1, %v4954_v2 }
0x2331   : > { %6440 = shalt.err (!%p6437_p10)
}
0x2332   : > { %s6441_s18 = scalar_lea.hbm %s7512_s19, 16  ;;  %s6445_s16 = scalar_lea.hbm %s7692_s23, 32 }
0x2333   : > { %p6442_p11 = scmp.ne.s32.totalorder %s7512_s19, %s6441_s18  ;;  %p6446_p13 = scmp.lt.s32.totalorder %s7512_s19, %s7692_s23 }
0x2334   : > { %p6447_p7 = scmp.lt.s32.totalorder %s6445_s16, %s6441_s18 }
0x2335   : > { %p6443_p4 = pnand %p6442_p11, %p7693_p1 }
0x2336   : > { %p6448_p9 = por %p6447_p7, %p6446_p13 }
0x2337   : > { %p6444_p12 = pneg %p6443_p4 }
0x2339   : > { %p6449_p6 = pnand %p6448_p9, %p6444_p12 }
0x233b   : > { %6452 = shalt.err (!%p6449_p6)
}
0x233c   : > { %5795 = dma.vmem_to_hbm [thread:$0]  (%p7693_p1), %s4973_s3, 16, %s7512_s19, %s4960_s22  }
0x233d PF: > { %s4984_s7 = sand.u32 1, %s6507_s27   ;;  %p7694_p3 = scmp.ne.s32.totalorder %s7654_s13, 0 }
0x233e   : > { %p7695_p0 = scmp.ge.s32.totalorder %s6519_s2, 2  ;;  %s4985_s20 = scalar_lea.sflag [#allocation5], %s4984_s7 }
0x2340   : > { %p5842_p2 = pnand %p7695_p0, %p7694_p3 }
0x2342   : > { %p5843_p5 = pneg %p5842_p2 }
0x2344   : > { %6502 = dma.done.wait (%p5843_p5), %s4985_s20, 16  }
0x2345   : > { %6504 = vsyncadd (%p5843_p5), %s4985_s20, 4294967280  ;;  %p46_p8 = scmp.ge.s32.totalorder %s6855_s25, 4   ;;  %s7696_s27 = smov %s6511_s28 }
0x2346   : > { %s7697_s28 = smov %s6515_s6  ;;  %s7698_s6 = smov %s6867_s17 }
0x2347   : > { %s7699_s2 = smov %s6855_s25  ;;  %48 = sbr.rel (!%p46_p8) target bundleno = 33 (0x21), region = 230 }
0x234c   :  { %4989 = vsyncpa [#allocation4], 1 }
0x234d   :  { %4991 = vsyncpa [#allocation4 + $0x1], 1 }
0x234e   :  { %4992 = vsyncpa [#allocation7], 1 }
0x234f   :  { %4993 = vsyncpa [#allocation10], 1 }
0x2350   :  { %4994 = vsyncpa [#allocation13], 1 }
0x2351   :  { %4995 = vsyncpa [#allocation16], 1 }
0x2352   :  { %4996 = vsyncpa [#allocation19], 1 }
0x2353   :  { %4997 = vsyncpa [#allocation22], 1 }
0x2354   :  { %4998 = vsyncpa [#allocation25], 1 }
0x2355   :  { %4999 = vsyncpa [#allocation5], 1 }
0x2356   :  { %5001 = vsyncpa [#allocation5 + $0x1], 1 }

</bundles_post_ra>
